<compile_context>
chip_gen: v6e
topology: v6e:2x2x1
jax: 0.10.0
libtpu: 0.0.40
codegen_flags: <defaults>
</compile_context>

<pallas_src>
import functools
import math

import jax
import jax.numpy as jnp
from jax import lax
from jax.experimental import pallas as pl
from jax.experimental.pallas import tpu as pltpu


def _fused_attn_kernel(scale, x_ref, wqkv_ref, bqkv_ref, wout_ref, bout_ref,
                       out_ref, attn_ref, v_scratch, scores_acc):
    """Row-tiled reduction over N; full attention + output proj on last step."""
    i = pl.program_id(0)
    TM, D = x_ref.shape
    N = v_scratch.shape[0]

    @pl.when(i == 0)
    def _():
        scores_acc[...] = jnp.zeros_like(scores_acc)

    # qkv projection for this row tile: (TM, D) @ (D, 3D) + (1, 3D)
    qkv = jnp.dot(x_ref[...], wqkv_ref[...],
                  preferred_element_type=jnp.float32) + bqkv_ref[...]
    q = qkv[:, 0 * D:1 * D]                                   # (TM, D)
    k = qkv[:, 1 * D:2 * D]                                   # (TM, D)
    v = qkv[:, 2 * D:3 * D]                                   # (TM, D)

    # Stash v rows in VMEM (no HBM round-trip); sublane-aligned dynamic store.
    row0 = pl.multiple_of(i * TM, TM)
    v_scratch[pl.ds(row0, TM), :] = v

    # scores[d1, d2] += sum_n q[n, d1] * k[n, d2]   (== q.T @ k), shape (D, D)
    scores_acc[...] += lax.dot_general(q, k, (((0,), (0,)), ((), ())),
                                       preferred_element_type=jnp.float32)

    @pl.when(i == pl.num_programs(0) - 1)
    def _():
        # Scale applied once to the (D, D) scores (not per-step on q).
        s = scores_acc[...] * scale
        m = jnp.max(s, axis=-1, keepdims=True)
        e = jnp.exp(s - m)
        denom = jnp.sum(e, axis=-1, keepdims=True)
        # Exact EUP reciprocal (approx=True would risk the 1e-4 tolerance).
        attn = e * pl.reciprocal(denom, approx=False)
        attn_ref[...] = attn
        # TODO(synk): attn_dropout implemented as identity (eval-mode dropout).

        # out_dn[d, n] = sum_d2 attn[d, d2] * v[n, d2]    -> (D, N), M = 128
        out_dn = lax.dot_general(attn, v_scratch[...], (((1,), (1,)), ((), ())),
                                 preferred_element_type=jnp.float32)
        # Flat reinterpretation (D, N) -> (N, D), matching torch's row-major
        # .reshape(B, S, D). Done exactly once per kernel (sub-microsecond
        # relayout vs. the MXU work below).
        out2 = jnp.reshape(out_dn, (N, D))
        # Output projection: (N, D) @ (D, D) + (1, D)
        out_ref[...] = jnp.dot(out2, wout_ref[...],
                               preferred_element_type=jnp.float32) + bout_ref[...]


def model_forward(x, wqkv_t, bqkv, wout_t, bout):
    """x: (B, S, D) float32. Weights pre-transposed to (in, out)."""
    B, S, D = x.shape
    N = B * S
    x2 = x.reshape(N, D)
    scale = 1.0 / math.sqrt(N)      # k.size(-1) == N in the torch module

    TM = min(512, N)
    assert N % TM == 0, "N must be divisible by the row tile"
    grid = N // TM

    # VMEM guard: v scratch + resident out block must stay small.
    # TODO(synk): for very large N (v7x 64 MiB VMEM), block v / out over an
    # inner axis and split the score reduction across the two TensorCores.
    assert N * D * 4 <= 8 * 1024 * 1024, "v scratch too large for this layout"

    out2, attn = pl.pallas_call(
        functools.partial(_fused_attn_kernel, scale),
        out_shape=(jax.ShapeDtypeStruct((N, D), jnp.float32),
                   jax.ShapeDtypeStruct((D, D), jnp.float32)),
        grid_spec=pltpu.PrefetchScalarGridSpec(
            num_scalar_prefetch=0,
            grid=(grid,),
            in_specs=[
                pl.BlockSpec((TM, D), lambda i: (i, 0)),        # x row tile
                pl.BlockSpec((D, 3 * D), lambda i: (0, 0)),     # Wqkv (resident)
                pl.BlockSpec((1, 3 * D), lambda i: (0, 0)),     # bqkv
                pl.BlockSpec((D, D), lambda i: (0, 0)),         # Wout (resident)
                pl.BlockSpec((1, D), lambda i: (0, 0)),         # bout
            ],
            out_specs=(
                pl.BlockSpec((N, D), lambda i: (0, 0)),         # out (written last step)
                pl.BlockSpec((D, D), lambda i: (0, 0)),         # attn (written last step)
            ),
            scratch_shapes=[
                pltpu.VMEM((N, D), jnp.float32),                # v kept on-chip
                pltpu.VMEM((D, D), jnp.float32),                # scores accumulator
            ],
        ),
        compiler_params=pltpu.CompilerParams(
            dimension_semantics=("arbitrary",)),                # reduction over N
    )(x2, wqkv_t, bqkv.reshape(1, 3 * D), wout_t, bout.reshape(1, D))

    # TODO(synk): bf16 operand casts (2x MXU on v6e/v7x) skipped to preserve
    # the 1e-4 accuracy target.
    return out2.reshape(B, S, D), attn


def ref_forward(x, wqkv_t, bqkv, wout_t, bout):
    """Pure-JAX replica of the PyTorch forward (eval-mode dropout)."""
    B, S, D = x.shape
    qkv = x @ wqkv_t + bqkv
    q, k, v = jnp.split(qkv, 3, axis=-1)
    q = q.reshape(-1, D).T                    # (D, N)
    k = k.reshape(-1, D).T                    # (D, N)
    v = v.reshape(-1, D).T                    # (D, N)
    scale = 1.0 / math.sqrt(k.shape[-1])      # k.size(-1) == N
    attn = jax.nn.softmax(q @ k.T * scale, axis=-1)
    out = attn @ v                            # (D, N)
    out = out.reshape(B, S, D)                # flat reinterpretation
    out = out @ wout_t + bout
    return out, attn


if __name__ == "__main__":
    # Small but lane-dense shapes: D = 128 fills all 128 lanes; N = B*S = 1024
    # gives a 2-step row-tiled grid (TM = 512).
    B, S, D = 4, 256, 128

    key = jax.random.PRNGKey(0)
    kx, kw1, kb1, kw2, kb2 = jax.random.split(key, 5)

    x = jax.random.normal(kx, (B, S, D), dtype=jnp.float32)

    # nn.Linear(D, 3D) / nn.Linear(D, D) init, stored pre-transposed (in, out).
    bound1 = 1.0 / math.sqrt(D)
    wqkv_t = jax.random.uniform(kw1, (D, 3 * D), jnp.float32, -bound1, bound1)
    bqkv = jax.random.uniform(kb1, (3 * D,), jnp.float32, -bound1, bound1)
    wout_t = jax.random.uniform(kw2, (D, D), jnp.float32, -bound1, bound1)
    bout = jax.random.uniform(kb2, (D,), jnp.float32, -bound1, bound1)

    out, attn = jax.jit(model_forward)(x, wqkv_t, bqkv, wout_t, bout)
    jax.block_until_ready((out, attn))

    with jax.default_matmul_precision("float32"):
        out_ref, attn_ref = ref_forward(x, wqkv_t, bqkv, wout_t, bout)

    assert out.shape == (B, S, D) and attn.shape == (D, D)
    assert jnp.allclose(out, out_ref, rtol=1e-4, atol=1e-4), \
        float(jnp.max(jnp.abs(out - out_ref)))
    assert jnp.allclose(attn, attn_ref, rtol=1e-4, atol=1e-4), \
        float(jnp.max(jnp.abs(attn - attn_ref)))

    print("KERNEL_OK")
</pallas_src>

<mosaic_0001>
module attributes {stable_mosaic.version = 11 : i64} {
  func.func @_fused_attn_kernel(%arg0: i32, %arg1: memref<512x128xf32, #tpu.memory_space<vmem>>, %arg2: memref<128x384xf32, #tpu.memory_space<vmem>>, %arg3: memref<1x384xf32, #tpu.memory_space<vmem>>, %arg4: memref<128x128xf32, #tpu.memory_space<vmem>>, %arg5: memref<1x128xf32, #tpu.memory_space<vmem>>, %arg6: memref<1024x128xf32, #tpu.memory_space<vmem>>, %arg7: memref<128x128xf32, #tpu.memory_space<vmem>>, %arg8: memref<1024x128xf32, #tpu.memory_space<vmem>>, %arg9: memref<128x128xf32, #tpu.memory_space<vmem>>) attributes {dimension_semantics = [#tpu.dimension_semantics<arbitrary>], iteration_bounds = array<i64: 2>, scalar_prefetch = 0 : i64, scratch_operands = 2 : i64, tpu.core_type = #tpu.core_type<tc>, window_params = [{transform_indices = @transform_0, window_bounds = array<i64: 512, 128>}, {pipeline_mode = #tpu.pipeline_mode<synchronous>, transform_indices = @transform_1, window_bounds = array<i64: 128, 384>}, {pipeline_mode = #tpu.pipeline_mode<synchronous>, transform_indices = @transform_2, window_bounds = array<i64: 1, 384>}, {pipeline_mode = #tpu.pipeline_mode<synchronous>, transform_indices = @transform_3, window_bounds = array<i64: 128, 128>}, {pipeline_mode = #tpu.pipeline_mode<synchronous>, transform_indices = @transform_4, window_bounds = array<i64: 1, 128>}, {pipeline_mode = #tpu.pipeline_mode<synchronous>, transform_indices = @transform_5, window_bounds = array<i64: 1024, 128>}, {pipeline_mode = #tpu.pipeline_mode<synchronous>, transform_indices = @transform_6, window_bounds = array<i64: 128, 128>}]} {
    %c0_i32 = arith.constant 0 : i32
    %0 = arith.cmpi eq, %arg0, %c0_i32 : i32
    %1 = arith.extui %0 : i1 to i32
    %c0_i32_0 = arith.constant 0 : i32
    %2 = arith.cmpi ne, %1, %c0_i32_0 : i32
    scf.if %2 {
      %cst_13 = arith.constant 0.000000e+00 : f32
      %23 = vector.broadcast %cst_13 : f32 to vector<128x128xf32>
      %c0_14 = arith.constant 0 : index
      %c0_15 = arith.constant 0 : index
      %24 = vector.load %arg9[%c0_14, %c0_15] : memref<128x128xf32, #tpu.memory_space<vmem>>, vector<128x128xf32>
      tpu.vector_store %arg9[%c0_14, %c0_15], %23 {strides = array<i32>} : memref<128x128xf32, #tpu.memory_space<vmem>>, vector<128x128xf32>,
    } else {
    }
    %c0 = arith.constant 0 : index
    %c0_1 = arith.constant 0 : index
    %3 = vector.load %arg1[%c0, %c0_1] : memref<512x128xf32, #tpu.memory_space<vmem>>, vector<512x128xf32>
    %c0_2 = arith.constant 0 : index
    %c0_3 = arith.constant 0 : index
    %4 = vector.load %arg2[%c0_2, %c0_3] : memref<128x384xf32, #tpu.memory_space<vmem>>, vector<128x384xf32>
    %cst = arith.constant dense<0.000000e+00> : vector<512x384xf32>
    %5 = tpu.matmul %3, %4, %cst {dimension_numbers = #tpu.dot_dimension_numbers<[1], [0], [0], [1], [0, 0, 1, 1], [], []>} : vector<512x128xf32>, vector<128x384xf32>, vector<512x384xf32> -> vector<512x384xf32>
    %c0_4 = arith.constant 0 : index
    %c0_5 = arith.constant 0 : index
    %6 = vector.load %arg3[%c0_4, %c0_5] : memref<1x384xf32, #tpu.memory_space<vmem>>, vector<1x384xf32>
    %7 = vector.broadcast %6 : vector<1x384xf32> to vector<512x384xf32>
    %8 = arith.addf %5, %7 : vector<512x384xf32>
    %9 = vector.extract_strided_slice %8 {offsets = [0, 0], sizes = [512, 128], strides = [1, 1]} : vector<512x384xf32> to vector<512x128xf32>
    %10 = vector.extract_strided_slice %8 {offsets = [0, 128], sizes = [512, 128], strides = [1, 1]} : vector<512x384xf32> to vector<512x128xf32>
    %11 = vector.extract_strided_slice %8 {offsets = [0, 256], sizes = [512, 128], strides = [1, 1]} : vector<512x384xf32> to vector<512x128xf32>
    %c512_i32 = arith.constant 512 : i32
    %12 = arith.muli %arg0, %c512_i32 : i32
    %13 = tpu.assume_multiple %12, 512 : i32
    %14 = arith.index_cast %13 : i32 to index
    %c0_6 = arith.constant 0 : index
    %15 = vector.load %arg8[%14, %c0_6] : memref<1024x128xf32, #tpu.memory_space<vmem>>, vector<512x128xf32>
    tpu.vector_store %arg8[%14, %c0_6], %11 {strides = array<i32>} : memref<1024x128xf32, #tpu.memory_space<vmem>>, vector<512x128xf32>,
    %c0_7 = arith.constant 0 : index
    %c0_8 = arith.constant 0 : index
    %16 = vector.load %arg9[%c0_7, %c0_8] : memref<128x128xf32, #tpu.memory_space<vmem>>, vector<128x128xf32>
    %cst_9 = arith.constant dense<0.000000e+00> : vector<128x128xf32>
    %17 = tpu.matmul %9, %10, %cst_9 {dimension_numbers = #tpu.dot_dimension_numbers<[0], [0], [1], [1], [0, 1, 1, 1], [], []>} : vector<512x128xf32>, vector<512x128xf32>, vector<128x128xf32> -> vector<128x128xf32>
    %18 = arith.addf %16, %17 : vector<128x128xf32>
    %c0_10 = arith.constant 0 : index
    %c0_11 = arith.constant 0 : index
    %19 = vector.load %arg9[%c0_10, %c0_11] : memref<128x128xf32, #tpu.memory_space<vmem>>, vector<128x128xf32>
    tpu.vector_store %arg9[%c0_10, %c0_11], %18 {strides = array<i32>} : memref<128x128xf32, #tpu.memory_space<vmem>>, vector<128x128xf32>,
    %c1_i32 = arith.constant 1 : i32
    %20 = arith.cmpi eq, %arg0, %c1_i32 : i32
    %21 = arith.extui %20 : i1 to i32
    %c0_i32_12 = arith.constant 0 : i32
    %22 = arith.cmpi ne, %21, %c0_i32_12 : i32
    scf.if %22 {
      %c0_13 = arith.constant 0 : index
      %c0_14 = arith.constant 0 : index
      %23 = vector.load %arg9[%c0_13, %c0_14] : memref<128x128xf32, #tpu.memory_space<vmem>>, vector<128x128xf32>
      %cst_15 = arith.constant 3.125000e-02 : f32
      %24 = vector.broadcast %cst_15 : f32 to vector<128x128xf32>
      %25 = arith.mulf %23, %24 : vector<128x128xf32>
      %cst_16 = arith.constant dense<0xFF800000> : vector<128xf32>
      %26 = vector.multi_reduction <maximumf>, %25, %cst_16 [1] : vector<128x128xf32> to vector<128xf32>
      %27 = vector.shape_cast %26 : vector<128xf32> to vector<128x1xf32>
      %28 = vector.broadcast %27 : vector<128x1xf32> to vector<128x128xf32>
      %29 = arith.subf %25, %28 : vector<128x128xf32>
      %30 = math.exp %29 : vector<128x128xf32>
      %cst_17 = arith.constant dense<0.000000e+00> : vector<128xf32>
      %31 = vector.multi_reduction <add>, %30, %cst_17 [1] : vector<128x128xf32> to vector<128xf32>
      %32 = vector.shape_cast %31 : vector<128xf32> to vector<128x1xf32>
      %33 = tpu.reciprocal %32 : vector<128x1xf32> -> vector<128x1xf32>
      %34 = vector.broadcast %33 : vector<128x1xf32> to vector<128x128xf32>
      %35 = arith.mulf %30, %34 : vector<128x128xf32>
      %c0_18 = arith.constant 0 : index
      %c0_19 = arith.constant 0 : index
      %36 = vector.load %arg7[%c0_18, %c0_19] : memref<128x128xf32, #tpu.memory_space<vmem>>, vector<128x128xf32>
      tpu.vector_store %arg7[%c0_18, %c0_19], %35 {strides = array<i32>} : memref<128x128xf32, #tpu.memory_space<vmem>>, vector<128x128xf32>,
      %c0_20 = arith.constant 0 : index
      %c0_21 = arith.constant 0 : index
      %37 = vector.load %arg8[%c0_20, %c0_21] : memref<1024x128xf32, #tpu.memory_space<vmem>>, vector<1024x128xf32>
      %cst_22 = arith.constant dense<0.000000e+00> : vector<128x1024xf32>
      %38 = tpu.matmul %35, %37, %cst_22 {dimension_numbers = #tpu.dot_dimension_numbers<[1], [1], [0], [0], [0, 0, 1, 0], [], []>} : vector<128x128xf32>, vector<1024x128xf32>, vector<128x1024xf32> -> vector<128x1024xf32>
      %39 = vector.shape_cast %38 : vector<128x1024xf32> to vector<1024x128xf32>
      %c0_23 = arith.constant 0 : index
      %c0_24 = arith.constant 0 : index
      %40 = vector.load %arg4[%c0_23, %c0_24] : memref<128x128xf32, #tpu.memory_space<vmem>>, vector<128x128xf32>
      %cst_25 = arith.constant dense<0.000000e+00> : vector<1024x128xf32>
      %41 = tpu.matmul %39, %40, %cst_25 {dimension_numbers = #tpu.dot_dimension_numbers<[1], [0], [0], [1], [0, 0, 1, 1], [], []>} : vector<1024x128xf32>, vector<128x128xf32>, vector<1024x128xf32> -> vector<1024x128xf32>
      %c0_26 = arith.constant 0 : index
      %c0_27 = arith.constant 0 : index
      %42 = vector.load %arg5[%c0_26, %c0_27] : memref<1x128xf32, #tpu.memory_space<vmem>>, vector<1x128xf32>
      %43 = vector.broadcast %42 : vector<1x128xf32> to vector<1024x128xf32>
      %44 = arith.addf %41, %43 : vector<1024x128xf32>
      %c0_28 = arith.constant 0 : index
      %c0_29 = arith.constant 0 : index
      %45 = vector.load %arg6[%c0_28, %c0_29] : memref<1024x128xf32, #tpu.memory_space<vmem>>, vector<1024x128xf32>
      tpu.vector_store %arg6[%c0_28, %c0_29], %44 {strides = array<i32>} : memref<1024x128xf32, #tpu.memory_space<vmem>>, vector<1024x128xf32>,
    } else {
    }
    return
  }
  func.func @transform_0(%arg0: i32) -> (i32, i32) {
    %c0_i32 = arith.constant 0 : i32
    %c0_i32_0 = arith.constant 0 : i32
    return %arg0, %c0_i32 : i32, i32
  }
  func.func @transform_1(%arg0: i32) -> (i32, i32) {
    %c0_i32 = arith.constant 0 : i32
    %c0_i32_0 = arith.constant 0 : i32
    %c0_i32_1 = arith.constant 0 : i32
    return %c0_i32, %c0_i32_0 : i32, i32
  }
  func.func @transform_2(%arg0: i32) -> (i32, i32) {
    %c0_i32 = arith.constant 0 : i32
    %c0_i32_0 = arith.constant 0 : i32
    %c0_i32_1 = arith.constant 0 : i32
    return %c0_i32, %c0_i32_0 : i32, i32
  }
  func.func @transform_3(%arg0: i32) -> (i32, i32) {
    %c0_i32 = arith.constant 0 : i32
    %c0_i32_0 = arith.constant 0 : i32
    %c0_i32_1 = arith.constant 0 : i32
    return %c0_i32, %c0_i32_0 : i32, i32
  }
  func.func @transform_4(%arg0: i32) -> (i32, i32) {
    %c0_i32 = arith.constant 0 : i32
    %c0_i32_0 = arith.constant 0 : i32
    %c0_i32_1 = arith.constant 0 : i32
    return %c0_i32, %c0_i32_0 : i32, i32
  }
  func.func @transform_5(%arg0: i32) -> (i32, i32) {
    %c0_i32 = arith.constant 0 : i32
    %c0_i32_0 = arith.constant 0 : i32
    %c0_i32_1 = arith.constant 0 : i32
    return %c0_i32, %c0_i32_0 : i32, i32
  }
  func.func @transform_6(%arg0: i32) -> (i32, i32) {
    %c0_i32 = arith.constant 0 : i32
    %c0_i32_0 = arith.constant 0 : i32
    %c0_i32_1 = arith.constant 0 : i32
    return %c0_i32, %c0_i32_0 : i32, i32
  }
}

</mosaic_0001>

<bundles_post_ra>
// kernel: model_forward.1
= control target key start
LH: loop header
LB: loop body
LE: loop exit
PB: predicated region body
PF: predicated region fallthrough
CT: control target
= control target key end

     0   :  { %12 = vsyncpa [#allocation5], 0  ;;  %s10587_s0 = inlined_call_operand.hbm [shape: f32[1024,128], index: 0, kind: input, shape index: {}]   ;;  %s10588_s1 = inlined_call_operand.hbm [shape: f32[128,384], index: 1, kind: input, shape index: {}]   ;;  %s10589_s2 = inlined_call_operand.vmem [shape: f32[1,384], index: 2, kind: input, shape index: {}]   ;;  %s10590_s3 = inlined_call_operand.hbm [shape: f32[128,128], index: 3, kind: input, shape index: {}]   ;;  %s10591_s4 = inlined_call_operand.vmem [shape: f32[1,128], index: 4, kind: input, shape index: {}]   ;;  %s10592_s5 = inlined_call_operand.hbm [shape: f32[1024,128], index: 5, kind: output, shape index: {0}]   ;;  %s10593_s6 = inlined_call_operand.hbm [shape: f32[128,128], index: 6, kind: output, shape index: {1}]  }
   0x1   :  { %14 = vsyncpa [#allocation5 + $0x1], 0 }
   0x2   :  { %15 = vsyncpa [#allocation8], 0 }
   0x3   :  { %16 = vsyncpa [#allocation6], 0 }
   0x4   :  { %17 = vsyncpa [#allocation12], 0  ;;  %s7805_s21 = smov 0   ;;  %s7807_s22 = smov 0  }
   0x5   :  { %s7809_s23 = smov 0   ;;  %s7811_s24 = smov 0  }
   0x6 LB: > { %s7824_s25 = sadd.s32 4294967295, %s7754_s24   ;;  %p43_p0 = scmp.ne.s32.totalorder %s7746_s22, %s7742_s21  ;;  %s7754_s24 = sphi %s7811_s24, %s10885_s24   ;;  %s7750_s23 = sphi %s7809_s23, %s10884_s23   ;;  %s7746_s22 = sphi %s7807_s22, %s10883_s22   ;;  %s7742_s21 = sphi %s7805_s21, %s10882_s21  }
   0x7   : > { %p10594_p1 = scmp.eq.s32.totalorder %s7824_s25, 0  ;;  %p6163_p2 = scmp.ge.s32.totalorder %s7754_s24, 1 }
   0x8   : > { %p180_p3 = scmp.lt.s32.totalorder %s7754_s24, 3  ;;  %s7756_s28 = smov [#allocation7]  }
   0x9   : > { %p7833_p5 = por %p10594_p1, %p43_p0  ;;  %s192_s29 = sshll.u32 %s7756_s28, 4  ;;  %s193_s29 = int_to_ptr.vmem [resolvable:$true] %s192_s29 }
   0xa   : > { %p7837_p6 = pnand %p6163_p2, %p180_p3  ;;  %s7757_s7 = smov [#allocation9]  }
   0xb   : > { %s10679_s26 = scalar_select %p7833_p5, 1, 0 }
   0xc   : > { %s10680_s27 = scalar_select %p7837_p6, 1, 0 }
   0xd   : > { %p7227_p7 = pneg %p7837_p6  ;;  %s208_s8 = sshll.u32 %s7757_s7, 4  ;;  %s209_s8 = int_to_ptr.vmem [resolvable:$true] %s208_s8 }
   0xe   : > { %s7591_s9 = scalar_lea.vmem %s193_s29, 6144  ;;  %p7599_p13 = scmp.lt.s32.totalorder %s193_s29, %s193_s29 }
   0xf   : > { %p7845_p8 = pnand %p7227_p7, %p10594_p1  ;;  %p7592_p10 = scmp.ne.s32.totalorder %s193_s29, %s7591_s9 }
  0x10   : > { %p7600_p0 = scmp.lt.s32.totalorder %s7591_s9, %s7591_s9 }
  0x11   : > { %p7582_p9 = pneg %p7845_p8 }
  0x12   : > { %p7601_p2 = por %p7600_p0, %p7599_p13 }
  0x13   : > { %p7594_p11 = pnand %p7592_p10, %p7582_p9 }
  0x15   : > { %p7595_p12 = pneg %p7594_p11 }
  0x17   : > { %p7602_p3 = pnand %p7601_p2, %p7595_p12 }
  0x19   : > { %7605 = shalt.err (!%p7602_p3)
}
  0x1a   : > { %s7758_s10 = smov 384   ;;  %s7759_s11 = smov 24  }
  0x1b   : > { %7230 = dma.hbm_to_vmem [thread:$0]  (!%p7845_p8), %s10588_s1, 6144, %s193_s29, [#allocation8], %s7758_s10, %s7758_s10, %s7759_s11  }
  0x1c   : > { %s7617_s14 = scalar_lea.vmem %s209_s8, 2048  ;;  %p7625_p4 = scmp.lt.s32.totalorder %s209_s8, %s209_s8 }
  0x1d   : > { %p7618_p7 = scmp.ne.s32.totalorder %s209_s8, %s7617_s14  ;;  %p7626_p1 = scmp.lt.s32.totalorder %s7617_s14, %s7617_s14 }
  0x1f   : > { %p7620_p10 = pnand %p7618_p7, %p7582_p9  ;;  %p7627_p13 = por %p7626_p1, %p7625_p4 }
  0x21   : > { %p7621_p11 = pneg %p7620_p10 }
  0x23   : > { %p7628_p12 = pnand %p7627_p13, %p7621_p11 }
  0x25   : > { %7631 = shalt.err (!%p7628_p12)
}
  0x26   : > { %s7760_s15 = smov 128   ;;  %s7761_s16 = smov 8  }
  0x27   : > { %7233 = dma.hbm_to_vmem [thread:$0]  (!%p7845_p8), %s10590_s3, 2048, %s209_s8, [#allocation8], %s7760_s15, %s7760_s15, %s7761_s16  }
  0x28   : > { %s7871_s19 = sadd.s32 1, %s7754_s24   ;;  %s30_s21 = sadd.s32 1, %s7750_s23 }
  0x29   : > { %s27_s20 = ssub.s32 %s7754_s24, %s7871_s19  ;;  %p37_p4 = scmp.ne.s32.totalorder %s7750_s23, %s7746_s22 }
  0x2a   : > { %p28_p1 = scmp.eq.s32.totalorder %s27_s20, 0  ;;  %p38_p9 = scmp.eq.s32.totalorder %s7754_s24, 0 }
  0x2b   : > { %p7240_p2 = scmp.lt.s32.totalorder %s7754_s24, 2  ;;  %s225_s29 = sand.u32 1, %s7750_s23  }
  0x2c   : > { %s7880_s28 = scalar_select %p28_p1, %s7750_s23, %s30_s21  }
  0x2d   : > { %p39_p0 = por %p38_p9, %p37_p4  ;;  %s6184_s30 = sshll.u32 %s7754_s24, 13 }
  0x2e   : > { %s6167_s7 = sshll.u32 %s225_s29, 9  ;;  %s7888_s11 = scalar_lea.hbm %s10587_s0, %s6184_s30 }
  0x2f   : > { %s229_s8 = scalar_lea.vmem [#allocation4], %s6167_s7  ;;  %p7890_p8 = pnand %p7240_p2, %p39_p0 }
  0x30   : > { %s236_s12 = sshll.u32 %s229_s8, 4  ;;  %s7896_s14 = scalar_lea.sflag [#allocation5], %s225_s29  ;;  %s7894_s12 = int_to_ptr.vmem [resolvable:$true] %s236_s12 }
  0x31   : > { %s7632_s24 = scalar_lea.hbm %s7888_s11, 8192  ;;  %p7634_p7 = pneg %p7890_p8 }
  0x32   : > { %p7633_p3 = scmp.ne.s32.totalorder %s7888_s11, %s7632_s24  ;;  %s7637_s20 = scalar_lea.hbm %s10587_s0, 16384 }
  0x33   : > { %p7638_p13 = scmp.lt.s32.totalorder %s7888_s11, %s10587_s0  ;;  %p7639_p12 = scmp.lt.s32.totalorder %s7637_s20, %s7632_s24 }
  0x34   : > { %p7635_p10 = pnand %p7634_p7, %p7633_p3 }
  0x35   : > { %p7640_p1 = por %p7639_p12, %p7638_p13 }
  0x36   : > { %p7636_p11 = pneg %p7635_p10 }
  0x38   : > { %p7641_p4 = pnand %p7640_p1, %p7636_p11 }
  0x3a   : > { %7644 = shalt.err (!%p7641_p4)
}
  0x3b   : > { %s7645_s29 = scalar_lea.vmem %s7894_s12, 8192  ;;  %s7762_s7 = smov [#allocation4]  }
  0x3c   : > { %p7646_p9 = scmp.ne.s32.totalorder %s7894_s12, %s7645_s29  ;;  %s7650_s9 = sshll.u32 %s7762_s7, 4  ;;  %s7651_s9 = int_to_ptr.vmem [resolvable:$false] %s7650_s9 }
  0x3d   : > { %s7652_s10 = scalar_lea.vmem %s7651_s9, 16384  ;;  %p7653_p3 = scmp.lt.s32.totalorder %s7894_s12, %s7651_s9 }
  0x3e   : > { %p7648_p0 = pnand %p7646_p9, %p7634_p7  ;;  %p7654_p10 = scmp.lt.s32.totalorder %s7652_s10, %s7645_s29 }
  0x40   : > { %p7649_p2 = pneg %p7648_p0  ;;  %p7655_p5 = por %p7654_p10, %p7653_p3 }
  0x42   : > { %p7656_p6 = pnand %p7655_p5, %p7649_p2 }
  0x44   : > { %7659 = shalt.err (!%p7656_p6)
}
  0x45   : > { %7237 = dma.hbm_to_vmem [thread:$0]  (!%p7890_p8), %s7888_s11, 8192, %s7894_s12, %s7896_s14, %s7760_s15, %s7760_s15, %s7761_s16  }
  0x46   : > { %p10683_p7 = scmp.ne.s32.totalorder %s10680_s27, 0 }
  0x48   : > { %248 = sbr.rel (%p10683_p7) target bundleno = 1897 (0x769), region = 40 }
  0x4d   : > { %s250_s8 = sand.u32 1, %s7746_s22   ;;  %p10684_p5 = scmp.ne.s32.totalorder %s10679_s26, 0 }
  0x4e   : > { %s6171_s24 = sshll.u32 %s250_s8, 9  ;;  %s251_s17 = scalar_lea.sflag [#allocation5], %s250_s8 }
  0x4f   : > { %s7923_s18 = scalar_lea.vmem [#allocation4], %s6171_s24 }
  0x50   : > { %7725 = dma.done.wait (%p10684_p5), %s251_s17, 8192  }
  0x51   : > { %7727 = vsyncadd (%p10684_p5), %s251_s17, 4294959104  ;;  %p10685_p6 = scmp.eq.s32.totalorder %s7824_s25, 0 }
  0x53   : > { %7729 = dma.done.wait (%p10685_p6), [#allocation8], 8192   ;;  %p10686_p8 = pmov %p10685_p6 }
  0x54   : > { %p10687_p11 = scmp.ne.s32.totalorder %s7824_s25, 0 }
  0x55   : > { %7731 = vsyncadd (%p10686_p8), [#allocation8], 4294959104 }
  0x56   : > { %290 = sbr.rel (%p10687_p11) target bundleno = 100 (0x64), region = 56 }
  0x5b   : > { %v7763_v0 = vmov 0.0  }
  0x5c   : > { %291 = vst [vmem:[#allocation3 + $0x30] sm:$0xff] %v7763_v0  ;;  %292 = vst [vmem:[#allocation3] sm:$0xff] %v7763_v0 }
  0x5d   : > { %293 = vst [vmem:[#allocation3 + $0x58] sm:$0xff] %v7763_v0  ;;  %294 = vst [vmem:[#allocation3 + $0x18] sm:$0xff] %v7763_v0 }
  0x5e   : > { %295 = vst [vmem:[#allocation3 + $0x50] sm:$0xff] %v7763_v0  ;;  %296 = vst [vmem:[#allocation3 + $0x68] sm:$0xff] %v7763_v0 }
  0x5f   : > { %297 = vst [vmem:[#allocation3 + $0x8] sm:$0xff] %v7763_v0  ;;  %298 = vst [vmem:[#allocation3 + $0x48] sm:$0xff] %v7763_v0 }
  0x60   : > { %299 = vst [vmem:[#allocation3 + $0x40] sm:$0xff] %v7763_v0  ;;  %300 = vst [vmem:[#allocation3 + $0x20] sm:$0xff] %v7763_v0 }
  0x61   : > { %301 = vst [vmem:[#allocation3 + $0x10] sm:$0xff] %v7763_v0  ;;  %302 = vst [vmem:[#allocation3 + $0x38] sm:$0xff] %v7763_v0 }
  0x62   : > { %303 = vst [vmem:[#allocation3 + $0x60] sm:$0xff] %v7763_v0  ;;  %304 = vst [vmem:[#allocation3 + $0x70] sm:$0xff] %v7763_v0 }
  0x63   : > { %305 = vst [vmem:[#allocation3 + $0x78] sm:$0xff] %v7763_v0  ;;  %306 = vst [vmem:[#allocation3 + $0x28] sm:$0xff] %v7763_v0 }
  0x64 PF: > { %v417_v1 = vld [vmem:[#allocation7 + $0x170] sm:$0xff]  ;;  %v416_v2 = vld [vmem:[#allocation7 + $0x168] sm:$0xff]  ;;  %v414_v3 = vld [vmem:[#allocation7 + $0x158] sm:$0xff]  ;;  %v7764_v5 = vmov 0.0   ;;  %s6175_s15 = sshll.u32 %s7824_s25, 9  ;;  %p6176_p13 = scmp.ne.s32.totalorder %s7824_s25, 1 }
  0x65   : > { %436 = vmatprep.subr.mxu0 %v417_v1  ;;  %v413_v4 = vld [vmem:[#allocation7 + $0x150] sm:$0xff]  ;;  %500 = vmatprep.mubr.f32.mxu0 %v7764_v5  ;;  %v411_v6 = vld [vmem:[#allocation7 + $0x140] sm:$0xff]  ;;  %v410_v7 = vld [vmem:[#allocation7 + $0x138] sm:$0xff]  ;;  %s8608_s16 = scalar_lea.vmem [#allocation2], %s6175_s15 }
  0x66   : > { %437 = vmatpush1.msra.mxu0 %v416_v2  ;;  %v408_v8 = vld [vmem:[#allocation7 + $0x128] sm:$0xff]  ;;  %v407_v9 = vld [vmem:[#allocation7 + $0x120] sm:$0xff]  ;;  %v405_v10 = vld [vmem:[#allocation7 + $0x110] sm:$0xff] }
  0x67   : > { %438 = vmatprep.subr.mxu0 %v414_v3  ;;  %v404_v11 = vld [vmem:[#allocation7 + $0x108] sm:$0xff]  ;;  %v402_v12 = vld [vmem:[#allocation7 + $0xf8] sm:$0xff]  ;;  %v401_v13 = vld [vmem:[#allocation7 + $0xf0] sm:$0xff] }
  0x68   : > { %439 = vmatpush1.msra.mxu0 %v413_v4  ;;  %v399_v14 = vld [vmem:[#allocation7 + $0xe0] sm:$0xff]  ;;  %v398_v16 = vld [vmem:[#allocation7 + $0xd8] sm:$0xff]  ;;  %v396_v17 = vld [vmem:[#allocation7 + $0xc8] sm:$0xff] }
  0x69   : > { %440 = vmatprep.subr.mxu0 %v411_v6  ;;  %v307_v15 = vld [vmem:[%s7923_s18] sm:$0xff]  ;;  %v393_v19 = vld [vmem:[#allocation7 + $0xb0] sm:$0xff]  ;;  %v392_v20 = vld [vmem:[#allocation7 + $0xa8] sm:$0xff] }
  0x6a   : > { %441 = vmatpush1.msra.mxu0 %v410_v7  ;;  %6857 = vmatprep.mubr.f32.mxu1 %v307_v15  ;;  %v395_v18 = vld [vmem:[#allocation7 + $0xc0] sm:$0xff]  ;;  %v390_v21 = vld [vmem:[#allocation7 + $0x98] sm:$0xff]  ;;  %v389_v22 = vld [vmem:[#allocation7 + $0x90] sm:$0xff] }
  0x6b   : > { %442 = vmatprep.subr.mxu0 %v408_v8  ;;  %v387_v23 = vld [vmem:[#allocation7 + $0x80] sm:$0xff]  ;;  %v386_v24 = vld [vmem:[#allocation7 + $0x78] sm:$0xff]  ;;  %v384_v25 = vld [vmem:[#allocation7 + $0x68] sm:$0xff] }
  0x6c   : > { %443 = vmatpush1.msra.mxu0 %v407_v9  ;;  %v383_v26 = vld [vmem:[#allocation7 + $0x60] sm:$0xff]  ;;  %v381_v27 = vld [vmem:[#allocation7 + $0x50] sm:$0xff]  ;;  %v380_v28 = vld [vmem:[#allocation7 + $0x48] sm:$0xff] }
  0x6d   : > { %444 = vmatprep.subr.mxu0 %v405_v10  ;;  %v378_v29 = vld [vmem:[#allocation7 + $0x38] sm:$0xff]  ;;  %v377_v30 = vld [vmem:[#allocation7 + $0x30] sm:$0xff]  ;;  %v375_v31 = vld [vmem:[#allocation7 + $0x20] sm:$0xff] }
  0x6e   : > { %445 = vmatpush1.msra.mxu0 %v404_v11  ;;  %v374_v32 = vld [vmem:[#allocation7 + $0x18] sm:$0xff]  ;;  %v372_v33 = vld [vmem:[#allocation7 + $0x8] sm:$0xff]  ;;  %v371_v34 = vld [vmem:[#allocation7] sm:$0xff] }
  0x6f   : > { %446 = vmatprep.subr.mxu0 %v402_v12  ;;  %v7939_v35 = vld [vmem:[%s7923_s18 + $0x8] sm:$0xff]  ;;  %v7944_v36 = vld [vmem:[%s7923_s18 + $0x10] sm:$0xff]  ;;  %v7949_v37 = vld [vmem:[%s7923_s18 + $0x18] sm:$0xff] }
  0x70   : > { %447 = vmatpush1.msra.mxu0 %v401_v13  ;;  %v7954_v38 = vld [vmem:[%s7923_s18 + $0x20] sm:$0xff]  ;;  %v7959_v39 = vld [vmem:[%s7923_s18 + $0x28] sm:$0xff]  ;;  %v7964_v40 = vld [vmem:[%s7923_s18 + $0x30] sm:$0xff] }
  0x71   : > { %448 = vmatprep.subr.mxu0 %v399_v14  ;;  %v7969_v41 = vld [vmem:[%s7923_s18 + $0x38] sm:$0xff]  ;;  %v7974_v42 = vld [vmem:[%s7923_s18 + $0x40] sm:$0xff]  ;;  %v7979_v43 = vld [vmem:[%s7923_s18 + $0x48] sm:$0xff] }
  0x72   : > { %449 = vmatpush1.msra.mxu0 %v398_v16  ;;  %v7984_v44 = vld [vmem:[%s7923_s18 + $0x50] sm:$0xff]  ;;  %v7989_v45 = vld [vmem:[%s7923_s18 + $0x58] sm:$0xff]  ;;  %v7994_v46 = vld [vmem:[%s7923_s18 + $0x60] sm:$0xff] }
  0x73   : > { %450 = vmatprep.subr.mxu0 %v396_v17  ;;  %v7999_v47 = vld [vmem:[%s7923_s18 + $0x68] sm:$0xff]  ;;  %v8004_v48 = vld [vmem:[%s7923_s18 + $0x70] sm:$0xff]  ;;  %v8009_v49 = vld [vmem:[%s7923_s18 + $0x78] sm:$0xff] }
  0x74   : > { %451 = vmatpush1.msra.mxu0 %v395_v18  ;;  %v8014_v50 = vld [vmem:[%s7923_s18 + $0x80] sm:$0xff]  ;;  %v8019_v51 = vld [vmem:[%s7923_s18 + $0x88] sm:$0xff]  ;;  %v8024_v52 = vld [vmem:[%s7923_s18 + $0x90] sm:$0xff] }
  0x75   : > { %452 = vmatprep.subr.mxu0 %v393_v19  ;;  %v8029_v53 = vld [vmem:[%s7923_s18 + $0x98] sm:$0xff]  ;;  %v8034_v54 = vld [vmem:[%s7923_s18 + $0xa0] sm:$0xff]  ;;  %v8039_v55 = vld [vmem:[%s7923_s18 + $0xa8] sm:$0xff] }
  0x76   : > { %453 = vmatpush1.msra.mxu0 %v392_v20  ;;  %v8044_v56 = vld [vmem:[%s7923_s18 + $0xb0] sm:$0xff]  ;;  %v8049_v57 = vld [vmem:[%s7923_s18 + $0xb8] sm:$0xff]  ;;  %v8054_v58 = vld [vmem:[%s7923_s18 + $0xc0] sm:$0xff] }
  0x77   : > { %454 = vmatprep.subr.mxu0 %v390_v21  ;;  %v8059_v59 = vld [vmem:[%s7923_s18 + $0xc8] sm:$0xff]  ;;  %v8064_v60 = vld [vmem:[%s7923_s18 + $0xd0] sm:$0xff]  ;;  %v8069_v61 = vld [vmem:[%s7923_s18 + $0xd8] sm:$0xff] }
  0x78   : > { %455 = vmatpush1.msra.mxu0 %v389_v22  ;;  %v8074_v62 = vld [vmem:[%s7923_s18 + $0xe0] sm:$0xff]  ;;  %v8079_v63 = vld [vmem:[%s7923_s18 + $0xe8] sm:$0xff]  ;;  %v8084_v0 = vld [vmem:[%s7923_s18 + $0xf0] sm:$0xff] }
  0x79   : > { %456 = vmatprep.subr.mxu0 %v387_v23  ;;  %v8089_v1 = vld [vmem:[%s7923_s18 + $0xf8] sm:$0xff]  ;;  %v8094_v2 = vld [vmem:[%s7923_s18 + $0x100] sm:$0xff]  ;;  %v8099_v3 = vld [vmem:[%s7923_s18 + $0x108] sm:$0xff] }
  0x7a   : > { %457 = vmatpush1.msra.mxu0 %v386_v24  ;;  %v8104_v4 = vld [vmem:[%s7923_s18 + $0x110] sm:$0xff]  ;;  %v8109_v6 = vld [vmem:[%s7923_s18 + $0x118] sm:$0xff]  ;;  %v8114_v7 = vld [vmem:[%s7923_s18 + $0x120] sm:$0xff] }
  0x7b   : > { %458 = vmatprep.subr.mxu0 %v384_v25  ;;  %v8119_v8 = vld [vmem:[%s7923_s18 + $0x128] sm:$0xff]  ;;  %v8124_v9 = vld [vmem:[%s7923_s18 + $0x130] sm:$0xff]  ;;  %v8129_v10 = vld [vmem:[%s7923_s18 + $0x138] sm:$0xff] }
  0x7c   : > { %459 = vmatpush1.msra.mxu0 %v383_v26  ;;  %v8134_v11 = vld [vmem:[%s7923_s18 + $0x140] sm:$0xff]  ;;  %v418_v12 = vld [vmem:[#allocation7 + $0x178] sm:$0xff]  ;;  %v8139_v13 = vld [vmem:[%s7923_s18 + $0x148] sm:$0xff] }
  0x7d   : > { %460 = vmatprep.subr.mxu0 %v381_v27  ;;  %6825 = vmatprep.subr.mxu1 %v418_v12  ;;  %v415_v14 = vld [vmem:[#allocation7 + $0x160] sm:$0xff]  ;;  %v8144_v16 = vld [vmem:[%s7923_s18 + $0x150] sm:$0xff]  ;;  %v406_v18 = vld [vmem:[#allocation7 + $0x118] sm:$0xff] }
  0x7e   : > { %461 = vmatpush1.msra.mxu0 %v380_v28  ;;  %6826 = vmatpush3.msra.mxu1 %v418_v12  ;;  %v409_v17 = vld [vmem:[#allocation7 + $0x130] sm:$0xff]  ;;  %v8149_v19 = vld [vmem:[%s7923_s18 + $0x158] sm:$0xff]  ;;  %v403_v20 = vld [vmem:[#allocation7 + $0x100] sm:$0xff] }
  0x7f   : > { %462 = vmatprep.subr.mxu0 %v378_v29  ;;  %6827 = vmatprep.subr.mxu1 %v415_v14  ;;  %v400_v21 = vld [vmem:[#allocation7 + $0xe8] sm:$0xff]  ;;  %v8154_v22 = vld [vmem:[%s7923_s18 + $0x160] sm:$0xff]  ;;  %v397_v23 = vld [vmem:[#allocation7 + $0xd0] sm:$0xff] }
  0x80   : > { %463 = vmatpush1.msra.mxu0 %v377_v30  ;;  %6828 = vmatpush3.msra.mxu1 %v415_v14  ;;  %v394_v24 = vld [vmem:[#allocation7 + $0xb8] sm:$0xff]  ;;  %v8159_v25 = vld [vmem:[%s7923_s18 + $0x168] sm:$0xff]  ;;  %v391_v26 = vld [vmem:[#allocation7 + $0xa0] sm:$0xff] }
  0x81   : > { %464 = vmatprep.subr.mxu0 %v375_v31  ;;  %v388_v27 = vld [vmem:[#allocation7 + $0x88] sm:$0xff]  ;;  %v8164_v28 = vld [vmem:[%s7923_s18 + $0x170] sm:$0xff]  ;;  %v382_v30 = vld [vmem:[#allocation7 + $0x58] sm:$0xff] }
  0x82   : > { %465 = vmatpush1.msra.mxu0 %v374_v32  ;;  %v385_v29 = vld [vmem:[#allocation7 + $0x70] sm:$0xff]  ;;  %v8169_v31 = vld [vmem:[%s7923_s18 + $0x178] sm:$0xff]  ;;  %v379_v32 = vld [vmem:[#allocation7 + $0x40] sm:$0xff] }
  0x83   : > { %466 = vmatprep.subr.mxu0 %v372_v33  ;;  %v376_v33 = vld [vmem:[#allocation7 + $0x28] sm:$0xff]  ;;  %v373_v12 = vld [vmem:[#allocation7 + $0x10] sm:$0xff] }
  0x84   : > { %467 = vmatpush1.msra.mxu0 %v371_v34  ;;  %v8174_v34 = vld [vmem:[%s7923_s18 + $0x180] sm:$0xff] }
  0x85   : > { %501 = vmatmul.mubr.f32.vlgmr.msra.gmra.mxu0 %v307_v15  ;;  %v412_v15 = vld [vmem:[#allocation7 + $0x148] sm:$0xff] }
  0x86   : > { %506 = vmatprep.mubr.f32.mxu0 %v7764_v5  ;;  %6829 = vmatprep.subr.mxu1 %v412_v15 }
  0x87   : > { %6830 = vmatpush3.msra.mxu1 %v412_v15  ;;  %v8181_v15 = vld [vmem:[%s7923_s18 + $0x188] sm:$0xff] }
  0x88   : > { %6831 = vmatprep.subr.mxu1 %v409_v17 }
  0x89   : > { %507 = vmatmul.mubr.f32.gmra.mxu0 %v7939_v35  ;;  %6832 = vmatpush3.msra.mxu1 %v409_v17 }
  0x8a   : > { %512 = vmatprep.mubr.f32.mxu0 %v7764_v5  ;;  %6833 = vmatprep.subr.mxu1 %v406_v18 }
  0x8b   : > { %6834 = vmatpush3.msra.mxu1 %v406_v18 }
  0x8c   : > { %6835 = vmatprep.subr.mxu1 %v403_v20 }
  0x8d   : > { %513 = vmatmul.mubr.f32.gmra.mxu0 %v7944_v36  ;;  %6836 = vmatpush3.msra.mxu1 %v403_v20  ;;  %v8192_v20 = vld [vmem:[%s7923_s18 + $0x190] sm:$0xff] }
  0x8e   : > { %518 = vmatprep.mubr.f32.mxu0 %v7764_v5  ;;  %6837 = vmatprep.subr.mxu1 %v400_v21 }
  0x8f   : > { %6838 = vmatpush3.msra.mxu1 %v400_v21 }
  0x90   : > { %6839 = vmatprep.subr.mxu1 %v397_v23 }
  0x91   : > { %519 = vmatmul.mubr.f32.gmra.mxu0 %v7949_v37  ;;  %6840 = vmatpush3.msra.mxu1 %v397_v23 }
  0x92   : > { %524 = vmatprep.mubr.f32.mxu0 %v7764_v5  ;;  %6841 = vmatprep.subr.mxu1 %v394_v24 }
  0x93   : > { %6842 = vmatpush3.msra.mxu1 %v394_v24 }
  0x94   : > { %6843 = vmatprep.subr.mxu1 %v391_v26 }
  0x95   : > { %525 = vmatmul.mubr.f32.gmra.mxu0 %v7954_v38  ;;  %6844 = vmatpush3.msra.mxu1 %v391_v26 }
  0x96   : > { %530 = vmatprep.mubr.f32.mxu0 %v7764_v5  ;;  %6845 = vmatprep.subr.mxu1 %v388_v27 }
  0x97   : > { %6846 = vmatpush3.msra.mxu1 %v388_v27 }
  0x98   : > { %6847 = vmatprep.subr.mxu1 %v385_v29 }
  0x99   : > { %531 = vmatmul.mubr.f32.gmra.mxu0 %v7959_v39  ;;  %6848 = vmatpush3.msra.mxu1 %v385_v29 }
  0x9a   : > { %536 = vmatprep.mubr.f32.mxu0 %v7764_v5  ;;  %6849 = vmatprep.subr.mxu1 %v382_v30 }
  0x9b   : > { %6850 = vmatpush3.msra.mxu1 %v382_v30 }
  0x9c   : > { %6851 = vmatprep.subr.mxu1 %v379_v32 }
  0x9d   : > { %537 = vmatmul.mubr.f32.gmra.mxu0 %v7964_v40  ;;  %6852 = vmatpush3.msra.mxu1 %v379_v32 }
  0x9e   : > { %542 = vmatprep.mubr.f32.mxu0 %v7764_v5  ;;  %6853 = vmatprep.subr.mxu1 %v376_v33 }
  0x9f   : > { %6854 = vmatpush3.msra.mxu1 %v376_v33 }
  0xa0   : > { %6855 = vmatprep.subr.mxu1 %v373_v12 }
  0xa1   : > { %543 = vmatmul.mubr.f32.gmra.mxu0 %v7969_v41  ;;  %6856 = vmatpush3.msra.mxu1 %v373_v12 }
  0xa2   : > { %548 = vmatprep.mubr.f32.mxu0 %v7764_v5  ;;  %6858 = vmatmul.mubr.f32.vlgmr.msra.gmra.mxu1 %v7939_v35 }
  0xa3   : > { %6860 = vmatprep.mubr.f32.mxu1 %v7944_v36  ;;  %v8203_v36 = vld [vmem:[%s7923_s18 + $0x198] sm:$0xff] }
  0xa5   : > { %549 = vmatmul.mubr.f32.gmra.mxu0 %v7974_v42 }
  0xa6   : > { %554 = vmatprep.mubr.f32.mxu0 %v7764_v5  ;;  %6861 = vmatmul.mubr.f32.gmra.mxu1 %v7949_v37 }
  0xa7   : > { %6863 = vmatprep.mubr.f32.mxu1 %v7954_v38  ;;  %v8214_v38 = vld [vmem:[%s7923_s18 + $0x1a0] sm:$0xff] }
  0xa9   : > { %555 = vmatmul.mubr.f32.gmra.mxu0 %v7979_v43 }
  0xaa   : > { %560 = vmatprep.mubr.f32.mxu0 %v7764_v5  ;;  %6864 = vmatmul.mubr.f32.gmra.mxu1 %v7959_v39 }
  0xab   : > { %6866 = vmatprep.mubr.f32.mxu1 %v7964_v40  ;;  %v8225_v40 = vld [vmem:[%s7923_s18 + $0x1a8] sm:$0xff] }
  0xad   : > { %561 = vmatmul.mubr.f32.gmra.mxu0 %v7984_v44 }
  0xae   : > { %566 = vmatprep.mubr.f32.mxu0 %v7764_v5  ;;  %6867 = vmatmul.mubr.f32.gmra.mxu1 %v7969_v41 }
  0xaf   : > { %6869 = vmatprep.mubr.f32.mxu1 %v7974_v42  ;;  %v8236_v42 = vld [vmem:[%s7923_s18 + $0x1b0] sm:$0xff] }
  0xb1   : > { %567 = vmatmul.mubr.f32.gmra.mxu0 %v7989_v45 }
  0xb2   : > { %572 = vmatprep.mubr.f32.mxu0 %v7764_v5  ;;  %6870 = vmatmul.mubr.f32.gmra.mxu1 %v7979_v43 }
  0xb3   : > { %6872 = vmatprep.mubr.f32.mxu1 %v7984_v44  ;;  %v8247_v44 = vld [vmem:[%s7923_s18 + $0x1b8] sm:$0xff] }
  0xb5   : > { %573 = vmatmul.mubr.f32.gmra.mxu0 %v7994_v46 }
  0xb6   : > { %578 = vmatprep.mubr.f32.mxu0 %v7764_v5  ;;  %6873 = vmatmul.mubr.f32.gmra.mxu1 %v7989_v45 }
  0xb7   : > { %6875 = vmatprep.mubr.f32.mxu1 %v7994_v46  ;;  %v8258_v46 = vld [vmem:[%s7923_s18 + $0x1c0] sm:$0xff] }
  0xb9   : > { %579 = vmatmul.mubr.f32.gmra.mxu0 %v7999_v47 }
  0xba   : > { %584 = vmatprep.mubr.f32.mxu0 %v7764_v5  ;;  %6876 = vmatmul.mubr.f32.gmra.mxu1 %v7999_v47 }
  0xbb   : > { %6878 = vmatprep.mubr.f32.mxu1 %v8004_v48 }
  0xbd   : > { %585 = vmatmul.mubr.f32.gmra.mxu0 %v8004_v48  ;;  %v8269_v48 = vld [vmem:[%s7923_s18 + $0x1c8] sm:$0xff] }
  0xbe   : > { %590 = vmatprep.mubr.f32.mxu0 %v7764_v5  ;;  %6879 = vmatmul.mubr.f32.gmra.mxu1 %v8009_v49 }
  0xbf   : > { %6881 = vmatprep.mubr.f32.mxu1 %v8014_v50 }
  0xc1   : > { %591 = vmatmul.mubr.f32.gmra.mxu0 %v8009_v49 }
  0xc2   : > { %596 = vmatprep.mubr.f32.mxu0 %v7764_v5  ;;  %6882 = vmatmul.mubr.f32.gmra.mxu1 %v8019_v51 }
  0xc3   : > { %6884 = vmatprep.mubr.f32.mxu1 %v8024_v52 }
  0xc5   : > { %597 = vmatmul.mubr.f32.gmra.mxu0 %v8014_v50  ;;  %v8280_v50 = vld [vmem:[%s7923_s18 + $0x1d0] sm:$0xff] }
  0xc6   : > { %602 = vmatprep.mubr.f32.mxu0 %v7764_v5  ;;  %6885 = vmatmul.mubr.f32.gmra.mxu1 %v8029_v53 }
  0xc7   : > { %6887 = vmatprep.mubr.f32.mxu1 %v8034_v54 }
  0xc9   : > { %603 = vmatmul.mubr.f32.gmra.mxu0 %v8019_v51 }
  0xca   : > { %608 = vmatprep.mubr.f32.mxu0 %v7764_v5  ;;  %6888 = vmatmul.mubr.f32.gmra.mxu1 %v8039_v55 }
  0xcb   : > { %6890 = vmatprep.mubr.f32.mxu1 %v8044_v56 }
  0xcd   : > { %609 = vmatmul.mubr.f32.gmra.mxu0 %v8024_v52  ;;  %v8291_v52 = vld [vmem:[%s7923_s18 + $0x1d8] sm:$0xff] }
  0xce   : > { %614 = vmatprep.mubr.f32.mxu0 %v7764_v5  ;;  %6891 = vmatmul.mubr.f32.gmra.mxu1 %v8049_v57 }
  0xcf   : > { %6893 = vmatprep.mubr.f32.mxu1 %v8054_v58 }
  0xd1   : > { %615 = vmatmul.mubr.f32.gmra.mxu0 %v8029_v53 }
  0xd2   : > { %620 = vmatprep.mubr.f32.mxu0 %v7764_v5  ;;  %6894 = vmatmul.mubr.f32.gmra.mxu1 %v8059_v59 }
  0xd3   : > { %6896 = vmatprep.mubr.f32.mxu1 %v8064_v60 }
  0xd5   : > { %621 = vmatmul.mubr.f32.gmra.mxu0 %v8034_v54  ;;  %v8302_v54 = vld [vmem:[%s7923_s18 + $0x1e0] sm:$0xff] }
  0xd6   : > { %626 = vmatprep.mubr.f32.mxu0 %v7764_v5  ;;  %6897 = vmatmul.mubr.f32.gmra.mxu1 %v8069_v61 }
  0xd7   : > { %6899 = vmatprep.mubr.f32.mxu1 %v8074_v62 }
  0xd9   : > { %627 = vmatmul.mubr.f32.gmra.mxu0 %v8039_v55 }
  0xda   : > { %632 = vmatprep.mubr.f32.mxu0 %v7764_v5  ;;  %6900 = vmatmul.mubr.f32.gmra.mxu1 %v8079_v63 }
  0xdb   : > { %6902 = vmatprep.mubr.f32.mxu1 %v8084_v0 }
  0xdd   : > { %633 = vmatmul.mubr.f32.gmra.mxu0 %v8044_v56  ;;  %v421_v56 = vlaneseq }
  0xde   : > { %638 = vmatprep.mubr.f32.mxu0 %v7764_v5  ;;  %6903 = vmatmul.mubr.f32.gmra.mxu1 %v8089_v1 }
  0xdf   : > { %6905 = vmatprep.mubr.f32.mxu1 %v8094_v2 }
  0xe1   : > { %639 = vmatmul.mubr.f32.gmra.mxu0 %v8049_v57 }
  0xe2   : > { %644 = vmatprep.mubr.f32.mxu0 %v7764_v5  ;;  %6906 = vmatmul.mubr.f32.gmra.mxu1 %v8099_v3 }
  0xe3   : > { %6908 = vmatprep.mubr.f32.mxu1 %v8104_v4 }
  0xe5   : > { %645 = vmatmul.mubr.f32.gmra.mxu0 %v8054_v58  ;;  %v8322_v58 = vshrl.u32 %v421_v56, 7  ;;  %v8338_v56 = vld [vmem:[%s7923_s18 + $0x1f8] sm:$0xff] }
  0xe6   : > { %650 = vmatprep.mubr.f32.mxu0 %v7764_v5  ;;  %6909 = vmatmul.mubr.f32.gmra.mxu1 %v8109_v6 }
  0xe7   : > { %6911 = vmatprep.mubr.f32.mxu1 %v8114_v7 }
  0xe9   : > { %651 = vmatmul.mubr.f32.gmra.mxu0 %v8059_v59 }
  0xea   : > { %656 = vmatprep.mubr.f32.mxu0 %v7764_v5  ;;  %6912 = vmatmul.mubr.f32.gmra.mxu1 %v8119_v8 }
  0xeb   : > { %6914 = vmatprep.mubr.f32.mxu1 %v8124_v9 }
  0xed   : > { %657 = vmatmul.mubr.f32.gmra.mxu0 %v8064_v60  ;;  %v423_v60 = vsub.s32 0, %v8322_v58 }
  0xee   : > { %662 = vmatprep.mubr.f32.mxu0 %v7764_v5  ;;  %6915 = vmatmul.mubr.f32.gmra.mxu1 %v8129_v10 }
  0xef   : > { %6917 = vmatprep.mubr.f32.mxu1 %v8134_v11 }
  0xf1   : > { %663 = vmatmul.mubr.f32.gmra.mxu0 %v8069_v61  ;;  %v8344_v61 = vld [vmem:[%s10589_s2] sm:$0x7] }
  0xf2   : > { %668 = vmatprep.mubr.f32.mxu0 %v7764_v5  ;;  %6918 = vmatmul.mubr.f32.gmra.mxu1 %v8139_v13 }
  0xf3   : > { %6920 = vmatprep.mubr.f32.mxu1 %v8144_v16 }
  0xf5   : > { %669 = vmatmul.mubr.f32.gmra.mxu0 %v8074_v62 }
  0xf6   : > { %674 = vmatprep.mubr.f32.mxu0 %v7764_v5  ;;  %6921 = vmatmul.mubr.f32.gmra.mxu1 %v8149_v19 }
  0xf7   : > { %6923 = vmatprep.mubr.f32.mxu1 %v8154_v22 }
  0xf9   : > { %675 = vmatmul.mubr.f32.gmra.mxu0 %v8079_v63 }
  0xfa   : > { %680 = vmatprep.mubr.f32.mxu0 %v7764_v5  ;;  %6924 = vmatmul.mubr.f32.gmra.mxu1 %v8159_v25 }
  0xfb   : > { %6926 = vmatprep.mubr.f32.mxu1 %v8164_v28 }
  0xfd   : > { %681 = vmatmul.mubr.f32.gmra.mxu0 %v8084_v0 }
  0xfe   : > { %686 = vmatprep.mubr.f32.mxu0 %v7764_v5  ;;  %6927 = vmatmul.mubr.f32.gmra.mxu1 %v8169_v31 }
  0xff   : > { %6929 = vmatprep.mubr.f32.mxu1 %v8174_v34 }
 0x101   : > { %687 = vmatmul.mubr.f32.gmra.mxu0 %v8089_v1 }
 0x102   : > { %692 = vmatprep.mubr.f32.mxu0 %v7764_v5  ;;  %6930 = vmatmul.mubr.f32.gmra.mxu1 %v8181_v15 }
 0x103   : > { %6932 = vmatprep.mubr.f32.mxu1 %v8192_v20 }
 0x105   : > { %693 = vmatmul.mubr.f32.gmra.mxu0 %v8094_v2 }
 0x106   : > { %698 = vmatprep.mubr.f32.mxu0 %v7764_v5  ;;  %6933 = vmatmul.mubr.f32.gmra.mxu1 %v8203_v36 }
 0x107   : > { %6935 = vmatprep.mubr.f32.mxu1 %v8214_v38 }
 0x109   : > { %699 = vmatmul.mubr.f32.gmra.mxu0 %v8099_v3 }
 0x10a   : > { %704 = vmatprep.mubr.f32.mxu0 %v7764_v5  ;;  %6936 = vmatmul.mubr.f32.gmra.mxu1 %v8225_v40 }
 0x10b   : > { %6938 = vmatprep.mubr.f32.mxu1 %v8236_v42 }
 0x10d   : > { %705 = vmatmul.mubr.f32.gmra.mxu0 %v8104_v4 }
 0x10e   : > { %710 = vmatprep.mubr.f32.mxu0 %v7764_v5  ;;  %6939 = vmatmul.mubr.f32.gmra.mxu1 %v8247_v44 }
 0x10f   : > { %6941 = vmatprep.mubr.f32.mxu1 %v8258_v46 }
 0x111   : > { %711 = vmatmul.mubr.f32.gmra.mxu0 %v8109_v6 }
 0x112   : > { %716 = vmatprep.mubr.f32.mxu0 %v7764_v5  ;;  %6942 = vmatmul.mubr.f32.gmra.mxu1 %v8269_v48 }
 0x113   : > { %6944 = vmatprep.mubr.f32.mxu1 %v8280_v50 }
 0x115   : > { %717 = vmatmul.mubr.f32.gmra.mxu0 %v8114_v7 }
 0x116   : > { %722 = vmatprep.mubr.f32.mxu0 %v7764_v5  ;;  %6945 = vmatmul.mubr.f32.gmra.mxu1 %v8291_v52 }
 0x117   : > { %6947 = vmatprep.mubr.f32.mxu1 %v8302_v54 }
 0x119   : > { %723 = vmatmul.mubr.f32.gmra.mxu0 %v8119_v8 }
 0x11a   : > { %728 = vmatprep.mubr.f32.mxu0 %v7764_v5 }
 0x11d   : > { %729 = vmatmul.mubr.f32.gmra.mxu0 %v8124_v9 }
 0x11e   : > { %734 = vmatprep.mubr.f32.mxu0 %v7764_v5 }
 0x121   : > { %735 = vmatmul.mubr.f32.gmra.mxu0 %v8129_v10 }
 0x122   : > { %740 = vmatprep.mubr.f32.mxu0 %v7764_v5 }
 0x125   : > { %741 = vmatmul.mubr.f32.gmra.mxu0 %v8134_v11 }
 0x126   : > { %746 = vmatprep.mubr.f32.mxu0 %v7764_v5 }
 0x129   : > { %747 = vmatmul.mubr.f32.gmra.mxu0 %v8139_v13 }
 0x12a   : > { %752 = vmatprep.mubr.f32.mxu0 %v7764_v5 }
 0x12d   : > { %753 = vmatmul.mubr.f32.gmra.mxu0 %v8144_v16 }
 0x12e   : > { %758 = vmatprep.mubr.f32.mxu0 %v7764_v5 }
 0x131   : > { %759 = vmatmul.mubr.f32.gmra.mxu0 %v8149_v19 }
 0x132   : > { %764 = vmatprep.mubr.f32.mxu0 %v7764_v5 }
 0x135   : > { %765 = vmatmul.mubr.f32.gmra.mxu0 %v8154_v22 }
 0x136   : > { %770 = vmatprep.mubr.f32.mxu0 %v7764_v5 }
 0x139   : > { %771 = vmatmul.mubr.f32.gmra.mxu0 %v8159_v25 }
 0x13a   : > { %776 = vmatprep.mubr.f32.mxu0 %v7764_v5 }
 0x13d   : > { %777 = vmatmul.mubr.f32.gmra.mxu0 %v8164_v28 }
 0x13e   : > { %782 = vmatprep.mubr.f32.mxu0 %v7764_v5 }
 0x141   : > { %783 = vmatmul.mubr.f32.gmra.mxu0 %v8169_v31 }
 0x142   : > { %788 = vmatprep.mubr.f32.mxu0 %v7764_v5 }
 0x145   : > { %v8176_v14 = vpop.f32.mrf.mxu0  ;;  %789 = vmatmul.mubr.f32.gmra.mxu0 %v8174_v34 }
 0x146   : > { %794 = vmatprep.mubr.f32.mxu0 %v7764_v5 }
 0x147   : > { %v8184_v17 = vpop.f32.mrf.mxu0 }
 0x148   : > { %10688 = vst [vmem:[#allocation17_spill] sm:$0xff] %v8184_v17 }
 0x149   : > { %v8187_v18 = vpop.f32.mrf.mxu0  ;;  %795 = vmatmul.mubr.f32.gmra.mxu0 %v8181_v15 }
 0x14a   : > { %800 = vmatprep.mubr.f32.mxu0 %v7764_v5 }
 0x14b   : > { %v8195_v21 = vpop.f32.mrf.mxu0 }
 0x14c   : > { %10689 = vst [vmem:[#allocation18_spill] sm:$0xff] %v8195_v21  ;;  %v8313_v21 = vld [vmem:[%s7923_s18 + $0x1e8] sm:$0xff] }
 0x14d   : > { %v8198_v35 = vpop.f32.mrf.mxu0  ;;  %801 = vmatmul.mubr.f32.gmra.mxu0 %v8192_v20  ;;  %6948 = vmatmul.mubr.f32.gmra.mxu1 %v8313_v21 }
 0x14e   : > { %806 = vmatprep.mubr.f32.mxu0 %v7764_v5 }
 0x14f   : > { %v8206_v23 = vpop.f32.mrf.mxu0 }
 0x150   : > { %10690 = vst [vmem:[#allocation19_spill] sm:$0xff] %v8206_v23 }
 0x151   : > { %v8209_v37 = vpop.f32.mrf.mxu0  ;;  %807 = vmatmul.mubr.f32.gmra.mxu0 %v8203_v36 }
 0x152   : > { %812 = vmatprep.mubr.f32.mxu0 %v7764_v5 }
 0x153   : > { %v8217_v24 = vpop.f32.mrf.mxu0 }
 0x154   : > { %10691 = vst [vmem:[#allocation20_spill] sm:$0xff] %v8217_v24  ;;  %v8326_v24 = vld [vmem:[%s7923_s18 + $0x1f0] sm:$0xff] }
 0x155   : > { %v8220_v39 = vpop.f32.mrf.mxu0  ;;  %813 = vmatmul.mubr.f32.gmra.mxu0 %v8214_v38  ;;  %6950 = vmatprep.mubr.f32.mxu1 %v8326_v24 }
 0x156   : > { %818 = vmatprep.mubr.f32.mxu0 %v7764_v5  ;;  %6951 = vmatmul.mubr.f32.gmra.mxu1 %v8338_v56 }
 0x157   : > { %v8228_v26 = vpop.f32.mrf.mxu0 }
 0x158   : > { %10692 = vst [vmem:[#allocation21_spill] sm:$0xff] %v8228_v26 }
 0x159   : > { %v8231_v41 = vpop.f32.mrf.mxu0  ;;  %819 = vmatmul.mubr.f32.gmra.mxu0 %v8225_v40 }
 0x15a   : > { %824 = vmatprep.mubr.f32.mxu0 %v7764_v5 }
 0x15b   : > { %v8239_v27 = vpop.f32.mrf.mxu0 }
 0x15c   : > { %10693 = vst [vmem:[#allocation22_spill] sm:$0xff] %v8239_v27 }
 0x15d   : > { %v8242_v43 = vpop.f32.mrf.mxu0  ;;  %825 = vmatmul.mubr.f32.gmra.mxu0 %v8236_v42 }
 0x15e   : > { %830 = vmatprep.mubr.f32.mxu0 %v7764_v5 }
 0x15f   : > { %v8250_v29 = vpop.f32.mrf.mxu0 }
 0x160   : > { %10694 = vst [vmem:[#allocation23_spill] sm:$0xff] %v8250_v29  ;;  %v8353_v29 = vrot.slane %v8344_v61, %v423_v60 }
 0x161   : > { %v8253_v45 = vpop.f32.mrf.mxu0  ;;  %831 = vmatmul.mubr.f32.gmra.mxu0 %v8247_v44 }
 0x162   : > { %836 = vmatprep.mubr.f32.mxu0 %v7764_v5  ;;  %v509_v1 = vadd.f32 %v8187_v18, %v8353_v29 }
 0x163   : > { %v8261_v30 = vpop.f32.mrf.mxu0 }
 0x164   : > { %10695 = vst [vmem:[#allocation24_spill] sm:$0xff] %v8261_v30  ;;  %v503_v30 = vadd.f32 %v8176_v14, %v8353_v29 }
 0x165   : > { %v8264_v47 = vpop.f32.mrf.mxu0  ;;  %837 = vmatmul.mubr.f32.gmra.mxu0 %v8258_v46 }
 0x166   : > { %842 = vmatprep.mubr.f32.mxu0 %v7764_v5 }
 0x167   : > { %v8272_v32 = vpop.f32.mrf.mxu0 }
 0x168   : > { %10696 = vst [vmem:[#allocation25_spill] sm:$0xff] %v8272_v32 }
 0x169   : > { %v8275_v49 = vpop.f32.mrf.mxu0  ;;  %843 = vmatmul.mubr.f32.gmra.mxu0 %v8269_v48  ;;  %v427_v48 = vsub.s32 1, %v8322_v58 }
 0x16a   : > { %848 = vmatprep.mubr.f32.mxu0 %v7764_v5 }
 0x16b   : > { %v8283_v33 = vpop.f32.mrf.mxu0 }
 0x16c   : > { %10697 = vst [vmem:[#allocation26_spill] sm:$0xff] %v8283_v33 }
 0x16d   : > { %v8286_v51 = vpop.f32.mrf.mxu0  ;;  %849 = vmatmul.mubr.f32.gmra.mxu0 %v8280_v50 }
 0x16e   : > { %854 = vmatprep.mubr.f32.mxu0 %v7764_v5 }
 0x16f   : > { %v8294_v12 = vpop.f32.mrf.mxu0 }
 0x170   : > { %10698 = vst [vmem:[#allocation27_spill] sm:$0xff] %v8294_v12 }
 0x171   : > { %v8297_v53 = vpop.f32.mrf.mxu0  ;;  %855 = vmatmul.mubr.f32.gmra.mxu0 %v8291_v52 }
 0x172   : > { %860 = vmatprep.mubr.f32.mxu0 %v7764_v5 }
 0x173   : > { %v8305_v17 = vpop.f32.mrf.mxu0 }
 0x175   : > { %v8308_v55 = vpop.f32.mrf.mxu0  ;;  %861 = vmatmul.mubr.f32.gmra.mxu0 %v8302_v54 }
 0x176   : > { %866 = vmatprep.mubr.f32.mxu0 %v7764_v5  ;;  %v575_v40 = vadd.f32 %v8308_v55, %v8353_v29 }
 0x177   : > { %v8316_v23 = vpop.f32.mrf.mxu0 }
 0x179   : > { %v8319_v57 = vpop.f32.mrf.mxu0  ;;  %867 = vmatmul.mubr.f32.gmra.mxu0 %v8313_v21 }
 0x17a   : > { %872 = vmatprep.mubr.f32.mxu0 %v7764_v5  ;;  %v581_v44 = vadd.f32 %v8319_v57, %v8353_v29 }
 0x17b   : > { %v8329_v26 = vpop.f32.mrf.mxu0 }
 0x17d   : > { %v8332_v59 = vpop.f32.mrf.mxu0  ;;  %873 = vmatmul.mubr.f32.gmra.mxu0 %v8326_v24 }
 0x17e   : > { %878 = vmatprep.mubr.f32.mxu0 %v7764_v5  ;;  %v587_v50 = vadd.f32 %v8332_v59, %v8353_v29 }
 0x17f   : > { %v8346_v27 = vpop.f32.mrf.mxu0 }
 0x181   : > { %v8349_v62 = vpop.f32.mrf.mxu0  ;;  %879 = vmatmul.mubr.f32.gmra.mxu0 %v8338_v56 }
 0x182   : > { %v593_v54 = vadd.f32 %v8349_v62, %v8353_v29 }
 0x183   : > { %v8356_v5 = vpop.f32.mrf.mxu0 }
 0x185   : > { %v598_v63 = vpop.f32.mrf.mxu0 }
 0x186   : > { %v599_v32 = vadd.f32 %v598_v63, %v8353_v29  ;;  %v515_v63 = vadd.f32 %v8198_v35, %v8353_v29 }
 0x187   : > { %v8363_v0 = vpop.f32.mrf.mxu0 }
 0x188   : > { %v7292_v60 = vpack.i.bf16 %v503_v30, %v599_v32  ;;  %v521_v32 = vadd.f32 %v8209_v37, %v8353_v29 }
 0x189   : > { %v604_v33 = vpop.f32.mrf.mxu0 }
 0x18a   : > { %v605_v12 = vadd.f32 %v604_v33, %v8353_v29  ;;  %7293 = vxpose.xlu0.b32.start [1/16] %v7292_v60, 128 }
 0x18b   : > { %v8370_v2 = vpop.f32.mrf.mxu0 }
 0x18c   : > { %v7294_v14 = vpack.i.bf16 %v509_v1, %v605_v12  ;;  %v527_v12 = vadd.f32 %v8220_v39, %v8353_v29  ;;  %v533_v1 = vadd.f32 %v8231_v41, %v8353_v29 }
 0x18d   : > { %v610_v3 = vpop.f32.mrf.mxu0 }
 0x18e   : > { %v611_v4 = vadd.f32 %v610_v3, %v8353_v29  ;;  %7295 = vxpose.xlu0.b32.cont [2/16] %v7294_v14, 128  ;;  %v539_v3 = vadd.f32 %v8242_v43, %v8353_v29 }
 0x18f   : > { %v8377_v18 = vpop.f32.mrf.mxu0 }
 0x190   : > { %v7296_v30 = vpack.i.bf16 %v515_v63, %v611_v4  ;;  %v545_v4 = vadd.f32 %v8253_v45, %v8353_v29 }
 0x191   : > { %v616_v6 = vpop.f32.mrf.mxu0 }
 0x192   : > { %v617_v7 = vadd.f32 %v616_v6, %v8353_v29  ;;  %7297 = vxpose.xlu0.b32.cont [3/16] %v7296_v30, 128  ;;  %v551_v6 = vadd.f32 %v8264_v47, %v8353_v29 }
 0x193   : > { %v8384_v35 = vpop.f32.mrf.mxu0 }
 0x194   : > { %v7298_v33 = vpack.i.bf16 %v521_v32, %v617_v7  ;;  %v557_v7 = vadd.f32 %v8275_v49, %v8353_v29 }
 0x195   : > { %v622_v8 = vpop.f32.mrf.mxu0 }
 0x196   : > { %v623_v9 = vadd.f32 %v622_v8, %v8353_v29  ;;  %7299 = vxpose.xlu0.b32.cont [4/16] %v7298_v33, 128  ;;  %v563_v8 = vadd.f32 %v8286_v51, %v8353_v29 }
 0x197   : > { %v8391_v37 = vpop.f32.mrf.mxu0 }
 0x198   : > { %v7300_v60 = vpack.i.bf16 %v527_v12, %v623_v9  ;;  %v569_v9 = vadd.f32 %v8297_v53, %v8353_v29 }
 0x199   : > { %v628_v10 = vpop.f32.mrf.mxu0 }
 0x19a   : > { %v629_v11 = vadd.f32 %v628_v10, %v8353_v29  ;;  %7301 = vxpose.xlu0.b32.cont [5/16] %v7300_v60, 128 }
 0x19b   : > { %v8398_v39 = vpop.f32.mrf.mxu0 }
 0x19c   : > { %v7302_v14 = vpack.i.bf16 %v533_v1, %v629_v11 }
 0x19d   : > { %v634_v13 = vpop.f32.mrf.mxu0 }
 0x19e   : > { %v635_v16 = vadd.f32 %v634_v13, %v8353_v29  ;;  %7303 = vxpose.xlu0.b32.cont [6/16] %v7302_v14, 128 }
 0x19f   : > { %v8405_v41 = vpop.f32.mrf.mxu0 }
 0x1a0   : > { %v7304_v63 = vpack.i.bf16 %v539_v3, %v635_v16 }
 0x1a1   : > { %v640_v19 = vpop.f32.mrf.mxu0 }
 0x1a2   : > { %v641_v22 = vadd.f32 %v640_v19, %v8353_v29  ;;  %7305 = vxpose.xlu0.b32.cont [7/16] %v7304_v63, 128  ;;  %v8458_v63 = vrot.slane %v8344_v61, %v427_v48 }
 0x1a3   : > { %v8412_v43 = vpop.f32.mrf.mxu0 }
 0x1a4   : > { %v7306_v30 = vpack.i.bf16 %v545_v4, %v641_v22  ;;  %v595_v24 = vadd.f32 %v8356_v5, %v8458_v63  ;;  %v589_v62 = vadd.f32 %v8346_v27, %v8458_v63 }
 0x1a5   : > { %v646_v25 = vpop.f32.mrf.mxu0 }
 0x1a6   : > { %v647_v28 = vadd.f32 %v646_v25, %v8353_v29  ;;  %7307 = vxpose.xlu0.b32.cont [8/16] %v7306_v30, 128 }
 0x1a7   : > { %v8419_v45 = vpop.f32.mrf.mxu0 }
 0x1a8   : > { %v7308_v32 = vpack.i.bf16 %v551_v6, %v647_v28  ;;  %v583_v6 = vadd.f32 %v8329_v26, %v8458_v63 }
 0x1a9   : > { %v652_v31 = vpop.f32.mrf.mxu0 }
 0x1aa   : > { %v653_v34 = vadd.f32 %v652_v31, %v8353_v29  ;;  %7309 = vxpose.xlu0.b32.cont [9/16] %v7308_v32, 128  ;;  %v577_v32 = vadd.f32 %v8316_v23, %v8458_v63 }
 0x1ab   : > { %v8426_v47 = vpop.f32.mrf.mxu0 }
 0x1ac   : > { %v7310_v33 = vpack.i.bf16 %v557_v7, %v653_v34  ;;  %v571_v7 = vadd.f32 %v8305_v17, %v8458_v63 }
 0x1ad   : > { %v658_v15 = vpop.f32.mrf.mxu0 }
 0x1ae   : > { %v659_v20 = vadd.f32 %v658_v15, %v8353_v29  ;;  %7311 = vxpose.xlu0.b32.cont [10/16] %v7310_v33, 128  ;;  %v10699_v33 = vld [vmem:[#allocation27_spill] sm:$0xff] }
 0x1af   : > { %v8433_v49 = vpop.f32.mrf.mxu0  ;;  %v565_v15 = vadd.f32 %v10699_v33, %v8458_v63 }
 0x1b0   : > { %v7312_v12 = vpack.i.bf16 %v563_v8, %v659_v20  ;;  %v661_v26 = vadd.f32 %v8433_v49, %v8458_v63  ;;  %v655_v8 = vadd.f32 %v8426_v47, %v8458_v63  ;;  %v10700_v20 = vld [vmem:[#allocation26_spill] sm:$0xff]  ;;  %v649_v49 = vadd.f32 %v8419_v45, %v8458_v63 }
 0x1b1   : > { %v664_v36 = vpop.f32.mrf.mxu0  ;;  %v559_v17 = vadd.f32 %v10700_v20, %v8458_v63  ;;  %v643_v47 = vadd.f32 %v8412_v43, %v8458_v63  ;;  %v637_v45 = vadd.f32 %v8405_v41, %v8458_v63  ;;  %v631_v43 = vadd.f32 %v8398_v39, %v8458_v63 }
 0x1b2   : > { %v665_v38 = vadd.f32 %v664_v36, %v8353_v29  ;;  %7313 = vxpose.xlu0.b32.cont [11/16] %v7312_v12, 128  ;;  %v10701_v36 = vld [vmem:[#allocation25_spill] sm:$0xff]  ;;  %v625_v41 = vadd.f32 %v8391_v37, %v8458_v63  ;;  %v619_v39 = vadd.f32 %v8384_v35, %v8458_v63  ;;  %v613_v37 = vadd.f32 %v8377_v18, %v8458_v63 }
 0x1b3   : > { %v666_v51 = vpop.f32.mrf.mxu0  ;;  %v607_v35 = vadd.f32 %v8370_v2, %v8458_v63  ;;  %v601_v18 = vadd.f32 %v8363_v0, %v8458_v63 }
 0x1b4   : > { %v7314_v60 = vpack.i.bf16 %v569_v9, %v665_v38  ;;  %v667_v27 = vadd.f32 %v666_v51, %v8458_v63  ;;  %v553_v9 = vadd.f32 %v10701_v36, %v8458_v63  ;;  %v10702_v51 = vld [vmem:[#allocation24_spill] sm:$0xff] }
 0x1b5   : > { %v670_v10 = vpop.f32.mrf.mxu0 }
 0x1b6   : > { %v671_v42 = vadd.f32 %v670_v10, %v8353_v29  ;;  %7315 = vxpose.xlu0.b32.cont [12/16] %v7314_v60, 128  ;;  %v547_v60 = vadd.f32 %v10702_v51, %v8458_v63 }
 0x1b7   : > { %v672_v1 = vpop.f32.mrf.mxu0 }
 0x1b8   : > { %v7316_v53 = vpack.i.bf16 %v575_v40, %v671_v42  ;;  %v673_v5 = vadd.f32 %v672_v1, %v8458_v63  ;;  %v10703_v40 = vld [vmem:[#allocation23_spill] sm:$0xff] }
 0x1b9   : > { %v676_v11 = vpop.f32.mrf.mxu0  ;;  %v541_v42 = vadd.f32 %v10703_v40, %v8458_v63 }
 0x1ba   : > { %v677_v46 = vadd.f32 %v676_v11, %v8353_v29  ;;  %7317 = vxpose.xlu0.b32.cont [13/16] %v7316_v53, 128  ;;  %v10704_v53 = vld [vmem:[#allocation22_spill] sm:$0xff] }
 0x1bb   : > { %v678_v14 = vpop.f32.mrf.mxu0  ;;  %v535_v11 = vadd.f32 %v10704_v53, %v8458_v63 }
 0x1bc   : > { %v7318_v55 = vpack.i.bf16 %v581_v44, %v677_v46  ;;  %v679_v56 = vadd.f32 %v678_v14, %v8458_v63  ;;  %v10705_v46 = vld [vmem:[#allocation21_spill] sm:$0xff] }
 0x1bd   : > { %v682_v13 = vpop.f32.mrf.mxu0  ;;  %v529_v14 = vadd.f32 %v10705_v46, %v8458_v63 }
 0x1be   : > { %v683_v3 = vadd.f32 %v682_v13, %v8353_v29  ;;  %7319 = vxpose.xlu0.b32.cont [14/16] %v7318_v55, 128  ;;  %v10706_v13 = vld [vmem:[#allocation20_spill] sm:$0xff] }
 0x1bf   : > { %v684_v57 = vpop.f32.mrf.mxu0  ;;  %v523_v48 = vadd.f32 %v10706_v13, %v8458_v63 }
 0x1c0   : > { %v7320_v16 = vpack.i.bf16 %v587_v50, %v683_v3  ;;  %v685_v30 = vadd.f32 %v684_v57, %v8458_v63  ;;  %v10707_v3 = vld [vmem:[#allocation19_spill] sm:$0xff] }
 0x1c1   : > { %v688_v52 = vpop.f32.mrf.mxu0  ;;  %v517_v57 = vadd.f32 %v10707_v3, %v8458_v63 }
 0x1c2   : > { %v689_v19 = vadd.f32 %v688_v52, %v8353_v29  ;;  %7321 = vxpose.xlu0.b32.cont [15/16] %v7320_v16, 128  ;;  %v10708_v52 = vld [vmem:[#allocation18_spill] sm:$0xff] }
 0x1c3   : > { %v690_v59 = vpop.f32.mrf.mxu0 }
 0x1c4   : > { %v691_v4 = vadd.f32 %v690_v59, %v8458_v63  ;;  %v7322_v21 = vpack.i.bf16 %v593_v54, %v689_v19  ;;  %v511_v54 = vadd.f32 %v10708_v52, %v8458_v63  ;;  %v10709_v59 = vld [vmem:[#allocation17_spill] sm:$0xff] }
 0x1c5   : > { %v8467_v22 = vpop.f32.mrf.mxu0 }
 0x1c6   : > { %6265 = vmatprep.subr.mxu1 %v691_v4  ;;  %7323 = vxpose.xlu0.b32.end [16/16] %v7322_v21, 128  ;;  %v505_v4 = vadd.f32 %v10709_v59, %v8458_v63 }
 0x1c7   : > { %v8472_v25 = vpop.f32.mrf.mxu0  ;;  %6266 = vmatpush3.msra.mxu1 %v595_v24 }
 0x1c8   : > { %6267 = vmatprep.subr.mxu1 %v685_v30 }
 0x1c9   : > { %v8477_v28 = vpop.f32.mrf.mxu0  ;;  %6268 = vmatpush3.msra.mxu1 %v589_v62 }
 0x1ca   : > { %6269 = vmatprep.subr.mxu1 %v679_v56 }
 0x1cb   : > { %v8482_v31 = vpop.f32.mrf.mxu0  ;;  %6270 = vmatpush3.msra.mxu1 %v583_v6 }
 0x1cc   : > { %6271 = vmatprep.subr.mxu1 %v673_v5 }
 0x1cd   : > { %v8487_v34 = vpop.f32.mrf.mxu0  ;;  %6272 = vmatpush3.msra.mxu1 %v577_v32 }
 0x1ce   : > { %6273 = vmatprep.subr.mxu1 %v667_v27 }
 0x1cf   : > { %v8493_v23 = vpop.f32.mrf.mxu0  ;;  %6274 = vmatpush3.msra.mxu1 %v571_v7 }
 0x1d0   : > { %6275 = vmatprep.subr.mxu1 %v661_v26 }
 0x1d1   : > { %v8499_v12 = vpop.f32.mrf.mxu0  ;;  %6276 = vmatpush3.msra.mxu1 %v565_v15 }
 0x1d2   : > { %6277 = vmatprep.subr.mxu1 %v655_v8 }
 0x1d3   : > { %v8505_v38 = vpop.f32.mrf.mxu0  ;;  %6278 = vmatpush3.msra.mxu1 %v559_v17 }
 0x1d4   : > { %6279 = vmatprep.subr.mxu1 %v649_v49  ;;  %v695_v49 = vadd.f32 %v8467_v22, %v8353_v29 }
 0x1d5   : > { %v8511_v10 = vpop.f32.mrf.mxu0  ;;  %6280 = vmatpush3.msra.mxu1 %v553_v9 }
 0x1d6   : > { %6281 = vmatprep.subr.mxu1 %v643_v47 }
 0x1d7   : > { %v8517_v1 = vpop.f32.mrf.mxu0  ;;  %6282 = vmatpush3.msra.mxu1 %v547_v60 }
 0x1d8   : > { %6283 = vmatprep.subr.mxu1 %v637_v45  ;;  %v6859_v45 = vpop.f32.mrf.mxu1 }
 0x1d9   : > { %v8523_v44 = vpop.f32.mrf.mxu0  ;;  %6284 = vmatpush3.msra.mxu1 %v541_v42  ;;  %v431_v42 = vsub.s32 2, %v8322_v58 }
 0x1da   : > { %6285 = vmatprep.subr.mxu1 %v631_v43  ;;  %v951_v53 = vpop.f32.mrf.mxu1 }
 0x1db   : > { %v8529_v55 = vpop.f32.mrf.mxu0  ;;  %6286 = vmatpush3.msra.mxu1 %v535_v11  ;;  %v701_v11 = vadd.f32 %v8477_v28, %v8353_v29  ;;  %v8598_v46 = vrot.slane %v8344_v61, %v431_v42 }
 0x1dc   : > { %6287 = vmatprep.subr.mxu1 %v625_v41 }
 0x1dd   : > { %v8535_v50 = vpop.f32.mrf.mxu0  ;;  %6288 = vmatpush3.msra.mxu1 %v529_v14  ;;  %v957_v3 = vadd.f32 %v6859_v45, %v8598_v46  ;;  %v713_v45 = vadd.f32 %v8499_v12, %v8353_v29 }
 0x1de   : > { %6289 = vmatprep.subr.mxu1 %v619_v39 }
 0x1df   : > { %v8541_v16 = vpop.f32.mrf.mxu0  ;;  %6290 = vmatpush3.msra.mxu1 %v523_v48  ;;  %v6862_v48 = vpop.f32.mrf.mxu1  ;;  %1273 = vst [vmem:[%s8608_s16 + $0x8] sm:$0xff] %v957_v3 }
 0x1e0   : > { %6291 = vmatprep.subr.mxu1 %v613_v37  ;;  %v967_v28 = vadd.f32 %v6862_v48, %v8598_v46 }
 0x1e1   : > { %v8547_v19 = vpop.f32.mrf.mxu0  ;;  %6292 = vmatpush3.msra.mxu1 %v517_v57  ;;  %v952_v57 = vadd.f32 %v951_v53, %v8598_v46  ;;  %v961_v52 = vpop.f32.mrf.mxu1 }
 0x1e2   : > { %6293 = vmatprep.subr.mxu1 %v607_v35  ;;  %v962_v59 = vadd.f32 %v961_v52, %v8598_v46  ;;  %1275 = vst [vmem:[%s8608_s16 + $0x18] sm:$0xff] %v967_v28 }
 0x1e3   : > { %v8553_v21 = vpop.f32.mrf.mxu0  ;;  %6294 = vmatpush3.msra.mxu1 %v511_v54  ;;  %v707_v54 = vadd.f32 %v8487_v34, %v8353_v29  ;;  %1272 = vst [vmem:[%s8608_s16] sm:$0xff] %v952_v57 }
 0x1e4   : > { %6295 = vmatprep.subr.mxu1 %v601_v18  ;;  %1274 = vst [vmem:[%s8608_s16 + $0x10] sm:$0xff] %v962_v59 }
 0x1e5   : > { %v8555_v24 = vpop.f32.mrf.mxu0  ;;  %6296 = vmatpush3.msra.mxu1 %v505_v4 }
 0x1e7   : > { %v8557_v2 = vpop.f32.mrf.mxu0 }
 0x1e9   : > { %v8559_v30 = vpop.f32.mrf.mxu0 }
 0x1eb   : > { %v8561_v62 = vpop.f32.mrf.mxu0 }
 0x1ed   : > { %v8563_v56 = vpop.f32.mrf.mxu0 }
 0x1ef   : > { %v8565_v0 = vpop.f32.mrf.mxu0 }
 0x1f1   : > { %v8567_v6 = vpop.f32.mrf.mxu0 }
 0x1f3   : > { %v8569_v5 = vpop.f32.mrf.mxu0 }
 0x1f5   : > { %v8571_v32 = vpop.f32.mrf.mxu0 }
 0x1f7   : > { %v8573_v27 = vpop.f32.mrf.mxu0 }
 0x1f9   : > { %v8575_v7 = vpop.f32.mrf.mxu0 }
 0x1fb   : > { %v8577_v26 = vpop.f32.mrf.mxu0 }
 0x1fd   : > { %v8579_v33 = vpop.f32.mrf.mxu0 }
 0x1ff   : > { %v8581_v15 = vpop.f32.mrf.mxu0 }
 0x201   : > { %v8583_v8 = vpop.f32.mrf.mxu0 }
 0x203   : > { %v8585_v20 = vpop.f32.mrf.mxu0 }
 0x205   : > { %v790_v17 = vpop.f32.mrf.mxu0 }
 0x206   : > { %v791_v36 = vadd.f32 %v790_v17, %v8353_v29  ;;  %v7324_v9 = vpop.trf.xlu0 }
 0x207   : > { %v8590_v47 = vpop.f32.mrf.mxu0  ;;  %v7328_v51 = vunpack.i.h.bf16 %v7324_v9  ;;  %v7325_v60 = vunpack.i.l.bf16 %v7324_v9 }
 0x208   : > { %v7404_v40 = vpack.i.bf16 %v695_v49, %v791_v36  ;;  %v6865_v49 = vpop.f32.mrf.mxu1 }
 0x209   : > { %v796_v43 = vpop.f32.mrf.mxu0  ;;  %1544 = vmatprep.mubr.f32.mxu1 %v7325_v60  ;;  %v977_v9 = vadd.f32 %v6865_v49, %v8598_v46 }
 0x20a   : > { %v797_v22 = vadd.f32 %v796_v43, %v8353_v29  ;;  %7405 = vxpose.xlu1.b32.start [1/16] %v7404_v40, 128  ;;  %v7329_v41 = vpop.trf.xlu0  ;;  %1545 = vmatmul.mubr.f32.vlgmr.msra.gmra.mxu1 %v7328_v51  ;;  %v971_v60 = vpop.f32.mrf.mxu1 }
 0x20b   : > { %v8600_v14 = vpop.f32.mrf.mxu0  ;;  %v7330_v39 = vunpack.i.l.bf16 %v7329_v41  ;;  %v7333_v13 = vunpack.i.h.bf16 %v7329_v41  ;;  %1277 = vst [vmem:[%s8608_s16 + $0x28] sm:$0xff] %v977_v9  ;;  %v972_v43 = vadd.f32 %v971_v60, %v8598_v46 }
 0x20c   : > { %v7406_v37 = vpack.i.bf16 %v701_v11, %v797_v22  ;;  %v6868_v41 = vpop.f32.mrf.mxu1 }
 0x20d   : > { %v802_v35 = vpop.f32.mrf.mxu0  ;;  %1549 = vmatprep.mubr.f32.mxu1 %v7330_v39  ;;  %1276 = vst [vmem:[%s8608_s16 + $0x20] sm:$0xff] %v972_v43 }
 0x20e   : > { %v803_v61 = vadd.f32 %v802_v35, %v8353_v29  ;;  %7407 = vxpose.xlu1.b32.cont [2/16] %v7406_v37, 128  ;;  %v7334_v18 = vpop.trf.xlu0  ;;  %1550 = vmatmul.mubr.f32.gmra.mxu1 %v7333_v13  ;;  %v987_v13 = vadd.f32 %v6868_v41, %v8598_v46  ;;  %v981_v48 = vpop.f32.mrf.mxu1  ;;  %v719_v37 = vadd.f32 %v8511_v10, %v8353_v29 }
 0x20f   : > { %v8613_v4 = vpop.f32.mrf.mxu0  ;;  %v7335_v17 = vunpack.i.l.bf16 %v7334_v18  ;;  %v7338_v34 = vunpack.i.h.bf16 %v7334_v18  ;;  %v982_v35 = vadd.f32 %v981_v48, %v8598_v46 }
 0x210   : > { %v7408_v36 = vpack.i.bf16 %v707_v54, %v803_v61  ;;  %1279 = vst [vmem:[%s8608_s16 + $0x38] sm:$0xff] %v987_v13  ;;  %v6871_v61 = vpop.f32.mrf.mxu1 }
 0x211   : > { %v808_v51 = vpop.f32.mrf.mxu0  ;;  %1554 = vmatprep.mubr.f32.mxu1 %v7335_v17  ;;  %1278 = vst [vmem:[%s8608_s16 + $0x30] sm:$0xff] %v982_v35  ;;  %v997_v59 = vadd.f32 %v6871_v61, %v8598_v46 }
 0x212   : > { %v809_v40 = vadd.f32 %v808_v51, %v8353_v29  ;;  %7409 = vxpose.xlu1.b32.cont [3/16] %v7408_v36, 128  ;;  %v7339_v42 = vpop.trf.xlu0  ;;  %1555 = vmatmul.mubr.f32.gmra.mxu1 %v7338_v34  ;;  %v991_v17 = vpop.f32.mrf.mxu1  ;;  %v725_v34 = vadd.f32 %v8523_v44, %v8353_v29 }
 0x213   : > { %v8623_v53 = vpop.f32.mrf.mxu0  ;;  %v7340_v11 = vunpack.i.l.bf16 %v7339_v42  ;;  %v7343_v22 = vunpack.i.h.bf16 %v7339_v42  ;;  %1281 = vst [vmem:[%s8608_s16 + $0x48] sm:$0xff] %v997_v59  ;;  %v992_v9 = vadd.f32 %v991_v17, %v8598_v46 }
 0x214   : > { %v7410_v39 = vpack.i.bf16 %v713_v45, %v809_v40  ;;  %v6874_v40 = vpop.f32.mrf.mxu1 }
 0x215   : > { %v814_v12 = vpop.f32.mrf.mxu0  ;;  %1559 = vmatprep.mubr.f32.mxu1 %v7340_v11  ;;  %1280 = vst [vmem:[%s8608_s16 + $0x40] sm:$0xff] %v992_v9  ;;  %v1007_v43 = vadd.f32 %v6874_v40, %v8598_v46 }
 0x216   : > { %v815_v3 = vadd.f32 %v814_v12, %v8353_v29  ;;  %7411 = vxpose.xlu1.b32.cont [4/16] %v7410_v39, 128  ;;  %v7344_v57 = vpop.trf.xlu0  ;;  %1560 = vmatmul.mubr.f32.gmra.mxu1 %v7343_v22  ;;  %v1001_v11 = vpop.f32.mrf.mxu1  ;;  %v731_v22 = vadd.f32 %v8535_v50, %v8353_v29 }
 0x217   : > { %v8632_v28 = vpop.f32.mrf.mxu0  ;;  %v7345_v52 = vunpack.i.l.bf16 %v7344_v57  ;;  %v7348_v54 = vunpack.i.h.bf16 %v7344_v57  ;;  %1283 = vst [vmem:[%s8608_s16 + $0x58] sm:$0xff] %v1007_v43  ;;  %v1002_v13 = vadd.f32 %v1001_v11, %v8598_v46 }
 0x218   : > { %v7412_v18 = vpack.i.bf16 %v719_v37, %v815_v3  ;;  %v6877_v3 = vpop.f32.mrf.mxu1 }
 0x219   : > { %v820_v10 = vpop.f32.mrf.mxu0  ;;  %1564 = vmatprep.mubr.f32.mxu1 %v7345_v52  ;;  %1282 = vst [vmem:[%s8608_s16 + $0x50] sm:$0xff] %v1002_v13  ;;  %v1017_v35 = vadd.f32 %v6877_v3, %v8598_v46 }
 0x21a   : > { %v821_v49 = vadd.f32 %v820_v10, %v8353_v29  ;;  %7413 = vxpose.xlu1.b32.cont [5/16] %v7412_v18, 128  ;;  %v7349_v36 = vpop.trf.xlu0  ;;  %1565 = vmatmul.mubr.f32.gmra.mxu1 %v7348_v54  ;;  %v1011_v52 = vpop.f32.mrf.mxu1  ;;  %v737_v54 = vadd.f32 %v8547_v19, %v8353_v29 }
 0x21b   : > { %v8641_v51 = vpop.f32.mrf.mxu0  ;;  %v7350_v60 = vunpack.i.l.bf16 %v7349_v36  ;;  %v7353_v45 = vunpack.i.h.bf16 %v7349_v36  ;;  %1285 = vst [vmem:[%s8608_s16 + $0x68] sm:$0xff] %v1017_v35  ;;  %v1012_v59 = vadd.f32 %v1011_v52, %v8598_v46 }
 0x21c   : > { %v7414_v42 = vpack.i.bf16 %v725_v34, %v821_v49  ;;  %v6880_v49 = vpop.f32.mrf.mxu1 }
 0x21d   : > { %v826_v44 = vpop.f32.mrf.mxu0  ;;  %1569 = vmatprep.mubr.f32.mxu1 %v7350_v60  ;;  %1284 = vst [vmem:[%s8608_s16 + $0x60] sm:$0xff] %v1012_v59  ;;  %v1027_v9 = vadd.f32 %v6880_v49, %v8598_v46 }
 0x21e   : > { %v827_v41 = vadd.f32 %v826_v44, %v8353_v29  ;;  %7415 = vxpose.xlu1.b32.cont [6/16] %v7414_v42, 128  ;;  %v7354_v39 = vpop.trf.xlu0  ;;  %1570 = vmatmul.mubr.f32.gmra.mxu1 %v7353_v45  ;;  %v1021_v60 = vpop.f32.mrf.mxu1  ;;  %v743_v45 = vadd.f32 %v8555_v24, %v8353_v29 }
 0x21f   : > { %v8650_v12 = vpop.f32.mrf.mxu0  ;;  %v7355_v48 = vunpack.i.l.bf16 %v7354_v39  ;;  %v7358_v37 = vunpack.i.h.bf16 %v7354_v39  ;;  %1287 = vst [vmem:[%s8608_s16 + $0x78] sm:$0xff] %v1027_v9  ;;  %v1022_v43 = vadd.f32 %v1021_v60, %v8598_v46 }
 0x220   : > { %v7416_v57 = vpack.i.bf16 %v731_v22, %v827_v41  ;;  %v6883_v41 = vpop.f32.mrf.mxu1 }
 0x221   : > { %v832_v50 = vpop.f32.mrf.mxu0  ;;  %1574 = vmatprep.mubr.f32.mxu1 %v7355_v48  ;;  %1286 = vst [vmem:[%s8608_s16 + $0x70] sm:$0xff] %v1022_v43  ;;  %v1037_v13 = vadd.f32 %v6883_v41, %v8598_v46 }
 0x222   : > { %v833_v61 = vadd.f32 %v832_v50, %v8353_v29  ;;  %7417 = vxpose.xlu1.b32.cont [7/16] %v7416_v57, 128  ;;  %v7359_v18 = vpop.trf.xlu0  ;;  %1575 = vmatmul.mubr.f32.gmra.mxu1 %v7358_v37  ;;  %v1031_v48 = vpop.f32.mrf.mxu1  ;;  %v749_v37 = vadd.f32 %v8559_v30, %v8353_v29 }
 0x223   : > { %v8659_v10 = vpop.f32.mrf.mxu0  ;;  %v7360_v17 = vunpack.i.l.bf16 %v7359_v18  ;;  %v7363_v34 = vunpack.i.h.bf16 %v7359_v18  ;;  %1289 = vst [vmem:[%s8608_s16 + $0x88] sm:$0xff] %v1037_v13  ;;  %v1032_v35 = vadd.f32 %v1031_v48, %v8598_v46 }
 0x224   : > { %v7418_v36 = vpack.i.bf16 %v737_v54, %v833_v61  ;;  %v6886_v61 = vpop.f32.mrf.mxu1 }
 0x225   : > { %v838_v19 = vpop.f32.mrf.mxu0  ;;  %1579 = vmatprep.mubr.f32.mxu1 %v7360_v17  ;;  %1288 = vst [vmem:[%s8608_s16 + $0x80] sm:$0xff] %v1032_v35  ;;  %v1047_v59 = vadd.f32 %v6886_v61, %v8598_v46 }
 0x226   : > { %v839_v40 = vadd.f32 %v838_v19, %v8353_v29  ;;  %7419 = vxpose.xlu1.b32.cont [8/16] %v7418_v36, 128  ;;  %v7364_v42 = vpop.trf.xlu0  ;;  %1580 = vmatmul.mubr.f32.gmra.mxu1 %v7363_v34  ;;  %v1041_v17 = vpop.f32.mrf.mxu1  ;;  %v755_v34 = vadd.f32 %v8563_v56, %v8353_v29 }
 0x227   : > { %v8668_v44 = vpop.f32.mrf.mxu0  ;;  %v7365_v11 = vunpack.i.l.bf16 %v7364_v42  ;;  %v7368_v22 = vunpack.i.h.bf16 %v7364_v42  ;;  %1291 = vst [vmem:[%s8608_s16 + $0x98] sm:$0xff] %v1047_v59  ;;  %v1042_v9 = vadd.f32 %v1041_v17, %v8598_v46 }
 0x228   : > { %v7420_v39 = vpack.i.bf16 %v743_v45, %v839_v40  ;;  %v6889_v40 = vpop.f32.mrf.mxu1 }
 0x229   : > { %v844_v24 = vpop.f32.mrf.mxu0  ;;  %1584 = vmatprep.mubr.f32.mxu1 %v7365_v11  ;;  %1290 = vst [vmem:[%s8608_s16 + $0x90] sm:$0xff] %v1042_v9  ;;  %v1057_v43 = vadd.f32 %v6889_v40, %v8598_v46 }
 0x22a   : > { %v845_v3 = vadd.f32 %v844_v24, %v8353_v29  ;;  %7421 = vxpose.xlu1.b32.cont [9/16] %v7420_v39, 128  ;;  %v7369_v57 = vpop.trf.xlu0  ;;  %1585 = vmatmul.mubr.f32.gmra.mxu1 %v7368_v22  ;;  %v1051_v11 = vpop.f32.mrf.mxu1  ;;  %v761_v22 = vadd.f32 %v8567_v6, %v8353_v29 }
 0x22b   : > { %v8677_v50 = vpop.f32.mrf.mxu0  ;;  %v7370_v52 = vunpack.i.l.bf16 %v7369_v57  ;;  %v7373_v54 = vunpack.i.h.bf16 %v7369_v57  ;;  %1293 = vst [vmem:[%s8608_s16 + $0xa8] sm:$0xff] %v1057_v43  ;;  %v1052_v13 = vadd.f32 %v1051_v11, %v8598_v46 }
 0x22c   : > { %v7422_v18 = vpack.i.bf16 %v749_v37, %v845_v3  ;;  %v6892_v3 = vpop.f32.mrf.mxu1 }
 0x22d   : > { %v850_v30 = vpop.f32.mrf.mxu0  ;;  %1589 = vmatprep.mubr.f32.mxu1 %v7370_v52  ;;  %1292 = vst [vmem:[%s8608_s16 + $0xa0] sm:$0xff] %v1052_v13  ;;  %v1067_v35 = vadd.f32 %v6892_v3, %v8598_v46 }
 0x22e   : > { %v851_v49 = vadd.f32 %v850_v30, %v8353_v29  ;;  %7423 = vxpose.xlu1.b32.cont [10/16] %v7422_v18, 128  ;;  %v7374_v36 = vpop.trf.xlu0  ;;  %1590 = vmatmul.mubr.f32.gmra.mxu1 %v7373_v54  ;;  %v1061_v52 = vpop.f32.mrf.mxu1  ;;  %v767_v54 = vadd.f32 %v8571_v32, %v8353_v29 }
 0x22f   : > { %v8686_v19 = vpop.f32.mrf.mxu0  ;;  %v7375_v60 = vunpack.i.l.bf16 %v7374_v36  ;;  %v7378_v45 = vunpack.i.h.bf16 %v7374_v36  ;;  %1295 = vst [vmem:[%s8608_s16 + $0xb8] sm:$0xff] %v1067_v35  ;;  %v1062_v59 = vadd.f32 %v1061_v52, %v8598_v46 }
 0x230   : > { %v7424_v42 = vpack.i.bf16 %v755_v34, %v851_v49  ;;  %v6895_v49 = vpop.f32.mrf.mxu1 }
 0x231   : > { %v856_v56 = vpop.f32.mrf.mxu0  ;;  %1594 = vmatprep.mubr.f32.mxu1 %v7375_v60  ;;  %1294 = vst [vmem:[%s8608_s16 + $0xb0] sm:$0xff] %v1062_v59  ;;  %v1077_v9 = vadd.f32 %v6895_v49, %v8598_v46 }
 0x232   : > { %v857_v41 = vadd.f32 %v856_v56, %v8353_v29  ;;  %7425 = vxpose.xlu1.b32.cont [11/16] %v7424_v42, 128  ;;  %v7379_v39 = vpop.trf.xlu0  ;;  %1595 = vmatmul.mubr.f32.gmra.mxu1 %v7378_v45  ;;  %v1071_v60 = vpop.f32.mrf.mxu1  ;;  %v773_v45 = vadd.f32 %v8575_v7, %v8353_v29 }
 0x233   : > { %v8695_v24 = vpop.f32.mrf.mxu0  ;;  %v7380_v48 = vunpack.i.l.bf16 %v7379_v39  ;;  %v7383_v37 = vunpack.i.h.bf16 %v7379_v39  ;;  %1297 = vst [vmem:[%s8608_s16 + $0xc8] sm:$0xff] %v1077_v9  ;;  %v1072_v43 = vadd.f32 %v1071_v60, %v8598_v46 }
 0x234   : > { %v7426_v57 = vpack.i.bf16 %v761_v22, %v857_v41  ;;  %v6898_v41 = vpop.f32.mrf.mxu1 }
 0x235   : > { %v862_v6 = vpop.f32.mrf.mxu0  ;;  %1599 = vmatprep.mubr.f32.mxu1 %v7380_v48  ;;  %1296 = vst [vmem:[%s8608_s16 + $0xc0] sm:$0xff] %v1072_v43  ;;  %v1087_v13 = vadd.f32 %v6898_v41, %v8598_v46 }
 0x236   : > { %v863_v61 = vadd.f32 %v862_v6, %v8353_v29  ;;  %7427 = vxpose.xlu1.b32.cont [12/16] %v7426_v57, 128  ;;  %v7384_v18 = vpop.trf.xlu0  ;;  %1600 = vmatmul.mubr.f32.gmra.mxu1 %v7383_v37  ;;  %v1081_v7 = vpop.f32.mrf.mxu1  ;;  %v779_v37 = vadd.f32 %v8579_v33, %v8353_v29 }
 0x237   : > { %v8704_v30 = vpop.f32.mrf.mxu0  ;;  %v7385_v17 = vunpack.i.l.bf16 %v7384_v18  ;;  %v7388_v34 = vunpack.i.h.bf16 %v7384_v18  ;;  %1299 = vst [vmem:[%s8608_s16 + $0xd8] sm:$0xff] %v1087_v13  ;;  %v1082_v35 = vadd.f32 %v1081_v7, %v8598_v46  ;;  %v775_v7 = vadd.f32 %v8577_v26, %v8458_v63 }
 0x238   : > { %v7428_v36 = vpack.i.bf16 %v767_v54, %v863_v61  ;;  %v6901_v61 = vpop.f32.mrf.mxu1 }
 0x239   : > { %v868_v32 = vpop.f32.mrf.mxu0  ;;  %1604 = vmatprep.mubr.f32.mxu1 %v7385_v17  ;;  %1298 = vst [vmem:[%s8608_s16 + $0xd0] sm:$0xff] %v1082_v35  ;;  %v1097_v59 = vadd.f32 %v6901_v61, %v8598_v46  ;;  %v859_v35 = vadd.f32 %v8695_v24, %v8458_v63  ;;  %v757_v24 = vadd.f32 %v8565_v0, %v8458_v63 }
 0x23a   : > { %v869_v40 = vadd.f32 %v868_v32, %v8353_v29  ;;  %7429 = vxpose.xlu1.b32.cont [13/16] %v7428_v36, 128  ;;  %v7389_v42 = vpop.trf.xlu0  ;;  %1605 = vmatmul.mubr.f32.gmra.mxu1 %v7388_v34  ;;  %v1091_v33 = vpop.f32.mrf.mxu1  ;;  %v785_v34 = vadd.f32 %v8583_v8, %v8353_v29  ;;  %v847_v61 = vadd.f32 %v8677_v50, %v8458_v63 }
 0x23b   : > { %v870_v56 = vpop.f32.mrf.mxu0  ;;  %v7390_v11 = vunpack.i.l.bf16 %v7389_v42  ;;  %v7393_v22 = vunpack.i.h.bf16 %v7389_v42  ;;  %1301 = vst [vmem:[%s8608_s16 + $0xe8] sm:$0xff] %v1097_v59  ;;  %v1092_v9 = vadd.f32 %v1091_v33, %v8598_v46  ;;  %v841_v59 = vadd.f32 %v8668_v44, %v8458_v63 }
 0x23c   : > { %v7430_v39 = vpack.i.bf16 %v773_v45, %v869_v40  ;;  %v6904_v45 = vpop.f32.mrf.mxu1  ;;  %v745_v50 = vadd.f32 %v8557_v2, %v8458_v63  ;;  %v835_v33 = vadd.f32 %v8659_v10, %v8458_v63  ;;  %v739_v44 = vadd.f32 %v8553_v21, %v8458_v63 }
 0x23d   : > { %v874_v48 = vpop.f32.mrf.mxu0  ;;  %1609 = vmatprep.mubr.f32.mxu1 %v7390_v11  ;;  %1300 = vst [vmem:[%s8608_s16 + $0xe0] sm:$0xff] %v1092_v9  ;;  %v1107_v8 = vadd.f32 %v6904_v45, %v8598_v46  ;;  %v733_v10 = vadd.f32 %v8541_v16, %v8458_v63  ;;  %v823_v9 = vadd.f32 %v8641_v51, %v8458_v63 }
 0x23e   : > { %v875_v3 = vadd.f32 %v874_v48, %v8353_v29  ;;  %7431 = vxpose.xlu1.b32.cont [14/16] %v7430_v39, 128  ;;  %v7394_v57 = vpop.trf.xlu0  ;;  %1610 = vmatmul.mubr.f32.gmra.mxu1 %v7393_v22  ;;  %v1101_v11 = vpop.f32.mrf.mxu1  ;;  %v781_v39 = vadd.f32 %v8581_v15, %v8458_v63  ;;  %v871_v48 = vadd.f32 %v870_v56, %v8458_v63 }
 0x23f   : > { %v876_v6 = vpop.f32.mrf.mxu0  ;;  %v7395_v52 = vunpack.i.l.bf16 %v7394_v57  ;;  %v7398_v54 = vunpack.i.h.bf16 %v7394_v57  ;;  %1303 = vst [vmem:[%s8608_s16 + $0xf8] sm:$0xff] %v1107_v8  ;;  %v1102_v41 = vadd.f32 %v1101_v11, %v8598_v46  ;;  %v769_v56 = vadd.f32 %v8573_v27, %v8458_v63 }
 0x240   : > { %v7432_v18 = vpack.i.bf16 %v779_v37, %v875_v3  ;;  %v877_v22 = vadd.f32 %v876_v6, %v8458_v63  ;;  %v6907_v13 = vpop.f32.mrf.mxu1  ;;  %v865_v3 = vadd.f32 %v8704_v30, %v8458_v63  ;;  %v763_v30 = vadd.f32 %v8569_v5, %v8458_v63 }
 0x241   : > { %v880_v17 = vpop.f32.mrf.mxu0  ;;  %1614 = vmatprep.mubr.f32.mxu1 %v7395_v52  ;;  %1302 = vst [vmem:[%s8608_s16 + $0xf0] sm:$0xff] %v1102_v41  ;;  %v853_v52 = vadd.f32 %v8686_v19, %v8458_v63  ;;  %v751_v19 = vadd.f32 %v8561_v62, %v8458_v63  ;;  %v721_v51 = vadd.f32 %v8517_v1, %v8458_v63 }
 0x242   : > { %v881_v49 = vadd.f32 %v880_v17, %v8353_v29  ;;  %7433 = vxpose.xlu1.b32.cont [15/16] %v7432_v18, 128  ;;  %v7399_v36 = vpop.trf.xlu0  ;;  %1615 = vmatmul.mubr.f32.gmra.mxu1 %v7398_v54  ;;  %v787_v29 = vadd.f32 %v8585_v20, %v8458_v63  ;;  %v1117_v20 = vadd.f32 %v6907_v13, %v8598_v46  ;;  %v1111_v37 = vpop.f32.mrf.mxu1 }
 0x243   : > { %v882_v32 = vpop.f32.mrf.mxu0  ;;  %v7400_v60 = vunpack.i.l.bf16 %v7399_v36  ;;  %v7403_v43 = vunpack.i.h.bf16 %v7399_v36  ;;  %v1112_v15 = vadd.f32 %v1111_v37, %v8598_v46 }
 0x244   : > { %v883_v40 = vadd.f32 %v882_v32, %v8458_v63  ;;  %v7434_v42 = vpack.i.bf16 %v785_v34, %v881_v49  ;;  %1305 = vst [vmem:[%s8608_s16 + $0x108] sm:$0xff] %v1117_v20  ;;  %v6910_v57 = vpop.f32.mrf.mxu1  ;;  %v829_v49 = vadd.f32 %v8650_v12, %v8458_v63  ;;  %v727_v12 = vadd.f32 %v8529_v55, %v8458_v63 }
 0x245   : > { %1619 = vmatprep.mubr.f32.mxu1 %v7400_v60  ;;  %1304 = vst [vmem:[%s8608_s16 + $0x100] sm:$0xff] %v1112_v15  ;;  %v1127_v26 = vadd.f32 %v6910_v57, %v8598_v46  ;;  %v817_v60 = vadd.f32 %v8632_v28, %v8458_v63  ;;  %v715_v28 = vadd.f32 %v8505_v38, %v8458_v63 }
 0x246   : > { %7435 = vxpose.xlu1.b32.end [16/16] %v7434_v42, 128  ;;  %6345 = vmatprep.subr.mxu1 %v883_v40  ;;  %v1121_v6 = vpop.f32.mrf.mxu1  ;;  %v811_v40 = vadd.f32 %v8623_v53, %v8458_v63  ;;  %v709_v53 = vadd.f32 %v8493_v23, %v8458_v63  ;;  %v793_v23 = vadd.f32 %v8590_v47, %v8458_v63 }
 0x247   : > { %6346 = vmatpush3.msra.mxu1 %v787_v29  ;;  %1307 = vst [vmem:[%s8608_s16 + $0x118] sm:$0xff] %v1127_v26  ;;  %v1122_v27 = vadd.f32 %v1121_v6, %v8598_v46  ;;  %v799_v29 = vadd.f32 %v8600_v14, %v8458_v63  ;;  %v697_v14 = vadd.f32 %v8472_v25, %v8458_v63 }
 0x248   : > { %6347 = vmatprep.subr.mxu1 %v877_v22  ;;  %1620 = vmatmul.mubr.f32.gmra.mxu1 %v7403_v43  ;;  %v6913_v54 = vpop.f32.mrf.mxu1  ;;  %v805_v43 = vadd.f32 %v8613_v4, %v8458_v63  ;;  %v703_v4 = vadd.f32 %v8482_v31, %v8458_v63 }
 0x249   : > { %6348 = vmatpush3.msra.mxu1 %v781_v39  ;;  %1306 = vst [vmem:[%s8608_s16 + $0x110] sm:$0xff] %v1122_v27  ;;  %v1137_v5 = vadd.f32 %v6913_v54, %v8598_v46 }
 0x24a   : > { %6349 = vmatprep.subr.mxu1 %v871_v48  ;;  %v1131_v18 = vpop.f32.mrf.mxu1 }
 0x24b   : > { %6350 = vmatpush3.msra.mxu1 %v775_v7  ;;  %1309 = vst [vmem:[%s8608_s16 + $0x128] sm:$0xff] %v1137_v5  ;;  %v1132_v0 = vadd.f32 %v1131_v18, %v8598_v46 }
 0x24c   : > { %6351 = vmatprep.subr.mxu1 %v865_v3  ;;  %v6916_v17 = vpop.f32.mrf.mxu1 }
 0x24d   : > { %6352 = vmatpush3.msra.mxu1 %v769_v56  ;;  %1308 = vst [vmem:[%s8608_s16 + $0x120] sm:$0xff] %v1132_v0  ;;  %v1147_v62 = vadd.f32 %v6916_v17, %v8598_v46 }
 0x24e   : > { %6353 = vmatprep.subr.mxu1 %v859_v35  ;;  %v1141_v34 = vpop.f32.mrf.mxu1 }
 0x24f   : > { %6354 = vmatpush3.msra.mxu1 %v763_v30  ;;  %1311 = vst [vmem:[%s8608_s16 + $0x138] sm:$0xff] %v1147_v62  ;;  %v1142_v2 = vadd.f32 %v1141_v34, %v8598_v46 }
 0x250   : > { %6355 = vmatprep.subr.mxu1 %v853_v52  ;;  %v6919_v36 = vpop.f32.mrf.mxu1 }
 0x251   : > { %6356 = vmatpush3.msra.mxu1 %v757_v24  ;;  %1310 = vst [vmem:[%s8608_s16 + $0x130] sm:$0xff] %v1142_v2  ;;  %v1157_v21 = vadd.f32 %v6919_v36, %v8598_v46 }
 0x252   : > { %6357 = vmatprep.subr.mxu1 %v847_v61  ;;  %v1151_v32 = vpop.f32.mrf.mxu1 }
 0x253   : > { %6358 = vmatpush3.msra.mxu1 %v751_v19  ;;  %1313 = vst [vmem:[%s8608_s16 + $0x148] sm:$0xff] %v1157_v21  ;;  %v1152_v16 = vadd.f32 %v1151_v32, %v8598_v46 }
 0x254   : > { %6359 = vmatprep.subr.mxu1 %v841_v59  ;;  %v6922_v45 = vpop.f32.mrf.mxu1 }
 0x255   : > { %6360 = vmatpush3.msra.mxu1 %v745_v50  ;;  %1312 = vst [vmem:[%s8608_s16 + $0x140] sm:$0xff] %v1152_v16  ;;  %v1167_v55 = vadd.f32 %v6922_v45, %v8598_v46 }
 0x256   : > { %6361 = vmatprep.subr.mxu1 %v835_v33  ;;  %v1161_v42 = vpop.f32.mrf.mxu1 }
 0x257   : > { %6362 = vmatpush3.msra.mxu1 %v739_v44  ;;  %1315 = vst [vmem:[%s8608_s16 + $0x158] sm:$0xff] %v1167_v55  ;;  %v1162_v1 = vadd.f32 %v1161_v42, %v8598_v46 }
 0x258   : > { %6363 = vmatprep.subr.mxu1 %v829_v49  ;;  %v6925_v8 = vpop.f32.mrf.mxu1 }
 0x259   : > { %6364 = vmatpush3.msra.mxu1 %v733_v10  ;;  %1314 = vst [vmem:[%s8608_s16 + $0x150] sm:$0xff] %v1162_v1  ;;  %v1177_v38 = vadd.f32 %v6925_v8, %v8598_v46 }
 0x25a   : > { %6365 = vmatprep.subr.mxu1 %v823_v9  ;;  %v1171_v11 = vpop.f32.mrf.mxu1 }
 0x25b   : > { %6366 = vmatpush3.msra.mxu1 %v727_v12  ;;  %1317 = vst [vmem:[%s8608_s16 + $0x168] sm:$0xff] %v1177_v38  ;;  %v1172_v22 = vadd.f32 %v1171_v11, %v8598_v46 }
 0x25c   : > { %6367 = vmatprep.subr.mxu1 %v817_v60  ;;  %v6928_v41 = vpop.f32.mrf.mxu1 }
 0x25d   : > { %6368 = vmatpush3.msra.mxu1 %v721_v51  ;;  %1316 = vst [vmem:[%s8608_s16 + $0x160] sm:$0xff] %v1172_v22  ;;  %v1187_v31 = vadd.f32 %v6928_v41, %v8598_v46 }
 0x25e   : > { %6369 = vmatprep.subr.mxu1 %v811_v40  ;;  %v1181_v39 = vpop.f32.mrf.mxu1 }
 0x25f   : > { %6370 = vmatpush3.msra.mxu1 %v715_v28  ;;  %1319 = vst [vmem:[%s8608_s16 + $0x178] sm:$0xff] %v1187_v31  ;;  %v1182_v47 = vadd.f32 %v1181_v39, %v8598_v46 }
 0x260   : > { %6371 = vmatprep.subr.mxu1 %v805_v43  ;;  %v6931_v13 = vpop.f32.mrf.mxu1 }
 0x261   : > { %6372 = vmatpush3.msra.mxu1 %v709_v53  ;;  %1318 = vst [vmem:[%s8608_s16 + $0x170] sm:$0xff] %v1182_v47  ;;  %v1197_v48 = vadd.f32 %v6931_v13, %v8598_v46 }
 0x262   : > { %6373 = vmatprep.subr.mxu1 %v799_v29  ;;  %v1191_v63 = vpop.f32.mrf.mxu1 }
 0x263   : > { %6374 = vmatpush3.msra.mxu1 %v703_v4  ;;  %1321 = vst [vmem:[%s8608_s16 + $0x188] sm:$0xff] %v1197_v48  ;;  %v1192_v25 = vadd.f32 %v1191_v63, %v8598_v46 }
 0x264   : > { %6375 = vmatprep.subr.mxu1 %v793_v23  ;;  %v6934_v20 = vpop.f32.mrf.mxu1 }
 0x265   : > { %6376 = vmatpush3.msra.mxu1 %v697_v14  ;;  %1320 = vst [vmem:[%s8608_s16 + $0x180] sm:$0xff] %v1192_v25  ;;  %v1207_v7 = vadd.f32 %v6934_v20, %v8598_v46 }
 0x266   : > { %v1201_v37 = vpop.f32.mrf.mxu1 }
 0x267   : > { %1323 = vst [vmem:[%s8608_s16 + $0x198] sm:$0xff] %v1207_v7  ;;  %v1202_v3 = vadd.f32 %v1201_v37, %v8598_v46 }
 0x268   : > { %v6937_v15 = vpop.f32.mrf.mxu1 }
 0x269   : > { %1322 = vst [vmem:[%s8608_s16 + $0x190] sm:$0xff] %v1202_v3  ;;  %v1217_v56 = vadd.f32 %v6937_v15, %v8598_v46 }
 0x26a   : > { %v1211_v57 = vpop.f32.mrf.mxu1 }
 0x26b   : > { %1325 = vst [vmem:[%s8608_s16 + $0x1a8] sm:$0xff] %v1217_v56  ;;  %v1212_v35 = vadd.f32 %v1211_v57, %v8598_v46 }
 0x26c   : > { %v6940_v26 = vpop.f32.mrf.mxu1 }
 0x26d   : > { %1324 = vst [vmem:[%s8608_s16 + $0x1a0] sm:$0xff] %v1212_v35  ;;  %v1227_v30 = vadd.f32 %v6940_v26, %v8598_v46 }
 0x26e   : > { %v1221_v6 = vpop.f32.mrf.mxu1 }
 0x26f   : > { %1327 = vst [vmem:[%s8608_s16 + $0x1b8] sm:$0xff] %v1227_v30  ;;  %v1222_v52 = vadd.f32 %v1221_v6, %v8598_v46 }
 0x270   : > { %v6943_v27 = vpop.f32.mrf.mxu1 }
 0x271   : > { %1326 = vst [vmem:[%s8608_s16 + $0x1b0] sm:$0xff] %v1222_v52  ;;  %v1237_v24 = vadd.f32 %v6943_v27, %v8598_v46 }
 0x272   : > { %v1231_v54 = vpop.f32.mrf.mxu1 }
 0x273   : > { %1329 = vst [vmem:[%s8608_s16 + $0x1c8] sm:$0xff] %v1237_v24  ;;  %v1232_v61 = vadd.f32 %v1231_v54, %v8598_v46 }
 0x274   : > { %v6946_v5 = vpop.f32.mrf.mxu1 }
 0x275   : > { %1328 = vst [vmem:[%s8608_s16 + $0x1c0] sm:$0xff] %v1232_v61  ;;  %v1247_v19 = vadd.f32 %v6946_v5, %v8598_v46 }
 0x276   : > { %v1241_v18 = vpop.f32.mrf.mxu1 }
 0x277   : > { %1331 = vst [vmem:[%s8608_s16 + $0x1d8] sm:$0xff] %v1247_v19  ;;  %v1242_v59 = vadd.f32 %v1241_v18, %v8598_v46 }
 0x278   : > { %v6949_v0 = vpop.f32.mrf.mxu1 }
 0x279   : > { %1330 = vst [vmem:[%s8608_s16 + $0x1d0] sm:$0xff] %v1242_v59  ;;  %v1257_v50 = vadd.f32 %v6949_v0, %v8598_v46 }
 0x27a   : > { %v1251_v17 = vpop.f32.mrf.mxu1 }
 0x27b   : > { %1333 = vst [vmem:[%s8608_s16 + $0x1e8] sm:$0xff] %v1257_v50  ;;  %v1252_v33 = vadd.f32 %v1251_v17, %v8598_v46 }
 0x27c   : > { %v6952_v62 = vpop.f32.mrf.mxu1 }
 0x27d   : > { %1332 = vst [vmem:[%s8608_s16 + $0x1e0] sm:$0xff] %v1252_v33  ;;  %v1267_v44 = vadd.f32 %v6952_v62, %v8598_v46 }
 0x27e   : > { %v1261_v34 = vpop.f32.mrf.mxu1 }
 0x27f   : > { %1335 = vst [vmem:[%s8608_s16 + $0x1f8] sm:$0xff] %v1267_v44  ;;  %v1262_v2 = vadd.f32 %v1261_v34, %v8598_v46 }
 0x281   : > { %1334 = vst [vmem:[%s8608_s16 + $0x1f0] sm:$0xff] %v1262_v2 }
 0x286   : > { %v7436_v49 = vpop.trf.xlu1 }
 0x287   : > { %v7440_v10 = vunpack.i.h.bf16 %v7436_v49  ;;  %v7437_v36 = vunpack.i.l.bf16 %v7436_v49 }
 0x289   : > { %1689 = vmatprep.mubr.f32.mxu1 %v7437_v36 }
 0x28a   : > { %v7441_v9 = vpop.trf.xlu1  ;;  %1690 = vmatmul.mubr.f32.vlgmr.msra.gmra.mxu1 %v7440_v10 }
 0x28b   : > { %v7442_v21 = vunpack.i.l.bf16 %v7441_v9  ;;  %v7445_v12 = vunpack.i.h.bf16 %v7441_v9 }
 0x28d   : > { %1694 = vmatprep.mubr.f32.mxu1 %v7442_v21 }
 0x28e   : > { %v7446_v32 = vpop.trf.xlu1  ;;  %1695 = vmatmul.mubr.f32.gmra.mxu1 %v7445_v12 }
 0x28f   : > { %v7447_v60 = vunpack.i.l.bf16 %v7446_v32  ;;  %v7450_v16 = vunpack.i.h.bf16 %v7446_v32 }
 0x291   : > { %1699 = vmatprep.mubr.f32.mxu1 %v7447_v60 }
 0x292   : > { %v7451_v51 = vpop.trf.xlu1  ;;  %1700 = vmatmul.mubr.f32.gmra.mxu1 %v7450_v16 }
 0x293   : > { %v7452_v45 = vunpack.i.l.bf16 %v7451_v51  ;;  %v7455_v40 = vunpack.i.h.bf16 %v7451_v51 }
 0x295   : > { %1704 = vmatprep.mubr.f32.mxu1 %v7452_v45 }
 0x296   : > { %v7456_v46 = vpop.trf.xlu1  ;;  %1705 = vmatmul.mubr.f32.gmra.mxu1 %v7455_v40 }
 0x297   : > { %v7457_v55 = vunpack.i.l.bf16 %v7456_v46  ;;  %v7460_v28 = vunpack.i.h.bf16 %v7456_v46 }
 0x299   : > { %1709 = vmatprep.mubr.f32.mxu1 %v7457_v55 }
 0x29a   : > { %v7461_v42 = vpop.trf.xlu1  ;;  %1710 = vmatmul.mubr.f32.gmra.mxu1 %v7460_v28 }
 0x29b   : > { %v7462_v43 = vunpack.i.l.bf16 %v7461_v42  ;;  %v7465_v1 = vunpack.i.h.bf16 %v7461_v42 }
 0x29d   : > { %1714 = vmatprep.mubr.f32.mxu1 %v7462_v43 }
 0x29e   : > { %v7466_v53 = vpop.trf.xlu1  ;;  %1715 = vmatmul.mubr.f32.gmra.mxu1 %v7465_v1 }
 0x29f   : > { %v7467_v8 = vunpack.i.l.bf16 %v7466_v53  ;;  %v7470_v29 = vunpack.i.h.bf16 %v7466_v53 }
 0x2a1   : > { %1719 = vmatprep.mubr.f32.mxu1 %v7467_v8 }
 0x2a2   : > { %v7471_v38 = vpop.trf.xlu1  ;;  %1720 = vmatmul.mubr.f32.gmra.mxu1 %v7470_v29 }
 0x2a3   : > { %v7472_v4 = vunpack.i.l.bf16 %v7471_v38  ;;  %v7475_v11 = vunpack.i.h.bf16 %v7471_v38 }
 0x2a5   : > { %1724 = vmatprep.mubr.f32.mxu1 %v7472_v4 }
 0x2a6   : > { %v7476_v23 = vpop.trf.xlu1  ;;  %1725 = vmatmul.mubr.f32.gmra.mxu1 %v7475_v11 }
 0x2a7   : > { %v7480_v22 = vunpack.i.h.bf16 %v7476_v23  ;;  %v7477_v14 = vunpack.i.l.bf16 %v7476_v23 }
 0x2a9   : > { %1729 = vmatprep.mubr.f32.mxu1 %v7477_v14 }
 0x2aa   : > { %v7481_v41 = vpop.trf.xlu1  ;;  %1730 = vmatmul.mubr.f32.gmra.mxu1 %v7480_v22 }
 0x2ab   : > { %v7485_v31 = vunpack.i.h.bf16 %v7481_v41  ;;  %v7482_v39 = vunpack.i.l.bf16 %v7481_v41 }
 0x2ad   : > { %1734 = vmatprep.mubr.f32.mxu1 %v7482_v39 }
 0x2ae   : > { %v7486_v47 = vpop.trf.xlu1  ;;  %1735 = vmatmul.mubr.f32.gmra.mxu1 %v7485_v31 }
 0x2af   : > { %v7490_v13 = vunpack.i.h.bf16 %v7486_v47  ;;  %v7487_v48 = vunpack.i.l.bf16 %v7486_v47 }
 0x2b1   : > { %1739 = vmatprep.mubr.f32.mxu1 %v7487_v48 }
 0x2b2   : > { %v7491_v63 = vpop.trf.xlu1  ;;  %1740 = vmatmul.mubr.f32.gmra.mxu1 %v7490_v13 }
 0x2b3   : > { %v7495_v25 = vunpack.i.h.bf16 %v7491_v63  ;;  %v7492_v20 = vunpack.i.l.bf16 %v7491_v63 }
 0x2b5   : > { %1744 = vmatprep.mubr.f32.mxu1 %v7492_v20 }
 0x2b6   : > { %v7496_v7 = vpop.trf.xlu1  ;;  %1745 = vmatmul.mubr.f32.gmra.mxu1 %v7495_v25 }
 0x2b7   : > { %v7500_v37 = vunpack.i.h.bf16 %v7496_v7  ;;  %v7497_v3 = vunpack.i.l.bf16 %v7496_v7  ;;  %v1336_v7 = vld [vmem:[#allocation3 + $0x30] sm:$0xff] }
 0x2b9   : > { %1749 = vmatprep.mubr.f32.mxu1 %v7497_v3 }
 0x2ba   : > { %v7501_v15 = vpop.trf.xlu1  ;;  %1750 = vmatmul.mubr.f32.gmra.mxu1 %v7500_v37 }
 0x2bb   : > { %v7505_v56 = vunpack.i.h.bf16 %v7501_v15  ;;  %v7502_v57 = vunpack.i.l.bf16 %v7501_v15 }
 0x2bd   : > { %1754 = vmatprep.mubr.f32.mxu1 %v7502_v57 }
 0x2be   : > { %v7506_v35 = vpop.trf.xlu1  ;;  %1755 = vmatmul.mubr.f32.gmra.mxu1 %v7505_v56 }
 0x2bf   : > { %v7510_v26 = vunpack.i.h.bf16 %v7506_v35  ;;  %v7507_v30 = vunpack.i.l.bf16 %v7506_v35  ;;  %v1337_v35 = vld [vmem:[#allocation3] sm:$0xff] }
 0x2c1   : > { %1759 = vmatprep.mubr.f32.mxu1 %v7507_v30 }
 0x2c2   : > { %v7511_v6 = vpop.trf.xlu1  ;;  %1760 = vmatmul.mubr.f32.gmra.mxu1 %v7510_v26 }
 0x2c3   : > { %v7515_v52 = vunpack.i.h.bf16 %v7511_v6  ;;  %v7512_v27 = vunpack.i.l.bf16 %v7511_v6 }
 0x2c5   : > { %1764 = vmatprep.mubr.f32.mxu1 %v7512_v27 }
 0x2c6   : > { %1765 = vmatmul.mubr.f32.gmra.mxu1 %v7515_v52 }
 0x2ca   : > { %v6297_v24 = vpop.f32.mrf.mxu1 }
 0x2cc   : > { %v6298_v54 = vpop.f32.mrf.mxu1 }
 0x2cd   : > { %v6299_v61 = vadd.f32 %v6298_v54, %v6297_v24  ;;  %v1338_v24 = vld [vmem:[#allocation3 + $0x58] sm:$0xff] }
 0x2ce   : > { %v6300_v5 = vpop.f32.mrf.mxu1 }
 0x2d0   : > { %v6301_v19 = vpop.f32.mrf.mxu1 }
 0x2d1   : > { %v6302_v18 = vadd.f32 %v6301_v19, %v6300_v5 }
 0x2d2   : > { %v6303_v59 = vpop.f32.mrf.mxu1 }
 0x2d4   : > { %v6304_v0 = vpop.f32.mrf.mxu1 }
 0x2d5   : > { %v6305_v50 = vadd.f32 %v6304_v0, %v6303_v59 }
 0x2d6   : > { %v6306_v17 = vpop.f32.mrf.mxu1 }
 0x2d8   : > { %v6307_v33 = vpop.f32.mrf.mxu1 }
 0x2d9   : > { %v8857_v62 = vadd.f32 %v6307_v33, %v6306_v17  ;;  %v1339_v17 = vld [vmem:[#allocation3 + $0x18] sm:$0xff] }
 0x2da   : > { %v6309_v44 = vpop.f32.mrf.mxu1 }
 0x2dc   : > { %v6310_v34 = vpop.f32.mrf.mxu1 }
 0x2dd   : > { %v8859_v49 = vadd.f32 %v6310_v34, %v6309_v44 }
 0x2de   : > { %v6312_v2 = vpop.f32.mrf.mxu1 }
 0x2e0   : > { %v6313_v10 = vpop.f32.mrf.mxu1 }
 0x2e1   : > { %v8861_v36 = vadd.f32 %v6313_v10, %v6312_v2  ;;  %v1340_v10 = vld [vmem:[#allocation3 + $0x50] sm:$0xff] }
 0x2e2   : > { %v6315_v9 = vpop.f32.mrf.mxu1 }
 0x2e4   : > { %v6316_v21 = vpop.f32.mrf.mxu1 }
 0x2e5   : > { %v8863_v12 = vadd.f32 %v6316_v21, %v6315_v9 }
 0x2e6   : > { %v6318_v32 = vpop.f32.mrf.mxu1 }
 0x2e8   : > { %v6319_v60 = vpop.f32.mrf.mxu1 }
 0x2e9   : > { %v8865_v16 = vadd.f32 %v6319_v60, %v6318_v32 }
 0x2ea   : > { %v6321_v51 = vpop.f32.mrf.mxu1 }
 0x2ec   : > { %v6322_v45 = vpop.f32.mrf.mxu1 }
 0x2ed   : > { %v8867_v40 = vadd.f32 %v6322_v45, %v6321_v51 }
 0x2ee   : > { %v6324_v46 = vpop.f32.mrf.mxu1 }
 0x2f0   : > { %v6325_v55 = vpop.f32.mrf.mxu1 }
 0x2f1   : > { %v8869_v28 = vadd.f32 %v6325_v55, %v6324_v46 }
 0x2f2   : > { %v6327_v42 = vpop.f32.mrf.mxu1 }
 0x2f4   : > { %v6328_v43 = vpop.f32.mrf.mxu1 }
 0x2f5   : > { %v8871_v1 = vadd.f32 %v6328_v43, %v6327_v42 }
 0x2f6   : > { %v6330_v53 = vpop.f32.mrf.mxu1 }
 0x2f8   : > { %v6331_v8 = vpop.f32.mrf.mxu1 }
 0x2f9   : > { %v8873_v29 = vadd.f32 %v6331_v8, %v6330_v53 }
 0x2fa   : > { %v6333_v38 = vpop.f32.mrf.mxu1 }
 0x2fc   : > { %v6334_v4 = vpop.f32.mrf.mxu1 }
 0x2fd   : > { %v8875_v11 = vadd.f32 %v6334_v4, %v6333_v38 }
 0x2fe   : > { %v6336_v23 = vpop.f32.mrf.mxu1 }
 0x300   : > { %v6337_v22 = vpop.f32.mrf.mxu1 }
 0x301   : > { %v8877_v14 = vadd.f32 %v6337_v22, %v6336_v23 }
 0x302   : > { %v6339_v41 = vpop.f32.mrf.mxu1 }
 0x304   : > { %v6340_v31 = vpop.f32.mrf.mxu1 }
 0x305   : > { %v8879_v39 = vadd.f32 %v6340_v31, %v6339_v41 }
 0x308   : > { %v6342_v47 = vpop.f32.mrf.mxu1 }
 0x30a   : > { %v6343_v13 = vpop.f32.mrf.mxu1 }
 0x30b   : > { %v8881_v48 = vadd.f32 %v6343_v13, %v6342_v47 }
 0x34a   : > { %v6377_v63 = vpop.f32.mrf.mxu1 }
 0x34c   : > { %v6378_v25 = vpop.f32.mrf.mxu1 }
 0x34d   : > { %v6379_v20 = vadd.f32 %v6378_v25, %v6377_v63 }
 0x34e   : > { %v6380_v37 = vpop.f32.mrf.mxu1 }
 0x34f   : > { %v1692_v3 = vadd.f32 %v6379_v20, %v6299_v61 }
 0x350   : > { %v6381_v15 = vpop.f32.mrf.mxu1 }
 0x351   : > { %v1770_v56 = vadd.f32 %v1692_v3, %v1336_v7  ;;  %v6382_v57 = vadd.f32 %v6381_v15, %v6380_v37 }
 0x352   : > { %v6383_v26 = vpop.f32.mrf.mxu1 }
 0x353   : > { %1786 = vst [vmem:[#allocation3 + $0x30] sm:$0xff] %v1770_v56  ;;  %v1697_v30 = vadd.f32 %v6382_v57, %v6302_v18 }
 0x354   : > { %v6384_v6 = vpop.f32.mrf.mxu1 }
 0x355   : > { %v1771_v52 = vadd.f32 %v1697_v30, %v1337_v35  ;;  %v6385_v27 = vadd.f32 %v6384_v6, %v6383_v26 }
 0x356   : > { %v6386_v54 = vpop.f32.mrf.mxu1 }
 0x357   : > { %1787 = vst [vmem:[#allocation3] sm:$0xff] %v1771_v52  ;;  %v1702_v5 = vadd.f32 %v6385_v27, %v6305_v50  ;;  %v1341_v50 = vld [vmem:[#allocation3 + $0x68] sm:$0xff] }
 0x358   : > { %v6387_v19 = vpop.f32.mrf.mxu1 }
 0x359   : > { %v1772_v59 = vadd.f32 %v1702_v5, %v1338_v24  ;;  %v6388_v0 = vadd.f32 %v6387_v19, %v6386_v54 }
 0x35a   : > { %v6389_v33 = vpop.f32.mrf.mxu1 }
 0x35b   : > { %1788 = vst [vmem:[#allocation3 + $0x58] sm:$0xff] %v1772_v59  ;;  %v1707_v61 = vadd.f32 %v6388_v0, %v8857_v62  ;;  %v1342_v62 = vld [vmem:[#allocation3 + $0x8] sm:$0xff] }
 0x35c   : > { %v6390_v44 = vpop.f32.mrf.mxu1 }
 0x35d   : > { %v1773_v34 = vadd.f32 %v1707_v61, %v1339_v17  ;;  %v6391_v2 = vadd.f32 %v6390_v44, %v6389_v33 }
 0x35e   : > { %v6392_v18 = vpop.f32.mrf.mxu1 }
 0x35f   : > { %1789 = vst [vmem:[#allocation3 + $0x18] sm:$0xff] %v1773_v34  ;;  %v1712_v9 = vadd.f32 %v6391_v2, %v8859_v49  ;;  %v1343_v49 = vld [vmem:[#allocation3 + $0x48] sm:$0xff] }
 0x360   : > { %v6393_v21 = vpop.f32.mrf.mxu1 }
 0x361   : > { %v1774_v32 = vadd.f32 %v1712_v9, %v1340_v10  ;;  %v6394_v60 = vadd.f32 %v6393_v21, %v6392_v18 }
 0x362   : > { %v6395_v51 = vpop.f32.mrf.mxu1 }
 0x363   : > { %1790 = vst [vmem:[#allocation3 + $0x50] sm:$0xff] %v1774_v32  ;;  %v1717_v45 = vadd.f32 %v6394_v60, %v8861_v36  ;;  %v1344_v36 = vld [vmem:[#allocation3 + $0x40] sm:$0xff] }
 0x364   : > { %v6396_v46 = vpop.f32.mrf.mxu1 }
 0x365   : > { %v1775_v55 = vadd.f32 %v1717_v45, %v1341_v50  ;;  %v6397_v42 = vadd.f32 %v6396_v46, %v6395_v51 }
 0x366   : > { %v6398_v43 = vpop.f32.mrf.mxu1 }
 0x367   : > { %1791 = vst [vmem:[#allocation3 + $0x68] sm:$0xff] %v1775_v55  ;;  %v1722_v53 = vadd.f32 %v6397_v42, %v8863_v12  ;;  %v1345_v12 = vld [vmem:[#allocation3 + $0x20] sm:$0xff] }
 0x368   : > { %v6399_v8 = vpop.f32.mrf.mxu1 }
 0x369   : > { %v1776_v38 = vadd.f32 %v1722_v53, %v1342_v62  ;;  %v6400_v4 = vadd.f32 %v6399_v8, %v6398_v43 }
 0x36a   : > { %v6401_v23 = vpop.f32.mrf.mxu1 }
 0x36b   : > { %1792 = vst [vmem:[#allocation3 + $0x8] sm:$0xff] %v1776_v38  ;;  %v1727_v22 = vadd.f32 %v6400_v4, %v8865_v16  ;;  %v1346_v16 = vld [vmem:[#allocation3 + $0x10] sm:$0xff] }
 0x36c   : > { %v6402_v41 = vpop.f32.mrf.mxu1 }
 0x36d   : > { %v1777_v31 = vadd.f32 %v1727_v22, %v1343_v49  ;;  %v6403_v47 = vadd.f32 %v6402_v41, %v6401_v23 }
 0x36e   : > { %v6404_v13 = vpop.f32.mrf.mxu1 }
 0x36f   : > { %1793 = vst [vmem:[#allocation3 + $0x48] sm:$0xff] %v1777_v31  ;;  %v1732_v63 = vadd.f32 %v6403_v47, %v8867_v40  ;;  %v1347_v40 = vld [vmem:[#allocation3 + $0x38] sm:$0xff] }
 0x370   : > { %v6405_v25 = vpop.f32.mrf.mxu1 }
 0x371   : > { %v1778_v20 = vadd.f32 %v1732_v63, %v1344_v36  ;;  %v6406_v7 = vadd.f32 %v6405_v25, %v6404_v13 }
 0x372   : > { %v6407_v37 = vpop.f32.mrf.mxu1 }
 0x373   : > { %1794 = vst [vmem:[#allocation3 + $0x40] sm:$0xff] %v1778_v20  ;;  %v1737_v3 = vadd.f32 %v6406_v7, %v8869_v28  ;;  %v1348_v28 = vld [vmem:[#allocation3 + $0x60] sm:$0xff] }
 0x374   : > { %v6408_v15 = vpop.f32.mrf.mxu1 }
 0x375   : > { %v1779_v56 = vadd.f32 %v1737_v3, %v1345_v12  ;;  %v6409_v57 = vadd.f32 %v6408_v15, %v6407_v37 }
 0x376   : > { %v6410_v35 = vpop.f32.mrf.mxu1 }
 0x377   : > { %1795 = vst [vmem:[#allocation3 + $0x20] sm:$0xff] %v1779_v56  ;;  %v1742_v26 = vadd.f32 %v6409_v57, %v8871_v1  ;;  %v1349_v1 = vld [vmem:[#allocation3 + $0x70] sm:$0xff] }
 0x378   : > { %v6411_v30 = vpop.f32.mrf.mxu1 }
 0x379   : > { %v1780_v6 = vadd.f32 %v1742_v26, %v1346_v16  ;;  %v6412_v52 = vadd.f32 %v6411_v30, %v6410_v35 }
 0x37a   : > { %v6413_v27 = vpop.f32.mrf.mxu1 }
 0x37b   : > { %1796 = vst [vmem:[#allocation3 + $0x10] sm:$0xff] %v1780_v6  ;;  %v1747_v24 = vadd.f32 %v6412_v52, %v8873_v29  ;;  %v1350_v29 = vld [vmem:[#allocation3 + $0x78] sm:$0xff] }
 0x37c   : > { %v6414_v54 = vpop.f32.mrf.mxu1 }
 0x37d   : > { %v1781_v5 = vadd.f32 %v1747_v24, %v1347_v40  ;;  %v6415_v19 = vadd.f32 %v6414_v54, %v6413_v27 }
 0x37e   : > { %v6416_v59 = vpop.f32.mrf.mxu1 }
 0x37f   : > { %1797 = vst [vmem:[#allocation3 + $0x38] sm:$0xff] %v1781_v5  ;;  %v1752_v0 = vadd.f32 %v6415_v19, %v8875_v11  ;;  %v1351_v11 = vld [vmem:[#allocation3 + $0x28] sm:$0xff] }
 0x380   : > { %v6417_v17 = vpop.f32.mrf.mxu1 }
 0x381   : > { %v1782_v33 = vadd.f32 %v1752_v0, %v1348_v28  ;;  %v6418_v61 = vadd.f32 %v6417_v17, %v6416_v59 }
 0x382   : > { %v6419_v44 = vpop.f32.mrf.mxu1 }
 0x383   : > { %1798 = vst [vmem:[#allocation3 + $0x60] sm:$0xff] %v1782_v33  ;;  %v1757_v34 = vadd.f32 %v6418_v61, %v8877_v14 }
 0x384   : > { %v6420_v2 = vpop.f32.mrf.mxu1 }
 0x385   : > { %v1783_v10 = vadd.f32 %v1757_v34, %v1349_v1  ;;  %v6421_v18 = vadd.f32 %v6420_v2, %v6419_v44 }
 0x386   : > { %v6422_v9 = vpop.f32.mrf.mxu1 }
 0x387   : > { %1799 = vst [vmem:[#allocation3 + $0x70] sm:$0xff] %v1783_v10  ;;  %v1762_v21 = vadd.f32 %v6421_v18, %v8879_v39 }
 0x388   : > { %v6423_v32 = vpop.f32.mrf.mxu1 }
 0x389   : > { %v1784_v60 = vadd.f32 %v1762_v21, %v1350_v29  ;;  %v6424_v50 = vadd.f32 %v6423_v32, %v6422_v9 }
 0x38b   : > { %1800 = vst [vmem:[#allocation3 + $0x78] sm:$0xff] %v1784_v60  ;;  %v1767_v51 = vadd.f32 %v6424_v50, %v8881_v48  ;;  %1805 = sbr.rel (%p6176_p13) target bundleno = 1866 (0x74a), region = 60 }
 0x38d   : > { %v1785_v45 = vadd.f32 %v1767_v51, %v1351_v11 }
 0x38f   : > { %1801 = vst [vmem:[#allocation3 + $0x28] sm:$0xff] %v1785_v45 }
 0x390   : > { %v1806_v14 = vld [vmem:[#allocation3 + $0x30] sm:$0xff]  ;;  %v1808_v46 = vld [vmem:[#allocation3 + $0x58] sm:$0xff]  ;;  %v1807_v55 = vld [vmem:[#allocation3] sm:$0xff] }
 0x391   : > { %v8897_v42 = vmul.f32 0.03125, %v1806_v14  ;;  %v8899_v62 = vmul.f32 0.03125, %v1808_v46  ;;  %v1809_v39 = vld [vmem:[#allocation3 + $0x18] sm:$0xff]  ;;  %v8903_v43 = vmul.f32 0.03125, %v1807_v55  ;;  %v1810_v53 = vld [vmem:[#allocation3 + $0x50] sm:$0xff]  ;;  %v1811_v8 = vld [vmem:[#allocation3 + $0x68] sm:$0xff] }
 0x392   : > { %v8905_v48 = vmul.f32 0.03125, %v1809_v39  ;;  %v8909_v38 = vmul.f32 0.03125, %v1810_v53  ;;  %v8911_v4 = vmul.f32 0.03125, %v1811_v8  ;;  %v1812_v49 = vld [vmem:[#allocation3 + $0x8] sm:$0xff]  ;;  %v1814_v31 = vld [vmem:[#allocation3 + $0x40] sm:$0xff]  ;;  %v1816_v63 = vld [vmem:[#allocation3 + $0x10] sm:$0xff] }
 0x393   : > { %1838 = vmax.xlane.f32.xlu0 %v8897_v42  ;;  %1842 = vmax.xlane.f32.xlu1 %v8899_v62  ;;  %v1813_v23 = vld [vmem:[#allocation3 + $0x48] sm:$0xff]  ;;  %v8915_v22 = vmul.f32 0.03125, %v1812_v49  ;;  %v1815_v47 = vld [vmem:[#allocation3 + $0x20] sm:$0xff]  ;;  %v8921_v36 = vmul.f32 0.03125, %v1814_v31  ;;  %v1817_v25 = vld [vmem:[#allocation3 + $0x38] sm:$0xff]  ;;  %v8927_v20 = vmul.f32 0.03125, %v1816_v63 }
 0x394   : > { %v8917_v41 = vmul.f32 0.03125, %v1813_v23  ;;  %v8923_v13 = vmul.f32 0.03125, %v1815_v47  ;;  %v8929_v7 = vmul.f32 0.03125, %v1817_v25  ;;  %v1818_v12 = vld [vmem:[#allocation3 + $0x60] sm:$0xff]  ;;  %v1819_v37 = vld [vmem:[#allocation3 + $0x70] sm:$0xff]  ;;  %v1820_v56 = vld [vmem:[#allocation3 + $0x78] sm:$0xff] }
 0x395   : > { %v8933_v3 = vmul.f32 0.03125, %v1818_v12  ;;  %v8935_v15 = vmul.f32 0.03125, %v1819_v37  ;;  %v8939_v16 = vmul.f32 0.03125, %v1820_v56  ;;  %v2029_v26 = vld [vmem:[#allocation2 + $0xf8] sm:$0xff]  ;;  %v2028_v40 = vld [vmem:[#allocation2 + $0xf0] sm:$0xff]  ;;  %v2027_v5 = vld [vmem:[#allocation2 + $0xe8] sm:$0xff] }
 0x396   : > { %v1821_v57 = vld [vmem:[#allocation3 + $0x28] sm:$0xff]  ;;  %v2061_v30 = vld [vmem:[#allocation2 + $0x1f8] sm:$0xff]  ;;  %6425 = vmatprep.subr.mxu0 %v2029_v26  ;;  %v2060_v27 = vld [vmem:[#allocation2 + $0x1f0] sm:$0xff] }
 0x397   : > { %1840 = vmax.xlane.f32.xlu0 %v8903_v43  ;;  %1844 = vmax.xlane.f32.xlu1 %v8905_v48  ;;  %v8941_v35 = vmul.f32 0.03125, %v1821_v57  ;;  %v2013_v6 = vld [vmem:[#allocation2 + $0x78] sm:$0xff]  ;;  %v2012_v24 = vld [vmem:[#allocation2 + $0x70] sm:$0xff]  ;;  %v2059_v19 = vld [vmem:[#allocation2 + $0x1e8] sm:$0xff] }
 0x398   : > { %6489 = vmatprep.subr.mxu1 %v2061_v30  ;;  %v2045_v52 = vld [vmem:[#allocation2 + $0x178] sm:$0xff]  ;;  %6426 = vmatpush3.xpose.msra.mxu0 %v2013_v6  ;;  %v2044_v54 = vld [vmem:[#allocation2 + $0x170] sm:$0xff]  ;;  %v2011_v28 = vld [vmem:[#allocation2 + $0x68] sm:$0xff] }
 0x399   : > { %6490 = vmatpush3.xpose.msra.mxu1 %v2045_v52  ;;  %6427 = vmatprep.subr.mxu0 %v2028_v40  ;;  %v2043_v59 = vld [vmem:[#allocation2 + $0x168] sm:$0xff]  ;;  %v2026_v0 = vld [vmem:[#allocation2 + $0xe0] sm:$0xff]  ;;  %v2025_v1 = vld [vmem:[#allocation2 + $0xd8] sm:$0xff] }
 0x39a   : > { %6491 = vmatprep.subr.mxu1 %v2060_v27  ;;  %v2058_v17 = vld [vmem:[#allocation2 + $0x1e0] sm:$0xff]  ;;  %v2057_v44 = vld [vmem:[#allocation2 + $0x1d8] sm:$0xff]  ;;  %v2024_v10 = vld [vmem:[#allocation2 + $0xd0] sm:$0xff] }
 0x39b   : > { %1846 = vmax.xlane.f32.xlu0 %v8909_v38  ;;  %1848 = vmax.xlane.f32.xlu1 %v8911_v4  ;;  %v2010_v33 = vld [vmem:[#allocation2 + $0x60] sm:$0xff]  ;;  %v2009_v34 = vld [vmem:[#allocation2 + $0x58] sm:$0xff]  ;;  %v2056_v18 = vld [vmem:[#allocation2 + $0x1d0] sm:$0xff] }
 0x39c   : > { %6428 = vmatpush3.xpose.msra.mxu0 %v2012_v24  ;;  %v2042_v61 = vld [vmem:[#allocation2 + $0x160] sm:$0xff]  ;;  %v2041_v2 = vld [vmem:[#allocation2 + $0x158] sm:$0xff]  ;;  %v2008_v29 = vld [vmem:[#allocation2 + $0x50] sm:$0xff] }
 0x39d   : > { %6492 = vmatpush3.xpose.msra.mxu1 %v2044_v54  ;;  %6429 = vmatprep.subr.mxu0 %v2027_v5  ;;  %v2040_v9 = vld [vmem:[#allocation2 + $0x150] sm:$0xff]  ;;  %v2023_v21 = vld [vmem:[#allocation2 + $0xc8] sm:$0xff]  ;;  %v2022_v11 = vld [vmem:[#allocation2 + $0xc0] sm:$0xff] }
 0x39e   : > { %6493 = vmatprep.subr.mxu1 %v2059_v19  ;;  %v2055_v32 = vld [vmem:[#allocation2 + $0x1c8] sm:$0xff]  ;;  %v2054_v51 = vld [vmem:[#allocation2 + $0x1c0] sm:$0xff]  ;;  %v2021_v46 = vld [vmem:[#allocation2 + $0xb8] sm:$0xff] }
 0x39f   : > { %1850 = vmax.xlane.f32.xlu0 %v8915_v22  ;;  %1852 = vmax.xlane.f32.xlu1 %v8917_v41  ;;  %v2007_v60 = vld [vmem:[#allocation2 + $0x48] sm:$0xff]  ;;  %v2006_v45 = vld [vmem:[#allocation2 + $0x40] sm:$0xff]  ;;  %v2053_v55 = vld [vmem:[#allocation2 + $0x1b8] sm:$0xff] }
 0x3a0   : > { %6430 = vmatpush3.xpose.msra.mxu0 %v2011_v28  ;;  %v2039_v50 = vld [vmem:[#allocation2 + $0x148] sm:$0xff]  ;;  %v2038_v14 = vld [vmem:[#allocation2 + $0x140] sm:$0xff]  ;;  %v2005_v39 = vld [vmem:[#allocation2 + $0x38] sm:$0xff] }
 0x3a1   : > { %6494 = vmatpush3.xpose.msra.mxu1 %v2043_v59  ;;  %6431 = vmatprep.subr.mxu0 %v2026_v0  ;;  %v2037_v53 = vld [vmem:[#allocation2 + $0x138] sm:$0xff]  ;;  %v2020_v8 = vld [vmem:[#allocation2 + $0xb0] sm:$0xff]  ;;  %v2019_v47 = vld [vmem:[#allocation2 + $0xa8] sm:$0xff] }
 0x3a2   : > { %6495 = vmatprep.subr.mxu1 %v2058_v17  ;;  %v2052_v49 = vld [vmem:[#allocation2 + $0x1b0] sm:$0xff]  ;;  %v2051_v63 = vld [vmem:[#allocation2 + $0x1a8] sm:$0xff]  ;;  %v2018_v37 = vld [vmem:[#allocation2 + $0xa0] sm:$0xff] }
 0x3a3   : > { %1854 = vmax.xlane.f32.xlu0 %v8921_v36  ;;  %1856 = vmax.xlane.f32.xlu1 %v8923_v13  ;;  %v2004_v23 = vld [vmem:[#allocation2 + $0x30] sm:$0xff]  ;;  %v2003_v25 = vld [vmem:[#allocation2 + $0x28] sm:$0xff]  ;;  %v2050_v56 = vld [vmem:[#allocation2 + $0x1a0] sm:$0xff] }
 0x3a4   : > { %6432 = vmatpush3.xpose.msra.mxu0 %v2010_v33  ;;  %v2036_v31 = vld [vmem:[#allocation2 + $0x130] sm:$0xff]  ;;  %v2035_v12 = vld [vmem:[#allocation2 + $0x128] sm:$0xff]  ;;  %v2002_v57 = vld [vmem:[#allocation2 + $0x20] sm:$0xff] }
 0x3a5   : > { %6496 = vmatpush3.xpose.msra.mxu1 %v2042_v61  ;;  %6433 = vmatprep.subr.mxu0 %v2025_v1  ;;  %v2034_v26 = vld [vmem:[#allocation2 + $0x120] sm:$0xff] }
 0x3a6   : > { %6497 = vmatprep.subr.mxu1 %v2057_v44 }
 0x3a7   : > { %1858 = vmax.xlane.f32.xlu0 %v8927_v20  ;;  %1860 = vmax.xlane.f32.xlu1 %v8929_v7 }
 0x3a8   : > { %6434 = vmatpush3.xpose.msra.mxu0 %v2009_v34 }
 0x3a9   : > { %6498 = vmatpush3.xpose.msra.mxu1 %v2041_v2  ;;  %6435 = vmatprep.subr.mxu0 %v2024_v10 }
 0x3aa   : > { %6499 = vmatprep.subr.mxu1 %v2056_v18 }
 0x3ab   : > { %1862 = vmax.xlane.f32.xlu0 %v8933_v3  ;;  %1864 = vmax.xlane.f32.xlu1 %v8935_v15 }
 0x3ac   : > { %6436 = vmatpush3.xpose.msra.mxu0 %v2008_v29 }
 0x3ad   : > { %6500 = vmatpush3.xpose.msra.mxu1 %v2040_v9  ;;  %6437 = vmatprep.subr.mxu0 %v2023_v21 }
 0x3ae   : > { %6501 = vmatprep.subr.mxu1 %v2055_v32 }
 0x3af   : > { %1866 = vmax.xlane.f32.xlu0 %v8939_v16  ;;  %1868 = vmax.xlane.f32.xlu1 %v8941_v35 }
 0x3b0   : > { %6438 = vmatpush3.xpose.msra.mxu0 %v2007_v60 }
 0x3b1   : > { %6502 = vmatpush3.xpose.msra.mxu1 %v2039_v50  ;;  %6439 = vmatprep.subr.mxu0 %v2022_v11 }
 0x3b2   : > { %6503 = vmatprep.subr.mxu1 %v2054_v51 }
 0x3b4   : > { %6440 = vmatpush3.xpose.msra.mxu0 %v2006_v45 }
 0x3b5   : > { %6504 = vmatpush3.xpose.msra.mxu1 %v2038_v14  ;;  %6441 = vmatprep.subr.mxu0 %v2021_v46 }
 0x3b6   : > { %6505 = vmatprep.subr.mxu1 %v2053_v55 }
 0x3b8   : > { %6442 = vmatpush3.xpose.msra.mxu0 %v2005_v39 }
 0x3b9   : > { %6506 = vmatpush3.xpose.msra.mxu1 %v2037_v53  ;;  %6443 = vmatprep.subr.mxu0 %v2020_v8 }
 0x3ba   : > { %6507 = vmatprep.subr.mxu1 %v2052_v49 }
 0x3bc   : > { %6444 = vmatpush3.xpose.msra.mxu0 %v2004_v23 }
 0x3bd   : > { %6508 = vmatpush3.xpose.msra.mxu1 %v2036_v31  ;;  %6445 = vmatprep.subr.mxu0 %v2019_v47  ;;  %v2017_v47 = vld [vmem:[#allocation2 + $0x98] sm:$0xff] }
 0x3be   : > { %6509 = vmatprep.subr.mxu1 %v2051_v63 }
 0x3c0   : > { %6446 = vmatpush3.xpose.msra.mxu0 %v2003_v25  ;;  %v2001_v25 = vld [vmem:[#allocation2 + $0x18] sm:$0xff] }
 0x3c1   : > { %6510 = vmatpush3.xpose.msra.mxu1 %v2035_v12  ;;  %6447 = vmatprep.subr.mxu0 %v2018_v37  ;;  %v2033_v12 = vld [vmem:[#allocation2 + $0x118] sm:$0xff] }
 0x3c2   : > { %6511 = vmatprep.subr.mxu1 %v2050_v56 }
 0x3c4   : > { %6448 = vmatpush3.xpose.msra.mxu0 %v2002_v57 }
 0x3c5   : > { %6512 = vmatpush3.xpose.msra.mxu1 %v2034_v26  ;;  %6449 = vmatprep.subr.mxu0 %v2017_v47  ;;  %v2048_v26 = vld [vmem:[#allocation2 + $0x190] sm:$0xff] }
 0x3c8   : > { %6450 = vmatpush3.xpose.msra.mxu0 %v2001_v25  ;;  %v2107_v25 = vld [vmem:[#allocation2 + $0x368] sm:$0xff] }
 0x41c   : > { %v1839_v30 = vpop.xlane.xlu0 %1838  ;;  %v1843_v6 = vpop.xlane.xlu1 %1842 }
 0x41d   : > { %v1870_v52 = vsub.f32 %v8897_v42, %v1839_v30  ;;  %v1872_v40 = vsub.f32 %v8899_v62, %v1843_v6  ;;  %v2000_v30 = vld [vmem:[#allocation2 + $0x10] sm:$0xff] }
 0x41e   : > { %v2032_v6 = vld [vmem:[#allocation2 + $0x110] sm:$0xff] }
 0x41f   : > { %v1886_v27 = vmul.f32 1.442695, %v1870_v52  ;;  %v1890_v24 = vmul.f32 1.442695, %v1872_v40 }
 0x420   : > { %v1841_v54 = vpop.xlane.xlu0 %1840  ;;  %v1845_v5 = vpop.xlane.xlu1 %1844 }
 0x421   : > { %7516 = vpow2.f32 %v1886_v27  ;;  %v1871_v19 = vsub.f32 %v8903_v43, %v1841_v54  ;;  %v1873_v28 = vsub.f32 %v8905_v48, %v1845_v5  ;;  %v2015_v27 = vld [vmem:[#allocation2 + $0x88] sm:$0xff] }
 0x422   : > { %7518 = vpow2.f32 %v1890_v24  ;;  %v2047_v24 = vld [vmem:[#allocation2 + $0x188] sm:$0xff] }
 0x423   : > { %v1888_v59 = vmul.f32 1.442695, %v1871_v19  ;;  %v1892_v0 = vmul.f32 1.442695, %v1873_v28  ;;  %v1999_v54 = vld [vmem:[#allocation2 + $0x8] sm:$0xff] }
 0x424   : > { %v1847_v17 = vpop.xlane.xlu0 %1846  ;;  %v1849_v33 = vpop.xlane.xlu1 %1848  ;;  %v2031_v5 = vld [vmem:[#allocation2 + $0x108] sm:$0xff] }
 0x425   : > { %7520 = vpow2.f32 %v1888_v59  ;;  %v1874_v61 = vsub.f32 %v8909_v38, %v1847_v17  ;;  %v1875_v42 = vsub.f32 %v8911_v4, %v1849_v33  ;;  %v2014_v59 = vld [vmem:[#allocation2 + $0x80] sm:$0xff] }
 0x426   : > { %7522 = vpow2.f32 %v1892_v0  ;;  %v2046_v0 = vld [vmem:[#allocation2 + $0x180] sm:$0xff] }
 0x427   : > { %v1894_v62 = vmul.f32 1.442695, %v1874_v61  ;;  %v1896_v1 = vmul.f32 1.442695, %v1875_v42  ;;  %v1998_v17 = vld [vmem:[#allocation2] sm:$0xff] }
 0x428   : > { %v1851_v44 = vpop.xlane.xlu0 %1850  ;;  %v1853_v34 = vpop.xlane.xlu1 %1852  ;;  %v2030_v33 = vld [vmem:[#allocation2 + $0x100] sm:$0xff] }
 0x429   : > { %7524 = vpow2.f32 %v1894_v62  ;;  %v1876_v43 = vsub.f32 %v8915_v22, %v1851_v44  ;;  %v1877_v48 = vsub.f32 %v8917_v41, %v1853_v34  ;;  %v2093_v62 = vld [vmem:[#allocation2 + $0x2f8] sm:$0xff] }
 0x42a   : > { %7526 = vpow2.f32 %v1896_v1  ;;  %v2125_v1 = vld [vmem:[#allocation2 + $0x3f8] sm:$0xff] }
 0x42b   : > { %v1898_v2 = vmul.f32 1.442695, %v1876_v43  ;;  %v1900_v10 = vmul.f32 1.442695, %v1877_v48 }
 0x42c   : > { %v1855_v18 = vpop.xlane.xlu0 %1854  ;;  %v1857_v29 = vpop.xlane.xlu1 %1856 }
 0x42d   : > { %7528 = vpow2.f32 %v1898_v2  ;;  %v1878_v38 = vsub.f32 %v8921_v36, %v1855_v18  ;;  %v1879_v4 = vsub.f32 %v8923_v13, %v1857_v29 }
 0x42e   : > { %v8955_v9 = vpop.eup %7516  ;;  %7530 = vpow2.f32 %v1900_v10 }
 0x42f   : > { %v1902_v21 = vmul.f32 1.442695, %v1878_v38  ;;  %1918 = vadd.xlane.f32.xlu0 %v8955_v9  ;;  %v1904_v32 = vmul.f32 1.442695, %v1879_v4  ;;  %v8958_v22 = vpop.eup %7518 }
 0x430   : > { %v1859_v41 = vpop.xlane.xlu0 %1858  ;;  %v1861_v60 = vpop.xlane.xlu1 %1860 }
 0x431   : > { %7532 = vpow2.f32 %v1902_v21  ;;  %v1880_v50 = vsub.f32 %v8927_v20, %v1859_v41  ;;  %v1881_v11 = vsub.f32 %v8929_v7, %v1861_v60  ;;  %v2077_v41 = vld [vmem:[#allocation2 + $0x278] sm:$0xff] }
 0x432   : > { %v8962_v51 = vpop.eup %7520  ;;  %7534 = vpow2.f32 %v1904_v32  ;;  %v2109_v60 = vld [vmem:[#allocation2 + $0x378] sm:$0xff] }
 0x433   : > { %v1906_v36 = vmul.f32 1.442695, %v1880_v50  ;;  %1922 = vadd.xlane.f32.xlu0 %v8958_v22  ;;  %1920 = vadd.xlane.f32.xlu1 %v8962_v51  ;;  %v1908_v13 = vmul.f32 1.442695, %v1881_v11  ;;  %v8966_v45 = vpop.eup %7522  ;;  %v2092_v50 = vld [vmem:[#allocation2 + $0x2f0] sm:$0xff] }
 0x434   : > { %v1863_v14 = vpop.xlane.xlu0 %1862  ;;  %v1865_v46 = vpop.xlane.xlu1 %1864  ;;  %v2124_v11 = vld [vmem:[#allocation2 + $0x3f0] sm:$0xff] }
 0x435   : > { %7536 = vpow2.f32 %v1906_v36  ;;  %v1882_v55 = vsub.f32 %v8933_v3, %v1863_v14  ;;  %v1883_v20 = vsub.f32 %v8935_v15, %v1865_v46  ;;  %v2049_v15 = vld [vmem:[#allocation2 + $0x198] sm:$0xff] }
 0x436   : > { %v8970_v39 = vpop.eup %7524  ;;  %7538 = vpow2.f32 %v1908_v13  ;;  %6513 = vmatprep.subr.mxu1 %v2049_v15  ;;  %v2075_v15 = vld [vmem:[#allocation2 + $0x268] sm:$0xff] }
 0x437   : > { %v1910_v7 = vmul.f32 1.442695, %v1882_v55  ;;  %1924 = vadd.xlane.f32.xlu1 %v8966_v45  ;;  %1926 = vadd.xlane.f32.xlu0 %v8970_v39  ;;  %v1912_v53 = vmul.f32 1.442695, %v1883_v20  ;;  %v8974_v8 = vpop.eup %7526  ;;  %v2076_v20 = vld [vmem:[#allocation2 + $0x270] sm:$0xff] }
 0x438   : > { %v1867_v49 = vpop.xlane.xlu0 %1866  ;;  %v1869_v23 = vpop.xlane.xlu1 %1868  ;;  %6514 = vmatpush3.xpose.msra.mxu1 %v2033_v12  ;;  %v2122_v12 = vld [vmem:[#allocation2 + $0x3e0] sm:$0xff] }
 0x439   : > { %7540 = vpow2.f32 %v1910_v7  ;;  %v1884_v31 = vsub.f32 %v8939_v16, %v1867_v49  ;;  %v1885_v3 = vsub.f32 %v8941_v35, %v1869_v23  ;;  %v2016_v35 = vld [vmem:[#allocation2 + $0x90] sm:$0xff]  ;;  %6515 = vmatprep.subr.mxu1 %v2048_v26 }
 0x43a   : > { %v8978_v63 = vpop.eup %7528  ;;  %7542 = vpow2.f32 %v1912_v53  ;;  %6451 = vmatprep.subr.mxu0 %v2016_v35  ;;  %v2108_v7 = vld [vmem:[#allocation2 + $0x370] sm:$0xff]  ;;  %v2123_v53 = vld [vmem:[#allocation2 + $0x3e8] sm:$0xff] }
 0x43b   : > { %v1914_v37 = vmul.f32 1.442695, %v1884_v31  ;;  %1928 = vadd.xlane.f32.xlu1 %v8974_v8  ;;  %1930 = vadd.xlane.f32.xlu0 %v8978_v63  ;;  %v1916_v56 = vmul.f32 1.442695, %v1885_v3  ;;  %v8982_v57 = vpop.eup %7530 }
 0x43c   : > { %6452 = vmatpush3.xpose.msra.mxu0 %v2000_v30  ;;  %6516 = vmatpush3.xpose.msra.mxu1 %v2032_v6  ;;  %v2074_v6 = vld [vmem:[#allocation2 + $0x260] sm:$0xff] }
 0x43d   : > { %7544 = vpow2.f32 %v1914_v37  ;;  %6453 = vmatprep.subr.mxu0 %v2015_v27  ;;  %6517 = vmatprep.subr.mxu1 %v2047_v24  ;;  %v2106_v27 = vld [vmem:[#allocation2 + $0x360] sm:$0xff]  ;;  %v2121_v24 = vld [vmem:[#allocation2 + $0x3d8] sm:$0xff] }
 0x43e   : > { %v8984_v16 = vpop.eup %7532  ;;  %7546 = vpow2.f32 %v1916_v56 }
 0x43f   : > { %1932 = vadd.xlane.f32.xlu1 %v8982_v57  ;;  %1934 = vadd.xlane.f32.xlu0 %v8984_v16  ;;  %v8988_v52 = vpop.eup %7534 }
 0x440   : > { %6454 = vmatpush3.xpose.msra.mxu0 %v1999_v54  ;;  %6518 = vmatpush3.xpose.msra.mxu1 %v2031_v5 }
 0x441   : > { %6455 = vmatprep.subr.mxu0 %v2014_v59  ;;  %6519 = vmatprep.subr.mxu1 %v2046_v0 }
 0x442   : > { %v8990_v40 = vpop.eup %7536 }
 0x443   : > { %1936 = vadd.xlane.f32.xlu1 %v8988_v52  ;;  %1938 = vadd.xlane.f32.xlu0 %v8990_v40  ;;  %v8994_v19 = vpop.eup %7538 }
 0x444   : > { %6456 = vmatpush3.xpose.msra.mxu0 %v1998_v17  ;;  %6520 = vmatpush3.xpose.msra.mxu1 %v2030_v33  ;;  %v2073_v17 = vld [vmem:[#allocation2 + $0x258] sm:$0xff] }
 0x445   : > { %6553 = vmatprep.subr.mxu0 %v2093_v62  ;;  %6617 = vmatprep.subr.mxu1 %v2125_v1  ;;  %v2105_v33 = vld [vmem:[#allocation2 + $0x358] sm:$0xff] }
 0x446   : > { %v8996_v28 = vpop.eup %7540 }
 0x447   : > { %1940 = vadd.xlane.f32.xlu1 %v8994_v19  ;;  %1942 = vadd.xlane.f32.xlu0 %v8996_v28  ;;  %v9000_v61 = vpop.eup %7542 }
 0x44a   : > { %v9002_v42 = vpop.eup %7544 }
 0x44b   : > { %1944 = vadd.xlane.f32.xlu1 %v9000_v61  ;;  %1946 = vadd.xlane.f32.xlu0 %v9002_v42  ;;  %v9006_v44 = vpop.eup %7546 }
 0x44f   : > { %1948 = vadd.xlane.f32.xlu1 %v9006_v44 }
 0x4b8   : > { %v1919_v34 = vpop.xlane.xlu0 %1918 }
 0x4b9   : > { %7548 = vrcp.f32 %v1919_v34 }
 0x4bc   : > { %v1921_v43 = vpop.xlane.xlu1 %1920  ;;  %v1923_v48 = vpop.xlane.xlu0 %1922 }
 0x4bd   : > { %7550 = vrcp.f32 %v1921_v43 }
 0x4be   : > { %7552 = vrcp.f32 %v1923_v48  ;;  %v2072_v48 = vld [vmem:[#allocation2 + $0x250] sm:$0xff] }
 0x4c0   : > { %v1925_v2 = vpop.xlane.xlu1 %1924  ;;  %v1927_v10 = vpop.xlane.xlu0 %1926 }
 0x4c1   : > { %7554 = vrcp.f32 %v1925_v2  ;;  %v2104_v2 = vld [vmem:[#allocation2 + $0x350] sm:$0xff] }
 0x4c2   : > { %7556 = vrcp.f32 %v1927_v10 }
 0x4c4   : > { %v1929_v18 = vpop.xlane.xlu1 %1928  ;;  %v1931_v29 = vpop.xlane.xlu0 %1930 }
 0x4c5   : > { %7558 = vrcp.f32 %v1929_v18 }
 0x4c6   : > { %v7549_v38 = vpop.eup %7548  ;;  %7560 = vrcp.f32 %v1931_v29 }
 0x4c7   : > { %v9010_v4 = vmul.f32 %v7549_v38, %v8955_v9 }
 0x4c8   : > { %v1933_v21 = vpop.xlane.xlu1 %1932  ;;  %v1935_v32 = vpop.xlane.xlu0 %1934 }
 0x4c9   : > { %1982 = vst [vmem:[#allocation11] sm:$0xff] %v9010_v4  ;;  %7562 = vrcp.f32 %v1933_v21  ;;  %6457 = vmatprep.mubr.f32.mxu0 %v9010_v4  ;;  %6521 = vmatprep.mubr.f32.mxu1 %v9010_v4  ;;  %v2071_v21 = vld [vmem:[#allocation2 + $0x248] sm:$0xff] }
 0x4ca   : > { %v7551_v36 = vpop.eup %7550  ;;  %7564 = vrcp.f32 %v1935_v32  ;;  %6458 = vmatmul.mubr.f32.vlgmr.msra.gmra.mxu0 %v9010_v4  ;;  %6522 = vmatmul.mubr.f32.vlgmr.msra.gmra.mxu1 %v9010_v4  ;;  %v2103_v32 = vld [vmem:[#allocation2 + $0x348] sm:$0xff] }
 0x4cb   : > { %v7553_v9 = vpop.eup %7552  ;;  %v9018_v13 = vmul.f32 %v7551_v36, %v8962_v51  ;;  %6554 = vmatpush3.xpose.msra.mxu0 %v2077_v41  ;;  %6618 = vmatpush3.xpose.msra.mxu1 %v2109_v60  ;;  %v2070_v36 = vld [vmem:[#allocation2 + $0x240] sm:$0xff] }
 0x4cc   : > { %v9021_v14 = vmul.f32 %v7553_v9, %v8958_v22  ;;  %v1937_v46 = vpop.xlane.xlu1 %1936  ;;  %v1939_v55 = vpop.xlane.xlu0 %1938  ;;  %6555 = vmatprep.subr.mxu0 %v2092_v50  ;;  %6619 = vmatprep.subr.mxu1 %v2124_v11  ;;  %v2091_v22 = vld [vmem:[#allocation2 + $0x2e8] sm:$0xff]  ;;  %v2102_v9 = vld [vmem:[#allocation2 + $0x340] sm:$0xff] }
 0x4cd   : > { %1983 = vst [vmem:[#allocation11 + $0x8] sm:$0xff] %v9018_v13  ;;  %7566 = vrcp.f32 %v1937_v46  ;;  %6459 = vmatprep.mubr.f32.mxu0 %v9018_v13  ;;  %6523 = vmatprep.mubr.f32.mxu1 %v9018_v13 }
 0x4ce   : > { %v7555_v51 = vpop.eup %7554  ;;  %1984 = vst [vmem:[#allocation11 + $0x10] sm:$0xff] %v9021_v14  ;;  %7568 = vrcp.f32 %v1939_v55  ;;  %6460 = vmatmul.mubr.f32.gmra.mxu0 %v9018_v13  ;;  %6524 = vmatmul.mubr.f32.gmra.mxu1 %v9018_v13 }
 0x4cf   : > { %v7557_v49 = vpop.eup %7556  ;;  %v9030_v23 = vmul.f32 %v7555_v51, %v8966_v45  ;;  %6556 = vmatpush3.xpose.msra.mxu0 %v2076_v20  ;;  %6620 = vmatpush3.xpose.msra.mxu1 %v2108_v7  ;;  %v2069_v20 = vld [vmem:[#allocation2 + $0x238] sm:$0xff]  ;;  %v2084_v51 = vld [vmem:[#allocation2 + $0x2b0] sm:$0xff] }
 0x4d0   : > { %v9033_v31 = vmul.f32 %v7557_v49, %v8970_v39  ;;  %6461 = vmatprep.mubr.f32.mxu0 %v9021_v14  ;;  %6525 = vmatprep.mubr.f32.mxu1 %v9021_v14  ;;  %v1941_v3 = vpop.xlane.xlu1 %1940  ;;  %v1943_v47 = vpop.xlane.xlu0 %1942  ;;  %v2090_v39 = vld [vmem:[#allocation2 + $0x2e0] sm:$0xff]  ;;  %v2101_v7 = vld [vmem:[#allocation2 + $0x338] sm:$0xff]  ;;  %v2083_v49 = vld [vmem:[#allocation2 + $0x2a8] sm:$0xff] }
 0x4d1   : > { %1985 = vst [vmem:[#allocation11 + $0x18] sm:$0xff] %v9030_v23  ;;  %7570 = vrcp.f32 %v1941_v3  ;;  %6557 = vmatprep.subr.mxu0 %v2091_v22  ;;  %6621 = vmatprep.subr.mxu1 %v2123_v53  ;;  %v2116_v22 = vld [vmem:[#allocation2 + $0x3b0] sm:$0xff]  ;;  %v2115_v3 = vld [vmem:[#allocation2 + $0x3a8] sm:$0xff] }
 0x4d2   : > { %v7559_v45 = vpop.eup %7558  ;;  %1986 = vst [vmem:[#allocation11 + $0x20] sm:$0xff] %v9033_v31  ;;  %7572 = vrcp.f32 %v1943_v47  ;;  %6462 = vmatmul.mubr.f32.gmra.mxu0 %v9021_v14  ;;  %6526 = vmatmul.mubr.f32.gmra.mxu1 %v9021_v14  ;;  %v2100_v53 = vld [vmem:[#allocation2 + $0x330] sm:$0xff]  ;;  %v2067_v47 = vld [vmem:[#allocation2 + $0x228] sm:$0xff] }
 0x4d3   : > { %v7561_v37 = vpop.eup %7560  ;;  %v9042_v56 = vmul.f32 %v7559_v45, %v8974_v8  ;;  %6558 = vmatpush3.xpose.msra.mxu0 %v2075_v15  ;;  %6622 = vmatpush3.xpose.msra.mxu1 %v2107_v25  ;;  %v2099_v15 = vld [vmem:[#allocation2 + $0x328] sm:$0xff]  ;;  %v2082_v25 = vld [vmem:[#allocation2 + $0x2a0] sm:$0xff] }
 0x4d4   : > { %v9045_v35 = vmul.f32 %v7561_v37, %v8978_v63  ;;  %6463 = vmatprep.mubr.f32.mxu0 %v9030_v23  ;;  %6527 = vmatprep.mubr.f32.mxu1 %v9030_v23  ;;  %v1945_v26 = vpop.xlane.xlu1 %1944  ;;  %v1947_v30 = vpop.xlane.xlu0 %1946  ;;  %v2089_v63 = vld [vmem:[#allocation2 + $0x2d8] sm:$0xff]  ;;  %v2114_v45 = vld [vmem:[#allocation2 + $0x3a0] sm:$0xff] }
 0x4d5   : > { %1987 = vst [vmem:[#allocation11 + $0x28] sm:$0xff] %v9042_v56  ;;  %7574 = vrcp.f32 %v1945_v26  ;;  %6559 = vmatprep.subr.mxu0 %v2090_v39  ;;  %6623 = vmatprep.subr.mxu1 %v2122_v12  ;;  %v2066_v39 = vld [vmem:[#allocation2 + $0x220] sm:$0xff]  ;;  %v2081_v37 = vld [vmem:[#allocation2 + $0x298] sm:$0xff] }
 0x4d6   : > { %v7563_v8 = vpop.eup %7562  ;;  %1988 = vst [vmem:[#allocation11 + $0x30] sm:$0xff] %v9045_v35  ;;  %7576 = vrcp.f32 %v1947_v30  ;;  %6464 = vmatmul.mubr.f32.gmra.mxu0 %v9030_v23  ;;  %6528 = vmatmul.mubr.f32.gmra.mxu1 %v9030_v23  ;;  %v2098_v12 = vld [vmem:[#allocation2 + $0x320] sm:$0xff]  ;;  %v2113_v26 = vld [vmem:[#allocation2 + $0x398] sm:$0xff] }
 0x4d7   : > { %v7565_v54 = vpop.eup %7564  ;;  %v9054_v5 = vmul.f32 %v7563_v8, %v8982_v57  ;;  %6560 = vmatpush3.xpose.msra.mxu0 %v2074_v6  ;;  %6624 = vmatpush3.xpose.msra.mxu1 %v2106_v27  ;;  %v2088_v57 = vld [vmem:[#allocation2 + $0x2d0] sm:$0xff]  ;;  %v2065_v30 = vld [vmem:[#allocation2 + $0x218] sm:$0xff] }
 0x4d8   : > { %v9057_v59 = vmul.f32 %v7565_v54, %v8984_v16  ;;  %6465 = vmatprep.mubr.f32.mxu0 %v9033_v31  ;;  %6529 = vmatprep.mubr.f32.mxu1 %v9033_v31  ;;  %v1949_v0 = vpop.xlane.xlu1 %1948  ;;  %v2120_v16 = vld [vmem:[#allocation2 + $0x3d0] sm:$0xff]  ;;  %v2097_v6 = vld [vmem:[#allocation2 + $0x318] sm:$0xff]  ;;  %v2079_v54 = vld [vmem:[#allocation2 + $0x288] sm:$0xff] }
 0x4d9   : > { %1989 = vst [vmem:[#allocation11 + $0x38] sm:$0xff] %v9054_v5  ;;  %7578 = vrcp.f32 %v1949_v0  ;;  %6561 = vmatprep.subr.mxu0 %v2089_v63  ;;  %6625 = vmatprep.subr.mxu1 %v2121_v24  ;;  %v2080_v27 = vld [vmem:[#allocation2 + $0x290] sm:$0xff]  ;;  %v2111_v0 = vld [vmem:[#allocation2 + $0x388] sm:$0xff] }
 0x4da   : > { %v7567_v62 = vpop.eup %7566  ;;  %1990 = vst [vmem:[#allocation11 + $0x40] sm:$0xff] %v9057_v59  ;;  %6466 = vmatmul.mubr.f32.gmra.mxu0 %v9033_v31  ;;  %6530 = vmatmul.mubr.f32.gmra.mxu1 %v9033_v31  ;;  %v2112_v8 = vld [vmem:[#allocation2 + $0x390] sm:$0xff] }
 0x4db   : > { %v7569_v1 = vpop.eup %7568  ;;  %v9066_v34 = vmul.f32 %v7567_v62, %v8988_v52  ;;  %6562 = vmatpush3.xpose.msra.mxu0 %v2073_v17  ;;  %6626 = vmatpush3.xpose.msra.mxu1 %v2105_v33  ;;  %v2087_v52 = vld [vmem:[#allocation2 + $0x2c8] sm:$0xff]  ;;  %v2064_v63 = vld [vmem:[#allocation2 + $0x210] sm:$0xff]  ;;  %v2078_v62 = vld [vmem:[#allocation2 + $0x280] sm:$0xff] }
 0x4dc   : > { %v9069_v43 = vmul.f32 %v7569_v1, %v8990_v40  ;;  %6467 = vmatprep.mubr.f32.mxu0 %v9042_v56  ;;  %6531 = vmatprep.mubr.f32.mxu1 %v9042_v56  ;;  %v2119_v40 = vld [vmem:[#allocation2 + $0x3c8] sm:$0xff]  ;;  %v2096_v24 = vld [vmem:[#allocation2 + $0x310] sm:$0xff]  ;;  %v2094_v1 = vld [vmem:[#allocation2 + $0x300] sm:$0xff] }
 0x4dd   : > { %1991 = vst [vmem:[#allocation11 + $0x48] sm:$0xff] %v9066_v34  ;;  %6563 = vmatprep.subr.mxu0 %v2088_v57  ;;  %6627 = vmatprep.subr.mxu1 %v2120_v16  ;;  %v2063_v17 = vld [vmem:[#allocation2 + $0x208] sm:$0xff]  ;;  %v2110_v57 = vld [vmem:[#allocation2 + $0x380] sm:$0xff] }
 0x4de   : > { %v7571_v10 = vpop.eup %7570  ;;  %1992 = vst [vmem:[#allocation11 + $0x50] sm:$0xff] %v9069_v43  ;;  %6468 = vmatmul.mubr.f32.gmra.mxu0 %v9042_v56  ;;  %6532 = vmatmul.mubr.f32.gmra.mxu1 %v9042_v56  ;;  %v2095_v33 = vld [vmem:[#allocation2 + $0x308] sm:$0xff]  ;;  %v2062_v16 = vld [vmem:[#allocation2 + $0x200] sm:$0xff] }
 0x4df   : > { %v7573_v18 = vpop.eup %7572  ;;  %v9078_v29 = vmul.f32 %v7571_v10, %v8994_v19  ;;  %6564 = vmatpush3.xpose.msra.mxu0 %v2072_v48  ;;  %6628 = vmatpush3.xpose.msra.mxu1 %v2104_v2  ;;  %v2086_v19 = vld [vmem:[#allocation2 + $0x2c0] sm:$0xff]  ;;  %v5205_v2 = vld [vmem:[#allocation9 + $0x18] sm:$0xff]  ;;  %v5204_v10 = vld [vmem:[#allocation9 + $0x10] sm:$0xff] }
 0x4e0   : > { %v9081_v38 = vmul.f32 %v7573_v18, %v8996_v28  ;;  %6469 = vmatprep.mubr.f32.mxu0 %v9045_v35  ;;  %6533 = vmatprep.mubr.f32.mxu1 %v9045_v35  ;;  %v2118_v28 = vld [vmem:[#allocation2 + $0x3c0] sm:$0xff]  ;;  %v7765_v18 = vmov 1966171168  }
 0x4e1   : > { %1993 = vst [vmem:[#allocation11 + $0x58] sm:$0xff] %v9078_v29  ;;  %6565 = vmatprep.subr.mxu0 %v2087_v52  ;;  %6629 = vmatprep.subr.mxu1 %v2119_v40  ;;  %v5206_v48 = vld [vmem:[#allocation9 + $0x20] sm:$0xff]  ;;  %v5203_v52 = vld [vmem:[#allocation9 + $0x8] sm:$0xff] }
 0x4e2   : > { %v7575_v41 = vpop.eup %7574  ;;  %1994 = vst [vmem:[#allocation11 + $0x60] sm:$0xff] %v9081_v38  ;;  %6470 = vmatmul.mubr.f32.gmra.mxu0 %v9045_v35  ;;  %6534 = vmatmul.mubr.f32.gmra.mxu1 %v9045_v35  ;;  %v5202_v40 = vld [vmem:[#allocation9] sm:$0xff] }
 0x4e3   : > { %v7577_v60 = vpop.eup %7576  ;;  %v9090_v50 = vmul.f32 %v7575_v41, %v9000_v61  ;;  %6566 = vmatpush3.xpose.msra.mxu0 %v2071_v21  ;;  %6630 = vmatpush3.xpose.msra.mxu1 %v2103_v32  ;;  %v2085_v61 = vld [vmem:[#allocation2 + $0x2b8] sm:$0xff] }
 0x4e4   : > { %v9093_v11 = vmul.f32 %v7577_v60, %v9002_v42  ;;  %6471 = vmatprep.mubr.f32.mxu0 %v9054_v5  ;;  %6535 = vmatprep.mubr.f32.mxu1 %v9054_v5  ;;  %v2117_v42 = vld [vmem:[#allocation2 + $0x3b8] sm:$0xff] }
 0x4e5   : > { %1995 = vst [vmem:[#allocation11 + $0x68] sm:$0xff] %v9090_v50  ;;  %6567 = vmatprep.subr.mxu0 %v2086_v19  ;;  %6631 = vmatprep.subr.mxu1 %v2118_v28 }
 0x4e6   : > { %v7579_v46 = vpop.eup %7578  ;;  %1996 = vst [vmem:[#allocation11 + $0x70] sm:$0xff] %v9093_v11  ;;  %6472 = vmatmul.mubr.f32.gmra.mxu0 %v9054_v5  ;;  %6536 = vmatmul.mubr.f32.gmra.mxu1 %v9054_v5 }
 0x4e7   : > { %v9102_v55 = vmul.f32 %v7579_v46, %v9006_v44  ;;  %6568 = vmatpush3.xpose.msra.mxu0 %v2070_v36  ;;  %6632 = vmatpush3.xpose.msra.mxu1 %v2102_v9  ;;  %v2068_v44 = vld [vmem:[#allocation2 + $0x230] sm:$0xff] }
 0x4e8   : > { %6473 = vmatprep.mubr.f32.mxu0 %v9057_v59  ;;  %6537 = vmatprep.mubr.f32.mxu1 %v9057_v59 }
 0x4e9   : > { %1997 = vst [vmem:[#allocation11 + $0x78] sm:$0xff] %v9102_v55  ;;  %6569 = vmatprep.subr.mxu0 %v2085_v61  ;;  %6633 = vmatprep.subr.mxu1 %v2117_v42 }
 0x4ea   : > { %6474 = vmatmul.mubr.f32.gmra.mxu0 %v9057_v59  ;;  %6538 = vmatmul.mubr.f32.gmra.mxu1 %v9057_v59 }
 0x4eb   : > { %6570 = vmatpush3.xpose.msra.mxu0 %v2069_v20  ;;  %6634 = vmatpush3.xpose.msra.mxu1 %v2101_v7 }
 0x4ec   : > { %6475 = vmatprep.mubr.f32.mxu0 %v9066_v34  ;;  %6539 = vmatprep.mubr.f32.mxu1 %v9066_v34 }
 0x4ed   : > { %6571 = vmatprep.subr.mxu0 %v2084_v51  ;;  %6635 = vmatprep.subr.mxu1 %v2116_v22 }
 0x4ee   : > { %6476 = vmatmul.mubr.f32.gmra.mxu0 %v9066_v34  ;;  %6540 = vmatmul.mubr.f32.gmra.mxu1 %v9066_v34 }
 0x4ef   : > { %6572 = vmatpush3.xpose.msra.mxu0 %v2068_v44  ;;  %6636 = vmatpush3.xpose.msra.mxu1 %v2100_v53 }
 0x4f0   : > { %6477 = vmatprep.mubr.f32.mxu0 %v9069_v43  ;;  %6541 = vmatprep.mubr.f32.mxu1 %v9069_v43 }
 0x4f1   : > { %6573 = vmatprep.subr.mxu0 %v2083_v49  ;;  %6637 = vmatprep.subr.mxu1 %v2115_v3 }
 0x4f2   : > { %6478 = vmatmul.mubr.f32.gmra.mxu0 %v9069_v43  ;;  %6542 = vmatmul.mubr.f32.gmra.mxu1 %v9069_v43 }
 0x4f3   : > { %6574 = vmatpush3.xpose.msra.mxu0 %v2067_v47  ;;  %6638 = vmatpush3.xpose.msra.mxu1 %v2099_v15 }
 0x4f4   : > { %6479 = vmatprep.mubr.f32.mxu0 %v9078_v29  ;;  %6543 = vmatprep.mubr.f32.mxu1 %v9078_v29 }
 0x4f5   : > { %6575 = vmatprep.subr.mxu0 %v2082_v25  ;;  %6639 = vmatprep.subr.mxu1 %v2114_v45 }
 0x4f6   : > { %6480 = vmatmul.mubr.f32.gmra.mxu0 %v9078_v29  ;;  %6544 = vmatmul.mubr.f32.gmra.mxu1 %v9078_v29 }
 0x4f7   : > { %6576 = vmatpush3.xpose.msra.mxu0 %v2066_v39  ;;  %6640 = vmatpush3.xpose.msra.mxu1 %v2098_v12 }
 0x4f8   : > { %6481 = vmatprep.mubr.f32.mxu0 %v9081_v38  ;;  %6545 = vmatprep.mubr.f32.mxu1 %v9081_v38 }
 0x4f9   : > { %6577 = vmatprep.subr.mxu0 %v2081_v37  ;;  %6641 = vmatprep.subr.mxu1 %v2113_v26 }
 0x4fa   : > { %6482 = vmatmul.mubr.f32.gmra.mxu0 %v9081_v38  ;;  %6546 = vmatmul.mubr.f32.gmra.mxu1 %v9081_v38 }
 0x4fb   : > { %6578 = vmatpush3.xpose.msra.mxu0 %v2065_v30  ;;  %6642 = vmatpush3.xpose.msra.mxu1 %v2097_v6 }
 0x4fc   : > { %6483 = vmatprep.mubr.f32.mxu0 %v9090_v50  ;;  %6547 = vmatprep.mubr.f32.mxu1 %v9090_v50 }
 0x4fd   : > { %6579 = vmatprep.subr.mxu0 %v2080_v27  ;;  %6643 = vmatprep.subr.mxu1 %v2112_v8 }
 0x4fe   : > { %6484 = vmatmul.mubr.f32.gmra.mxu0 %v9090_v50  ;;  %6548 = vmatmul.mubr.f32.gmra.mxu1 %v9090_v50 }
 0x4ff   : > { %6580 = vmatpush3.xpose.msra.mxu0 %v2064_v63  ;;  %6644 = vmatpush3.xpose.msra.mxu1 %v2096_v24 }
 0x500   : > { %6485 = vmatprep.mubr.f32.mxu0 %v9093_v11  ;;  %6549 = vmatprep.mubr.f32.mxu1 %v9093_v11 }
 0x501   : > { %6581 = vmatprep.subr.mxu0 %v2079_v54  ;;  %6645 = vmatprep.subr.mxu1 %v2111_v0 }
 0x502   : > { %6486 = vmatmul.mubr.f32.gmra.mxu0 %v9093_v11  ;;  %6550 = vmatmul.mubr.f32.gmra.mxu1 %v9093_v11 }
 0x503   : > { %6582 = vmatpush3.xpose.msra.mxu0 %v2063_v17  ;;  %6646 = vmatpush3.xpose.msra.mxu1 %v2095_v33 }
 0x504   : > { %6487 = vmatprep.mubr.f32.mxu0 %v9102_v55  ;;  %6551 = vmatprep.mubr.f32.mxu1 %v9102_v55 }
 0x505   : > { %6583 = vmatprep.subr.mxu0 %v2078_v62  ;;  %6647 = vmatprep.subr.mxu1 %v2110_v57 }
 0x506   : > { %6488 = vmatmul.mubr.f32.gmra.mxu0 %v9102_v55  ;;  %6552 = vmatmul.mubr.f32.gmra.mxu1 %v9102_v55 }
 0x507   : > { %6584 = vmatpush3.xpose.msra.mxu0 %v2062_v16  ;;  %6648 = vmatpush3.xpose.msra.mxu1 %v2094_v1 }
 0x508   : > { %6585 = vmatprep.mubr.f32.mxu0 %v9010_v4  ;;  %6649 = vmatprep.mubr.f32.mxu1 %v9010_v4 }
 0x50a   : > { %6586 = vmatmul.mubr.f32.vlgmr.msra.gmra.mxu0 %v9010_v4  ;;  %6650 = vmatmul.mubr.f32.vlgmr.msra.gmra.mxu1 %v9010_v4  ;;  %v5217_v4 = vld [vmem:[#allocation9 + $0x78] sm:$0xff] }
 0x50b   : > { %6587 = vmatprep.mubr.f32.mxu0 %v9018_v13  ;;  %6651 = vmatprep.mubr.f32.mxu1 %v9018_v13 }
 0x50c   : > { %6953 = vmatprep.subr.mxu0 %v5217_v4  ;;  %7177 = vmatprep.subr.mxu1 %v5217_v4 }
 0x50d   : > { %6954 = vmatpush3.msra.mxu0 %v5217_v4  ;;  %7193 = vmatpush3.msra.mxu1 %v5217_v4 }
 0x50e   : > { %6588 = vmatmul.mubr.f32.gmra.mxu0 %v9018_v13  ;;  %6652 = vmatmul.mubr.f32.gmra.mxu1 %v9018_v13  ;;  %v5216_v13 = vld [vmem:[#allocation9 + $0x70] sm:$0xff] }
 0x50f   : > { %6589 = vmatprep.mubr.f32.mxu0 %v9021_v14  ;;  %6653 = vmatprep.mubr.f32.mxu1 %v9021_v14 }
 0x510   : > { %6955 = vmatprep.subr.mxu0 %v5216_v13  ;;  %7178 = vmatprep.subr.mxu1 %v5216_v13 }
 0x511   : > { %6956 = vmatpush3.msra.mxu0 %v5216_v13  ;;  %7194 = vmatpush3.msra.mxu1 %v5216_v13 }
 0x512   : > { %6590 = vmatmul.mubr.f32.gmra.mxu0 %v9021_v14  ;;  %6654 = vmatmul.mubr.f32.gmra.mxu1 %v9021_v14  ;;  %v5215_v14 = vld [vmem:[#allocation9 + $0x68] sm:$0xff] }
 0x513   : > { %6591 = vmatprep.mubr.f32.mxu0 %v9030_v23  ;;  %6655 = vmatprep.mubr.f32.mxu1 %v9030_v23 }
 0x514   : > { %6957 = vmatprep.subr.mxu0 %v5215_v14  ;;  %7179 = vmatprep.subr.mxu1 %v5215_v14 }
 0x515   : > { %6958 = vmatpush3.msra.mxu0 %v5215_v14  ;;  %7195 = vmatpush3.msra.mxu1 %v5215_v14 }
 0x516   : > { %6592 = vmatmul.mubr.f32.gmra.mxu0 %v9030_v23  ;;  %6656 = vmatmul.mubr.f32.gmra.mxu1 %v9030_v23  ;;  %v5214_v23 = vld [vmem:[#allocation9 + $0x60] sm:$0xff] }
 0x517   : > { %6593 = vmatprep.mubr.f32.mxu0 %v9033_v31  ;;  %6657 = vmatprep.mubr.f32.mxu1 %v9033_v31 }
 0x518   : > { %6959 = vmatprep.subr.mxu0 %v5214_v23  ;;  %7180 = vmatprep.subr.mxu1 %v5214_v23 }
 0x519   : > { %6960 = vmatpush3.msra.mxu0 %v5214_v23  ;;  %7196 = vmatpush3.msra.mxu1 %v5214_v23 }
 0x51a   : > { %6594 = vmatmul.mubr.f32.gmra.mxu0 %v9033_v31  ;;  %6658 = vmatmul.mubr.f32.gmra.mxu1 %v9033_v31  ;;  %v5213_v31 = vld [vmem:[#allocation9 + $0x58] sm:$0xff] }
 0x51b   : > { %6595 = vmatprep.mubr.f32.mxu0 %v9042_v56  ;;  %6659 = vmatprep.mubr.f32.mxu1 %v9042_v56 }
 0x51c   : > { %6961 = vmatprep.subr.mxu0 %v5213_v31  ;;  %7181 = vmatprep.subr.mxu1 %v5213_v31 }
 0x51d   : > { %6962 = vmatpush3.msra.mxu0 %v5213_v31  ;;  %7197 = vmatpush3.msra.mxu1 %v5213_v31 }
 0x51e   : > { %6596 = vmatmul.mubr.f32.gmra.mxu0 %v9042_v56  ;;  %6660 = vmatmul.mubr.f32.gmra.mxu1 %v9042_v56  ;;  %v5212_v56 = vld [vmem:[#allocation9 + $0x50] sm:$0xff] }
 0x51f   : > { %6597 = vmatprep.mubr.f32.mxu0 %v9045_v35  ;;  %6661 = vmatprep.mubr.f32.mxu1 %v9045_v35 }
 0x520   : > { %6963 = vmatprep.subr.mxu0 %v5212_v56  ;;  %7182 = vmatprep.subr.mxu1 %v5212_v56 }
 0x521   : > { %6964 = vmatpush3.msra.mxu0 %v5212_v56  ;;  %7198 = vmatpush3.msra.mxu1 %v5212_v56 }
 0x522   : > { %6598 = vmatmul.mubr.f32.gmra.mxu0 %v9045_v35  ;;  %6662 = vmatmul.mubr.f32.gmra.mxu1 %v9045_v35  ;;  %v5211_v35 = vld [vmem:[#allocation9 + $0x48] sm:$0xff] }
 0x523   : > { %6599 = vmatprep.mubr.f32.mxu0 %v9054_v5  ;;  %6663 = vmatprep.mubr.f32.mxu1 %v9054_v5 }
 0x524   : > { %6965 = vmatprep.subr.mxu0 %v5211_v35  ;;  %7183 = vmatprep.subr.mxu1 %v5211_v35 }
 0x525   : > { %6966 = vmatpush3.msra.mxu0 %v5211_v35  ;;  %7199 = vmatpush3.msra.mxu1 %v5211_v35 }
 0x526   : > { %6600 = vmatmul.mubr.f32.gmra.mxu0 %v9054_v5  ;;  %6664 = vmatmul.mubr.f32.gmra.mxu1 %v9054_v5  ;;  %v5210_v5 = vld [vmem:[#allocation9 + $0x40] sm:$0xff] }
 0x527   : > { %6601 = vmatprep.mubr.f32.mxu0 %v9057_v59  ;;  %6665 = vmatprep.mubr.f32.mxu1 %v9057_v59 }
 0x528   : > { %6967 = vmatprep.subr.mxu0 %v5210_v5  ;;  %7184 = vmatprep.subr.mxu1 %v5210_v5 }
 0x529   : > { %6968 = vmatpush3.msra.mxu0 %v5210_v5  ;;  %7200 = vmatpush3.msra.mxu1 %v5210_v5 }
 0x52a   : > { %6602 = vmatmul.mubr.f32.gmra.mxu0 %v9057_v59  ;;  %6666 = vmatmul.mubr.f32.gmra.mxu1 %v9057_v59  ;;  %v5209_v59 = vld [vmem:[#allocation9 + $0x38] sm:$0xff] }
 0x52b   : > { %6603 = vmatprep.mubr.f32.mxu0 %v9066_v34  ;;  %6667 = vmatprep.mubr.f32.mxu1 %v9066_v34 }
 0x52c   : > { %6969 = vmatprep.subr.mxu0 %v5209_v59  ;;  %7185 = vmatprep.subr.mxu1 %v5209_v59 }
 0x52d   : > { %6970 = vmatpush3.msra.mxu0 %v5209_v59  ;;  %7201 = vmatpush3.msra.mxu1 %v5209_v59 }
 0x52e   : > { %6604 = vmatmul.mubr.f32.gmra.mxu0 %v9066_v34  ;;  %6668 = vmatmul.mubr.f32.gmra.mxu1 %v9066_v34  ;;  %v5208_v34 = vld [vmem:[#allocation9 + $0x30] sm:$0xff] }
 0x52f   : > { %6605 = vmatprep.mubr.f32.mxu0 %v9069_v43  ;;  %6669 = vmatprep.mubr.f32.mxu1 %v9069_v43 }
 0x530   : > { %6971 = vmatprep.subr.mxu0 %v5208_v34  ;;  %7186 = vmatprep.subr.mxu1 %v5208_v34 }
 0x531   : > { %6972 = vmatpush3.msra.mxu0 %v5208_v34  ;;  %7202 = vmatpush3.msra.mxu1 %v5208_v34 }
 0x532   : > { %6606 = vmatmul.mubr.f32.gmra.mxu0 %v9069_v43  ;;  %6670 = vmatmul.mubr.f32.gmra.mxu1 %v9069_v43  ;;  %v5207_v43 = vld [vmem:[#allocation9 + $0x28] sm:$0xff] }
 0x533   : > { %6607 = vmatprep.mubr.f32.mxu0 %v9078_v29  ;;  %6671 = vmatprep.mubr.f32.mxu1 %v9078_v29 }
 0x534   : > { %6973 = vmatprep.subr.mxu0 %v5207_v43  ;;  %7187 = vmatprep.subr.mxu1 %v5207_v43 }
 0x535   : > { %6974 = vmatpush3.msra.mxu0 %v5207_v43  ;;  %7203 = vmatpush3.msra.mxu1 %v5207_v43 }
 0x536   : > { %6608 = vmatmul.mubr.f32.gmra.mxu0 %v9078_v29  ;;  %6672 = vmatmul.mubr.f32.gmra.mxu1 %v9078_v29  ;;  %v2907_v29 = vunpack.c.l.s4 %v7765_v18 }
 0x537   : > { %6609 = vmatprep.mubr.f32.mxu0 %v9081_v38  ;;  %6673 = vmatprep.mubr.f32.mxu1 %v9081_v38 }
 0x538   : > { %6975 = vmatprep.subr.mxu0 %v5206_v48  ;;  %7188 = vmatprep.subr.mxu1 %v5206_v48 }
 0x539   : > { %6976 = vmatpush3.msra.mxu0 %v5206_v48  ;;  %7204 = vmatpush3.msra.mxu1 %v5206_v48 }
 0x53a   : > { %6610 = vmatmul.mubr.f32.gmra.mxu0 %v9081_v38  ;;  %6674 = vmatmul.mubr.f32.gmra.mxu1 %v9081_v38  ;;  %v2908_v38 = vunpack.c.0.s8 %v2907_v29 }
 0x53b   : > { %6611 = vmatprep.mubr.f32.mxu0 %v9090_v50  ;;  %6675 = vmatprep.mubr.f32.mxu1 %v9090_v50 }
 0x53c   : > { %6977 = vmatprep.subr.mxu0 %v5205_v2  ;;  %7189 = vmatprep.subr.mxu1 %v5205_v2  ;;  %v9202_v41 = vsub.s32 %v2908_v38, %v8322_v58 }
 0x53d   : > { %6978 = vmatpush3.msra.mxu0 %v5205_v2  ;;  %7205 = vmatpush3.msra.mxu1 %v5205_v2 }
 0x53e   : > { %6612 = vmatmul.mubr.f32.gmra.mxu0 %v9090_v50  ;;  %6676 = vmatmul.mubr.f32.gmra.mxu1 %v9090_v50 }
 0x53f   : > { %6613 = vmatprep.mubr.f32.mxu0 %v9093_v11  ;;  %6677 = vmatprep.mubr.f32.mxu1 %v9093_v11 }
 0x540   : > { %6979 = vmatprep.subr.mxu0 %v5204_v10  ;;  %7190 = vmatprep.subr.mxu1 %v5204_v10 }
 0x541   : > { %6980 = vmatpush3.msra.mxu0 %v5204_v10  ;;  %7206 = vmatpush3.msra.mxu1 %v5204_v10 }
 0x542   : > { %6614 = vmatmul.mubr.f32.gmra.mxu0 %v9093_v11  ;;  %6678 = vmatmul.mubr.f32.gmra.mxu1 %v9093_v11 }
 0x543   : > { %6615 = vmatprep.mubr.f32.mxu0 %v9102_v55  ;;  %6679 = vmatprep.mubr.f32.mxu1 %v9102_v55 }
 0x544   : > { %6981 = vmatprep.subr.mxu0 %v5203_v52  ;;  %7191 = vmatprep.subr.mxu1 %v5203_v52 }
 0x545   : > { %6982 = vmatpush3.msra.mxu0 %v5203_v52  ;;  %7207 = vmatpush3.msra.mxu1 %v5203_v52 }
 0x546   : > { %6616 = vmatmul.mubr.f32.gmra.mxu0 %v9102_v55  ;;  %6680 = vmatmul.mubr.f32.gmra.mxu1 %v9102_v55 }
 0x547   : > { %6983 = vmatprep.subr.mxu0 %v5202_v40  ;;  %7192 = vmatprep.subr.mxu1 %v5202_v40 }
 0x548   : > { %6984 = vmatpush3.msra.mxu0 %v5202_v40  ;;  %7208 = vmatpush3.msra.mxu1 %v5202_v40 }
 0x58a   : > { %v2192_v21 = vpop.f32.mrf.mxu0  ;;  %v2353_v32 = vpop.f32.mrf.mxu1 }
 0x58c   : > { %v2194_v19 = vpop.f32.mrf.mxu0  ;;  %v2355_v28 = vpop.f32.mrf.mxu1 }
 0x58d   : > { %v2898_v60 = vcombine.low %v2192_v21, %v2194_v19  ;;  %v2899_v50 = vcombine.high %v2192_v21, %v2194_v19  ;;  %v2900_v11 = vcombine.low %v2353_v32, %v2355_v28  ;;  %v2901_v36 = vcombine.high %v2353_v32, %v2355_v28 }
 0x58e   : > { %v2198_v9 = vpop.f32.mrf.mxu0  ;;  %v2359_v46 = vpop.f32.mrf.mxu1 }
 0x58f   : > { %v9205_v61 = vrot.slane %v2898_v60, %v9202_v41  ;;  %v9208_v42 = vrot.slane %v2899_v50, %v9202_v41  ;;  %v9211_v55 = vrot.slane %v2900_v11, %v9202_v41  ;;  %v9214_v58 = vrot.slane %v2901_v36, %v9202_v41 }
 0x590   : > { %v2200_v20 = vpop.f32.mrf.mxu0  ;;  %v2361_v7 = vpop.f32.mrf.mxu1 }
 0x591   : > { %v3034_v49 = vcombine.low %v2198_v9, %v2200_v20  ;;  %v3035_v3 = vcombine.high %v2198_v9, %v2200_v20  ;;  %v3036_v47 = vcombine.low %v2359_v46, %v2361_v7  ;;  %v3037_v15 = vcombine.high %v2359_v46, %v2361_v7 }
 0x592   : > { %v2204_v25 = vpop.f32.mrf.mxu0  ;;  %v2365_v45 = vpop.f32.mrf.mxu1 }
 0x593   : > { %v9225_v39 = vrot.slane %v3034_v49, %v9202_v41  ;;  %v9228_v12 = vrot.slane %v3035_v3, %v9202_v41  ;;  %v9231_v37 = vrot.slane %v3036_v47, %v9202_v41  ;;  %v9234_v26 = vrot.slane %v3037_v15, %v9202_v41 }
 0x594   : > { %v2206_v30 = vpop.f32.mrf.mxu0  ;;  %v2367_v6 = vpop.f32.mrf.mxu1 }
 0x595   : > { %v3170_v27 = vcombine.low %v2204_v25, %v2206_v30  ;;  %v3171_v8 = vcombine.high %v2204_v25, %v2206_v30  ;;  %v3172_v63 = vcombine.low %v2365_v45, %v2367_v6  ;;  %v3173_v24 = vcombine.high %v2365_v45, %v2367_v6 }
 0x596   : > { %v2210_v62 = vpop.f32.mrf.mxu0  ;;  %v2371_v57 = vpop.f32.mrf.mxu1 }
 0x597   : > { %v9245_v16 = vrot.slane %v3170_v27, %v9202_v41  ;;  %v9248_v1 = vrot.slane %v3171_v8, %v9202_v41  ;;  %v9251_v4 = vrot.slane %v3172_v63, %v9202_v41  ;;  %v9254_v13 = vrot.slane %v3173_v24, %v9202_v41 }
 0x598   : > { %v2212_v14 = vpop.f32.mrf.mxu0  ;;  %v2373_v23 = vpop.f32.mrf.mxu1 }
 0x599   : > { %v3306_v59 = vcombine.low %v2210_v62, %v2212_v14  ;;  %v3307_v34 = vcombine.high %v2210_v62, %v2212_v14  ;;  %v3308_v43 = vcombine.low %v2371_v57, %v2373_v23  ;;  %v3309_v48 = vcombine.high %v2371_v57, %v2373_v23 }
 0x59a   : > { %v2216_v2 = vpop.f32.mrf.mxu0  ;;  %v2377_v10 = vpop.f32.mrf.mxu1 }
 0x59b   : > { %v9265_v52 = vrot.slane %v3306_v59, %v9202_v41  ;;  %v9268_v40 = vrot.slane %v3307_v34, %v9202_v41  ;;  %v9271_v18 = vrot.slane %v3308_v43, %v9202_v41  ;;  %v9274_v29 = vrot.slane %v3309_v48, %v9202_v41 }
 0x59c   : > { %v2218_v38 = vpop.f32.mrf.mxu0  ;;  %v2379_v21 = vpop.f32.mrf.mxu1 }
 0x59d   : > { %v3442_v32 = vcombine.low %v2216_v2, %v2218_v38  ;;  %v3443_v19 = vcombine.high %v2216_v2, %v2218_v38  ;;  %v3444_v28 = vcombine.low %v2377_v10, %v2379_v21  ;;  %v3445_v60 = vcombine.high %v2377_v10, %v2379_v21 }
 0x59e   : > { %v2222_v46 = vpop.f32.mrf.mxu0  ;;  %v2383_v20 = vpop.f32.mrf.mxu1 }
 0x59f   : > { %v9285_v7 = vrot.slane %v3442_v32, %v9202_v41  ;;  %v9288_v49 = vrot.slane %v3443_v19, %v9202_v41  ;;  %v9291_v3 = vrot.slane %v3444_v28, %v9202_v41  ;;  %v9294_v47 = vrot.slane %v3445_v60, %v9202_v41 }
 0x5a0   : > { %v2224_v15 = vpop.f32.mrf.mxu0  ;;  %v2385_v25 = vpop.f32.mrf.mxu1 }
 0x5a1   : > { %v3578_v8 = vcombine.low %v2222_v46, %v2224_v15  ;;  %v3579_v63 = vcombine.high %v2222_v46, %v2224_v15  ;;  %v3580_v24 = vcombine.low %v2383_v20, %v2385_v25  ;;  %v3581_v62 = vcombine.high %v2383_v20, %v2385_v25 }
 0x5a2   : > { %v2228_v57 = vpop.f32.mrf.mxu0  ;;  %v2389_v14 = vpop.f32.mrf.mxu1 }
 0x5a3   : > { %v9305_v23 = vrot.slane %v3578_v8, %v9202_v41  ;;  %v9308_v59 = vrot.slane %v3579_v63, %v9202_v41  ;;  %v9311_v34 = vrot.slane %v3580_v24, %v9202_v41  ;;  %v9314_v43 = vrot.slane %v3581_v62, %v9202_v41 }
 0x5a4   : > { %v2230_v48 = vpop.f32.mrf.mxu0  ;;  %v2391_v2 = vpop.f32.mrf.mxu1 }
 0x5a5   : > { %v3714_v10 = vcombine.low %v2228_v57, %v2230_v48  ;;  %v3715_v38 = vcombine.high %v2228_v57, %v2230_v48  ;;  %v3716_v21 = vcombine.low %v2389_v14, %v2391_v2  ;;  %v3717_v32 = vcombine.high %v2389_v14, %v2391_v2 }
 0x5a6   : > { %v2234_v20 = vpop.f32.mrf.mxu0  ;;  %v2395_v15 = vpop.f32.mrf.mxu1 }
 0x5a7   : > { %v9325_v25 = vrot.slane %v3714_v10, %v9202_v41  ;;  %v9328_v8 = vrot.slane %v3715_v38, %v9202_v41  ;;  %v9331_v63 = vrot.slane %v3716_v21, %v9202_v41  ;;  %v9334_v24 = vrot.slane %v3717_v32, %v9202_v41 }
 0x5a8   : > { %v2236_v62 = vpop.f32.mrf.mxu0  ;;  %v2397_v57 = vpop.f32.mrf.mxu1 }
 0x5a9   : > { %v3850_v38 = vcombine.low %v2234_v20, %v2236_v62  ;;  %v3851_v21 = vcombine.high %v2234_v20, %v2236_v62  ;;  %v3852_v46 = vcombine.low %v2395_v15, %v2397_v57  ;;  %v3853_v60 = vcombine.high %v2395_v15, %v2397_v57 }
 0x5aa   : > { %v2240_v32 = vpop.f32.mrf.mxu0  ;;  %v2401_v28 = vpop.f32.mrf.mxu1 }
 0x5ab   : > { %v9345_v19 = vrot.slane %v3850_v38, %v9202_v41  ;;  %v9348_v14 = vrot.slane %v3851_v21, %v9202_v41  ;;  %v9351_v48 = vrot.slane %v3852_v46, %v9202_v41  ;;  %v9354_v2 = vrot.slane %v3853_v60, %v9202_v41 }
 0x5ac   : > { %v2242_v27 = vpop.f32.mrf.mxu0  ;;  %v2403_v10 = vpop.f32.mrf.mxu1 }
 0x5ad   : > { %10710 = vst [vmem:[#allocation28_spill] sm:$0xff] %v9345_v19  ;;  %10711 = vst [vmem:[#allocation29_spill] sm:$0xff] %v9348_v14  ;;  %v3986_v6 = vcombine.low %v2240_v32, %v2242_v27  ;;  %v3987_v20 = vcombine.high %v2240_v32, %v2242_v27  ;;  %v3988_v62 = vcombine.low %v2401_v28, %v2403_v10 }
 0x5ae   : > { %10712 = vst [vmem:[#allocation30_spill] sm:$0xff] %v9351_v48  ;;  %10713 = vst [vmem:[#allocation31_spill] sm:$0xff] %v9354_v2  ;;  %v3989_v15 = vcombine.high %v2401_v28, %v2403_v10  ;;  %v2246_v60 = vpop.f32.mrf.mxu0  ;;  %v2407_v30 = vpop.f32.mrf.mxu1 }
 0x5af   : > { %v9365_v45 = vrot.slane %v3986_v6, %v9202_v41  ;;  %v9368_v27 = vrot.slane %v3987_v20, %v9202_v41  ;;  %v9371_v28 = vrot.slane %v3988_v62, %v9202_v41 }
 0x5b0   : > { %v9374_v10 = vrot.slane %v3989_v15, %v9202_v41  ;;  %v2248_v32 = vpop.f32.mrf.mxu0  ;;  %v2409_v38 = vpop.f32.mrf.mxu1 }
 0x5b1   : > { %10714 = vst [vmem:[#allocation32_spill] sm:$0xff] %v9368_v27  ;;  %v4122_v57 = vcombine.low %v2246_v60, %v2248_v32  ;;  %v4123_v62 = vcombine.high %v2246_v60, %v2248_v32  ;;  %v4124_v9 = vcombine.low %v2407_v30, %v2409_v38  ;;  %v4125_v36 = vcombine.high %v2407_v30, %v2409_v38 }
 0x5b2   : > { %10715 = vst [vmem:[#allocation33_spill] sm:$0xff] %v9374_v10  ;;  %v2252_v15 = vpop.f32.mrf.mxu0  ;;  %v2413_v11 = vpop.f32.mrf.mxu1 }
 0x5b3   : > { %v9385_v50 = vrot.slane %v4122_v57, %v9202_v41  ;;  %v9388_v21 = vrot.slane %v4123_v62, %v9202_v41  ;;  %v9391_v46 = vrot.slane %v4124_v9, %v9202_v41  ;;  %v9394_v6 = vrot.slane %v4125_v36, %v9202_v41 }
 0x5b4   : > { %v2254_v5 = vpop.f32.mrf.mxu0  ;;  %v2415_v20 = vpop.f32.mrf.mxu1 }
 0x5b5   : > { %10716 = vst [vmem:[#allocation34_spill] sm:$0xff] %v9385_v50  ;;  %10717 = vst [vmem:[#allocation35_spill] sm:$0xff] %v9388_v21  ;;  %v4258_v35 = vcombine.low %v2252_v15, %v2254_v5  ;;  %v4259_v60 = vcombine.high %v2252_v15, %v2254_v5  ;;  %v4260_v32 = vcombine.low %v2413_v11, %v2415_v20 }
 0x5b6   : > { %10718 = vst [vmem:[#allocation36_spill] sm:$0xff] %v9391_v46  ;;  %10719 = vst [vmem:[#allocation37_spill] sm:$0xff] %v9394_v6  ;;  %v4261_v30 = vcombine.high %v2413_v11, %v2415_v20  ;;  %v2258_v36 = vpop.f32.mrf.mxu0  ;;  %v2419_v56 = vpop.f32.mrf.mxu1 }
 0x5b7   : > { %v9405_v31 = vrot.slane %v4258_v35, %v9202_v41  ;;  %v9408_v5 = vrot.slane %v4259_v60, %v9202_v41  ;;  %v9411_v11 = vrot.slane %v4260_v32, %v9202_v41 }
 0x5b8   : > { %v9414_v20 = vrot.slane %v4261_v30, %v9202_v41  ;;  %v2260_v15 = vpop.f32.mrf.mxu0  ;;  %v2421_v57 = vpop.f32.mrf.mxu1 }
 0x5b9   : > { %10720 = vst [vmem:[#allocation38_spill] sm:$0xff] %v9405_v31  ;;  %10721 = vst [vmem:[#allocation39_spill] sm:$0xff] %v9408_v5  ;;  %v4394_v38 = vcombine.low %v2258_v36, %v2260_v15  ;;  %v4395_v32 = vcombine.high %v2258_v36, %v2260_v15  ;;  %v4396_v33 = vcombine.low %v2419_v56, %v2421_v57 }
 0x5ba   : > { %10722 = vst [vmem:[#allocation40_spill] sm:$0xff] %v9411_v11  ;;  %10723 = vst [vmem:[#allocation41_spill] sm:$0xff] %v9414_v20  ;;  %v4397_v17 = vcombine.high %v2419_v56, %v2421_v57  ;;  %v2264_v30 = vpop.f32.mrf.mxu0  ;;  %v2425_v0 = vpop.f32.mrf.mxu1 }
 0x5bb   : > { %v9425_v54 = vrot.slane %v4394_v38, %v9202_v41  ;;  %v9428_v62 = vrot.slane %v4395_v32, %v9202_v41  ;;  %v9431_v9 = vrot.slane %v4396_v33, %v9202_v41 }
 0x5bc   : > { %v9434_v35 = vrot.slane %v4397_v17, %v9202_v41  ;;  %v2266_v53 = vpop.f32.mrf.mxu0  ;;  %v2427_v60 = vpop.f32.mrf.mxu1 }
 0x5bd   : > { %10724 = vst [vmem:[#allocation42_spill] sm:$0xff] %v9425_v54  ;;  %10725 = vst [vmem:[#allocation43_spill] sm:$0xff] %v9428_v62  ;;  %v4530_v44 = vcombine.low %v2264_v30, %v2266_v53  ;;  %v4531_v36 = vcombine.high %v2264_v30, %v2266_v53  ;;  %v4532_v15 = vcombine.low %v2425_v0, %v2427_v60 }
 0x5be   : > { %10726 = vst [vmem:[#allocation44_spill] sm:$0xff] %v9431_v9  ;;  %10727 = vst [vmem:[#allocation45_spill] sm:$0xff] %v9434_v35  ;;  %v4533_v56 = vcombine.high %v2425_v0, %v2427_v60  ;;  %v2270_v17 = vpop.f32.mrf.mxu0  ;;  %v2431_v51 = vpop.f32.mrf.mxu1 }
 0x5bf   : > { %v9445_v22 = vrot.slane %v4530_v44, %v9202_v41  ;;  %v9448_v53 = vrot.slane %v4531_v36, %v9202_v41  ;;  %v9451_v0 = vrot.slane %v4532_v15, %v9202_v41 }
 0x5c0   : > { %v9454_v60 = vrot.slane %v4533_v56, %v9202_v41  ;;  %v2272_v30 = vpop.f32.mrf.mxu0  ;;  %v2433_v38 = vpop.f32.mrf.mxu1 }
 0x5c1   : > { %10728 = vst [vmem:[#allocation46_spill] sm:$0xff] %v9445_v22  ;;  %10729 = vst [vmem:[#allocation47_spill] sm:$0xff] %v9448_v53  ;;  %v4666_v57 = vcombine.low %v2270_v17, %v2272_v30  ;;  %v4667_v15 = vcombine.high %v2270_v17, %v2272_v30  ;;  %v4668_v35 = vcombine.low %v2431_v51, %v2433_v38 }
 0x5c2   : > { %10730 = vst [vmem:[#allocation48_spill] sm:$0xff] %v9451_v0  ;;  %10731 = vst [vmem:[#allocation49_spill] sm:$0xff] %v9454_v60  ;;  %v4669_v62 = vcombine.high %v2431_v51, %v2433_v38  ;;  %v2276_v56 = vpop.f32.mrf.mxu0  ;;  %v2437_v9 = vpop.f32.mrf.mxu1 }
 0x5c3   : > { %v9465_v54 = vrot.slane %v4666_v57, %v9202_v41  ;;  %v9468_v32 = vrot.slane %v4667_v15, %v9202_v41  ;;  %v9471_v33 = vrot.slane %v4668_v35, %v9202_v41 }
 0x5c4   : > { %v9474_v44 = vrot.slane %v4669_v62, %v9202_v41  ;;  %v2278_v0 = vpop.f32.mrf.mxu0  ;;  %v2439_v36 = vpop.f32.mrf.mxu1 }
 0x5c5   : > { %10732 = vst [vmem:[#allocation50_spill] sm:$0xff] %v9465_v54  ;;  %10733 = vst [vmem:[#allocation51_spill] sm:$0xff] %v9468_v32  ;;  %v4802_v60 = vcombine.low %v2276_v56, %v2278_v0  ;;  %v4803_v17 = vcombine.high %v2276_v56, %v2278_v0  ;;  %v4804_v30 = vcombine.low %v2437_v9, %v2439_v36 }
 0x5c6   : > { %10734 = vst [vmem:[#allocation52_spill] sm:$0xff] %v9471_v33  ;;  %10735 = vst [vmem:[#allocation53_spill] sm:$0xff] %v9474_v44  ;;  %v4805_v51 = vcombine.high %v2437_v9, %v2439_v36  ;;  %v2282_v62 = vpop.f32.mrf.mxu0  ;;  %v2443_v53 = vpop.f32.mrf.mxu1 }
 0x5c7   : > { %v9485_v22 = vrot.slane %v4802_v60, %v9202_v41  ;;  %v9488_v0 = vrot.slane %v4803_v17, %v9202_v41  ;;  %v9491_v9 = vrot.slane %v4804_v30, %v9202_v41 }
 0x5c8   : > { %v9494_v36 = vrot.slane %v4805_v51, %v9202_v41  ;;  %v2284_v56 = vpop.f32.mrf.mxu0  ;;  %v2445_v57 = vpop.f32.mrf.mxu1 }
 0x5c9   : > { %10736 = vst [vmem:[#allocation54_spill] sm:$0xff] %v9485_v22  ;;  %10737 = vst [vmem:[#allocation55_spill] sm:$0xff] %v9488_v0  ;;  %v4938_v38 = vcombine.low %v2282_v62, %v2284_v56  ;;  %v4939_v30 = vcombine.high %v2282_v62, %v2284_v56  ;;  %v4940_v44 = vcombine.low %v2443_v53, %v2445_v57 }
 0x5ca   : > { %10738 = vst [vmem:[#allocation56_spill] sm:$0xff] %v9491_v9  ;;  %10739 = vst [vmem:[#allocation57_spill] sm:$0xff] %v9494_v36  ;;  %v4941_v32 = vcombine.high %v2443_v53, %v2445_v57  ;;  %v2514_v51 = vpop.f32.mrf.mxu0  ;;  %v2675_v33 = vpop.f32.mrf.mxu1 }
 0x5cb   : > { %v9505_v54 = vrot.slane %v4938_v38, %v9202_v41  ;;  %v9508_v15 = vrot.slane %v4939_v30, %v9202_v41  ;;  %v9511_v35 = vrot.slane %v4940_v44, %v9202_v41 }
 0x5cc   : > { %v9514_v60 = vrot.slane %v4941_v32, %v9202_v41  ;;  %v2516_v9 = vpop.f32.mrf.mxu0  ;;  %v2677_v17 = vpop.f32.mrf.mxu1 }
 0x5cd   : > { %10740 = vst [vmem:[#allocation58_spill] sm:$0xff] %v9505_v54  ;;  %10741 = vst [vmem:[#allocation59_spill] sm:$0xff] %v9508_v15  ;;  %v2902_v36 = vcombine.low %v2514_v51, %v2516_v9  ;;  %v2903_v62 = vcombine.high %v2514_v51, %v2516_v9  ;;  %v2904_v56 = vcombine.low %v2675_v33, %v2677_v17 }
 0x5ce   : > { %10742 = vst [vmem:[#allocation60_spill] sm:$0xff] %v9511_v35  ;;  %10743 = vst [vmem:[#allocation61_spill] sm:$0xff] %v9514_v60  ;;  %v2905_v53 = vcombine.high %v2675_v33, %v2677_v17  ;;  %v2520_v32 = vpop.f32.mrf.mxu0  ;;  %v2681_v0 = vpop.f32.mrf.mxu1 }
 0x5cf   : > { %v2940_v22 = vrot.slane %v2902_v36, %v9202_v41  ;;  %v2954_v9 = vrot.slane %v2904_v56, %v9202_v41  ;;  %v2947_v57 = vrot.slane %v2903_v62, %v9202_v41 }
 0x5d0   : > { %v2522_v51 = vpop.f32.mrf.mxu0  ;;  %v2683_v33 = vpop.f32.mrf.mxu1  ;;  %v2961_v38 = vrot.slane %v2905_v53, %v9202_v41 }
 0x5d1   : > { %v2966_v17 = vcombine.low %v2940_v22, %v2954_v9  ;;  %v2967_v20 = vcombine.high %v2940_v22, %v2954_v9  ;;  %v3038_v60 = vcombine.low %v2520_v32, %v2522_v51  ;;  %v3040_v15 = vcombine.low %v2681_v0, %v2683_v33 }
 0x5d2   : > { %v9528_v35 = vpop.f32.mrf.mxu0  ;;  %v9530_v30 = vpop.f32.mrf.mxu1  ;;  %v10744_v22 = vcombine.high %v9205_v61, %v9211_v55  ;;  %v2968_v53 = vcombine.low %v2947_v57, %v2961_v38  ;;  %v3039_v6 = vcombine.high %v2520_v32, %v2522_v51  ;;  %v2969_v50 = vcombine.high %v2947_v57, %v2961_v38 }
 0x5d3   : > { %v3018_v44 = vrot.slane %v2967_v20, %v9202_v41  ;;  %v3004_v56 = vrot.slane %v2966_v17, %v9202_v41  ;;  %v10745_v20 = vcombine.low %v9205_v61, %v9211_v55  ;;  %v3076_v21 = vrot.slane %v3038_v60, %v9202_v41 }
 0x5d4   : > { %v9533_v54 = vpop.f32.mrf.mxu0  ;;  %v9535_v36 = vpop.f32.mrf.mxu1  ;;  %v2990_v62 = vrot.slane %v10744_v22, %v9202_v41  ;;  %v3041_v17 = vcombine.high %v2681_v0, %v2683_v33  ;;  %v3090_v2 = vrot.slane %v3040_v15, %v9202_v41  ;;  %v3011_v61 = vrot.slane %v2968_v53, %v9202_v41 }
 0x5d5   : > { %v2976_v11 = vrot.slane %v10745_v20, %v9202_v41  ;;  %v9562_v55 = vrot.slane %v3039_v6, %v9202_v41  ;;  %v3025_v6 = vrot.slane %v2969_v50, %v9202_v41  ;;  %v10751_v53 = vcombine.high %v9208_v42, %v9214_v58 }
 0x5d6   : > { %v9542_v9 = vpop.f32.mrf.mxu0  ;;  %v9544_v5 = vpop.f32.mrf.mxu1  ;;  %v3030_v31 = vcombine.low %v2990_v62, %v3018_v44  ;;  %v9565_v15 = vrot.slane %v3041_v17, %v9202_v41  ;;  %v3102_v0 = vcombine.low %v3076_v21, %v3090_v2  ;;  %v3031_v38 = vcombine.high %v2990_v62, %v3018_v44 }
 0x5d7   : > { %v3026_v14 = vcombine.low %v2976_v11, %v3004_v56  ;;  %v3027_v48 = vcombine.high %v2976_v11, %v3004_v56  ;;  %v3103_v56 = vcombine.high %v3076_v21, %v3090_v2  ;;  %v2997_v20 = vrot.slane %v10751_v53, %v9202_v41 }
 0x5d8   : > { %v9552_v46 = vpop.f32.mrf.mxu0  ;;  %v9554_v22 = vpop.f32.mrf.mxu1  ;;  %v3104_v17 = vcombine.low %v9562_v55, %v9565_v15  ;;  %v10752_v50 = vcombine.low %v9225_v39, %v9231_v37  ;;  %v9593_v21 = vrot.slane %v3102_v0, %v9202_v41 }
 0x5d9   : > { %6985 = vmatprep.mubr.f32.mxu0 %v3026_v14  ;;  %v10750_v14 = vcombine.low %v9208_v42, %v9214_v58  ;;  %v10753_v42 = vcombine.high %v9225_v39, %v9231_v37  ;;  %v3033_v39 = vcombine.high %v2997_v20, %v3025_v6 }
 0x5da   : > { %v9556_v19 = vpop.f32.mrf.mxu0  ;;  %v9558_v10 = vpop.f32.mrf.mxu1  ;;  %6986 = vmatmul.mubr.f32.vlgmr.msra.gmra.mxu0 %v3030_v31  ;;  %v3174_v31 = vcombine.low %v9528_v35, %v9533_v54  ;;  %v9590_v2 = vrot.slane %v10752_v50, %v9202_v41 }
 0x5db   : > { %10746 = vst [vmem:[#allocation62_spill] sm:$0xff] %v9556_v19  ;;  %10747 = vst [vmem:[#allocation63_spill] sm:$0xff] %v9558_v10  ;;  %6988 = vmatprep.mubr.f32.mxu0 %v3027_v48  ;;  %v2983_v11 = vrot.slane %v10750_v14, %v9202_v41  ;;  %v3176_v48 = vcombine.low %v9530_v30, %v9535_v36  ;;  %v9599_v58 = vrot.slane %v10753_v42, %v9202_v41 }
 0x5dc   : > { %v9567_v60 = vpop.f32.mrf.mxu0  ;;  %v9569_v57 = vpop.f32.mrf.mxu1  ;;  %v3105_v14 = vcombine.high %v9562_v55, %v9565_v15  ;;  %v3162_v37 = vcombine.low %v9590_v2, %v9593_v21  ;;  %v3154_v55 = vrot.slane %v3103_v56, %v9202_v41 }
 0x5dd   : > { %10748 = vst [vmem:[#allocation64_spill] sm:$0xff] %v9567_v60  ;;  %10749 = vst [vmem:[#allocation65_spill] sm:$0xff] %v9569_v57  ;;  %v3028_v32 = vcombine.low %v2983_v11, %v3011_v61  ;;  %v3029_v53 = vcombine.high %v2983_v11, %v3011_v61  ;;  %v9607_v27 = vrot.slane %v3176_v48, %v9202_v41 }
 0x5de   : > { %v2544_v51 = vpop.f32.mrf.mxu0  ;;  %v2705_v33 = vpop.f32.mrf.mxu1  ;;  %6989 = vmatmul.mubr.f32.gmra.mxu0 %v3031_v38  ;;  %v9604_v38 = vrot.slane %v3174_v31, %v9202_v41 }
 0x5df   : > { %6991 = vmatprep.mubr.f32.mxu0 %v3028_v32  ;;  %v3032_v32 = vcombine.low %v2997_v20, %v3025_v6 }
 0x5e0   : > { %v2546_v44 = vpop.f32.mrf.mxu0  ;;  %v2707_v62 = vpop.f32.mrf.mxu1 }
 0x5e1   : > { %v3582_v10 = vcombine.low %v2544_v51, %v2546_v44  ;;  %v3583_v50 = vcombine.high %v2544_v51, %v2546_v44  ;;  %v3584_v57 = vcombine.low %v2705_v33, %v2707_v62  ;;  %v3585_v19 = vcombine.high %v2705_v33, %v2707_v62 }
 0x5e2   : > { %v2550_v0 = vpop.f32.mrf.mxu0  ;;  %v2711_v60 = vpop.f32.mrf.mxu1  ;;  %6992 = vmatmul.mubr.f32.gmra.mxu0 %v3032_v32 }
 0x5e3   : > { %v9613_v15 = vrot.slane %v3582_v10, %v9202_v41  ;;  %v9616_v61 = vrot.slane %v3583_v50, %v9202_v41  ;;  %v9619_v11 = vrot.slane %v3584_v57, %v9202_v41  ;;  %v9622_v31 = vrot.slane %v3585_v19, %v9202_v41  ;;  %6994 = vmatprep.mubr.f32.mxu0 %v3029_v53 }
 0x5e4   : > { %v2552_v51 = vpop.f32.mrf.mxu0  ;;  %v2713_v6 = vpop.f32.mrf.mxu1  ;;  %v3163_v19 = vcombine.high %v9590_v2, %v9593_v21  ;;  %v3161_v57 = vrot.slane %v3105_v14, %v9202_v41  ;;  %v3167_v14 = vcombine.high %v9599_v58, %v3154_v55 }
 0x5e5   : > { %10754 = vst [vmem:[#allocation66_spill] sm:$0xff] %v9622_v31  ;;  %v3718_v33 = vcombine.low %v2550_v0, %v2552_v51  ;;  %v3719_v48 = vcombine.high %v2550_v0, %v2552_v51  ;;  %v3720_v20 = vcombine.low %v2711_v60, %v2713_v6  ;;  %v3721_v44 = vcombine.high %v2711_v60, %v2713_v6 }
 0x5e6   : > { %v2556_v62 = vpop.f32.mrf.mxu0  ;;  %v2717_v42 = vpop.f32.mrf.mxu1  ;;  %6995 = vmatmul.mubr.f32.gmra.mxu0 %v3033_v39  ;;  %v3166_v6 = vcombine.low %v9599_v58, %v3154_v55  ;;  %v10758_v58 = vcombine.high %v9228_v12, %v9234_v26 }
 0x5e7   : > { %v9633_v32 = vrot.slane %v3718_v33, %v9202_v41  ;;  %v9636_v53 = vrot.slane %v3719_v48, %v9202_v41  ;;  %v9639_v60 = vrot.slane %v3720_v20, %v9202_v41  ;;  %v9642_v50 = vrot.slane %v3721_v44, %v9202_v41  ;;  %6997 = vmatprep.mubr.f32.mxu0 %v3162_v37 }
 0x5e8   : > { %v2558_v0 = vpop.f32.mrf.mxu0  ;;  %v2719_v51 = vpop.f32.mrf.mxu1  ;;  %v10755_v33 = vcombine.low %v9228_v12, %v9234_v26  ;;  %v3147_v20 = vrot.slane %v3104_v17, %v9202_v41  ;;  %v3175_v17 = vcombine.high %v9528_v35, %v9533_v54  ;;  %v3177_v44 = vcombine.high %v9530_v30, %v9535_v36 }
 0x5e9   : > { %v3854_v2 = vcombine.low %v2556_v62, %v2558_v0  ;;  %v3855_v21 = vcombine.high %v2556_v62, %v2558_v0  ;;  %v3856_v56 = vcombine.low %v2717_v42, %v2719_v51  ;;  %v3857_v10 = vcombine.high %v2717_v42, %v2719_v51 }
 0x5ea   : > { %v3119_v48 = vrot.slane %v10755_v33, %v9202_v41  ;;  %v9660_v31 = vpop.f32.mrf.mxu0  ;;  %v9662_v33 = vpop.f32.mrf.mxu1  ;;  %v3238_v37 = vcombine.low %v9604_v38, %v9607_v27  ;;  %6998 = vmatmul.mubr.f32.gmra.mxu0 %v3166_v6  ;;  %v3133_v55 = vrot.slane %v10758_v58, %v9202_v41  ;;  %v9713_v12 = vrot.slane %v3175_v17, %v9202_v41 }
 0x5eb   : > { %v9672_v62 = vrot.slane %v3854_v2, %v9202_v41  ;;  %v9675_v42 = vrot.slane %v3855_v21, %v9202_v41  ;;  %v9678_v0 = vrot.slane %v3856_v56, %v9202_v41  ;;  %v9681_v54 = vrot.slane %v3857_v10, %v9202_v41  ;;  %7000 = vmatprep.mubr.f32.mxu0 %v3163_v19 }
 0x5ec   : > { %v2564_v35 = vpop.f32.mrf.mxu0  ;;  %v2725_v30 = vpop.f32.mrf.mxu1  ;;  %v3164_v6 = vcombine.low %v3119_v48, %v3147_v20  ;;  %v10759_v2 = vcombine.low %v9245_v16, %v9251_v4  ;;  %v10760_v10 = vcombine.high %v9245_v16, %v9251_v4  ;;  %v9716_v26 = vrot.slane %v3177_v44, %v9202_v41 }
 0x5ed   : > { %10756 = vst [vmem:[#allocation67_spill] sm:$0xff] %v9675_v42  ;;  %10757 = vst [vmem:[#allocation68_spill] sm:$0xff] %v9681_v54  ;;  %v3990_v36 = vcombine.low %v9660_v31, %v2564_v35  ;;  %v3992_v51 = vcombine.low %v9662_v33, %v2725_v30  ;;  %v3168_v54 = vcombine.low %v3133_v55, %v3161_v57 }
 0x5ee   : > { %7001 = vmatmul.mubr.f32.gmra.mxu0 %v3167_v14  ;;  %v3248_v56 = vrot.slane %v10759_v2, %v9202_v41  ;;  %v9708_v19 = vrot.slane %v10760_v10, %v9202_v41  ;;  %v3276_v2 = vrot.slane %v3238_v37, %v9202_v41  ;;  %v10761_v16 = vcombine.low %v9248_v1, %v9254_v13 }
 0x5ef   : > { %v4028_v21 = vrot.slane %v3990_v36, %v9202_v41  ;;  %v4042_v39 = vrot.slane %v3992_v51, %v9202_v41  ;;  %7003 = vmatprep.mubr.f32.mxu0 %v3164_v6  ;;  %v3239_v36 = vcombine.high %v9604_v38, %v9607_v27  ;;  %v3165_v6 = vcombine.high %v3119_v48, %v3147_v20 }
 0x5f0   : > { %v9726_v4 = vrot.slane %v10761_v16, %v9202_v41  ;;  %v10762_v27 = vcombine.high %v9248_v1, %v9254_v13  ;;  %v10763_v48 = vcombine.low %v9265_v52, %v9271_v18  ;;  %v3991_v44 = vcombine.high %v9660_v31, %v2564_v35 }
 0x5f1   : > { %v4054_v51 = vcombine.low %v4028_v21, %v4042_v39  ;;  %v4055_v14 = vcombine.high %v4028_v21, %v4042_v39  ;;  %v3993_v39 = vcombine.high %v9662_v33, %v2725_v30  ;;  %v10764_v17 = vcombine.high %v9265_v52, %v9271_v18  ;;  %v9762_v52 = vpop.f32.mrf.mxu0  ;;  %v9764_v18 = vpop.f32.mrf.mxu1 }
 0x5f2   : > { %7004 = vmatmul.mubr.f32.gmra.mxu0 %v3168_v54  ;;  %v9732_v38 = vrot.slane %v10762_v27, %v9202_v41  ;;  %v9738_v20 = vrot.slane %v10763_v48, %v9202_v41  ;;  %v10765_v13 = vcombine.high %v9365_v45, %v9371_v28  ;;  %v3169_v10 = vcombine.high %v3133_v55, %v3161_v57 }
 0x5f3   : > { %v9720_v58 = vrot.slane %v4055_v14, %v9202_v41  ;;  %7006 = vmatprep.mubr.f32.mxu0 %v3165_v6  ;;  %v4092_v37 = vrot.slane %v4054_v51, %v9202_v41  ;;  %v9747_v1 = vrot.slane %v10764_v17, %v9202_v41  ;;  %v3290_v21 = vrot.slane %v3239_v36, %v9202_v41 }
 0x5f4   : > { %v4078_v54 = vrot.slane %v10765_v13, %v9202_v41  ;;  %v10766_v31 = vcombine.low %v9268_v40, %v9274_v29  ;;  %v3240_v35 = vcombine.low %v9713_v12, %v9716_v26  ;;  %v3298_v30 = vcombine.low %v3248_v56, %v3276_v2 }
 0x5f5   : > { %v10767_v57 = vcombine.low %v9365_v45, %v9371_v28  ;;  %v10768_v36 = vcombine.high %v9268_v40, %v9274_v29  ;;  %v10769_v6 = vcombine.low %v9285_v7, %v9291_v3  ;;  %v10770_v45 = vcombine.high %v9285_v7, %v9291_v3 }
 0x5f6   : > { %v9758_v33 = vrot.slane %v10766_v31, %v9202_v41  ;;  %v4118_v14 = vcombine.low %v4078_v54, %v9720_v58  ;;  %7007 = vmatmul.mubr.f32.gmra.mxu0 %v3169_v10  ;;  %v10771_v40 = vcombine.low %v9288_v49, %v9294_v47  ;;  %v4035_v27 = vrot.slane %v3991_v44, %v9202_v41 }
 0x5f7   : > { %v4064_v55 = vrot.slane %v10767_v57, %v9202_v41  ;;  %v9774_v51 = vrot.slane %v10768_v36, %v9202_v41  ;;  %v9781_v16 = vrot.slane %v10769_v6, %v9202_v41  ;;  %v9787_v28 = vrot.slane %v10770_v45, %v9202_v41  ;;  %7009 = vmatprep.mubr.f32.mxu0 %v3298_v30  ;;  %v9822_v30 = vpop.f32.mrf.mxu0  ;;  %v9824_v57 = vpop.f32.mrf.mxu1 }
 0x5f8   : > { %v9793_v29 = vrot.slane %v10771_v40, %v9202_v41  ;;  %v4049_v48 = vrot.slane %v3993_v39, %v9202_v41  ;;  %v10772_v13 = vcombine.high %v9288_v49, %v9294_v47  ;;  %v3302_v7 = vcombine.low %v9708_v19, %v3290_v21 }
 0x5f9   : > { %v4114_v17 = vcombine.low %v4064_v55, %v4092_v37  ;;  %v10773_v3 = vcombine.low %v9305_v23, %v9311_v34  ;;  %v10774_v44 = vcombine.high %v9305_v23, %v9311_v34  ;;  %v10775_v49 = vcombine.low %v9308_v59, %v9314_v43 }
 0x5fa   : > { %v9801_v10 = vrot.slane %v10772_v13, %v9202_v41  ;;  %v3299_v36 = vcombine.high %v3248_v56, %v3276_v2  ;;  %v4115_v6 = vcombine.high %v4064_v55, %v4092_v37  ;;  %v3283_v45 = vrot.slane %v3240_v35, %v9202_v41  ;;  %7010 = vmatmul.mubr.f32.gmra.mxu0 %v3302_v7 }
 0x5fb   : > { %v9808_v31 = vrot.slane %v10773_v3, %v9202_v41  ;;  %v9814_v39 = vrot.slane %v10774_v44, %v9202_v41  ;;  %v9820_v47 = vrot.slane %v10775_v49, %v9202_v41  ;;  %7081 = vmatprep.mubr.f32.mxu1 %v4114_v17  ;;  %v10776_v23 = vcombine.high %v9308_v59, %v9314_v43  ;;  %v10781_v3 = vld [vmem:[#allocation32_spill] sm:$0xff] }
 0x5fc   : > { %v3310_v40 = vcombine.low %v9542_v9, %v9552_v46  ;;  %7082 = vmatmul.mubr.f32.vlgmr.msra.gmra.mxu1 %v4118_v14  ;;  %v10777_v13 = vcombine.low %v9325_v25, %v9331_v63  ;;  %v10778_v56 = vcombine.high %v9325_v25, %v9331_v63  ;;  %v3241_v59 = vcombine.high %v9713_v12, %v9716_v26  ;;  %v10785_v49 = vld [vmem:[#allocation28_spill] sm:$0xff] }
 0x5fd   : > { %v9831_v34 = vrot.slane %v10776_v23, %v9202_v41  ;;  %v4056_v43 = vcombine.low %v4035_v27, %v4049_v48  ;;  %v4057_v37 = vcombine.high %v4035_v27, %v4049_v48  ;;  %7012 = vmatprep.mubr.f32.mxu0 %v3299_v36  ;;  %7084 = vmatprep.mubr.f32.mxu1 %v4115_v6  ;;  %v10786_v36 = vld [vmem:[#allocation30_spill] sm:$0xff] }
 0x5fe   : > { %v9839_v17 = vrot.slane %v10777_v13, %v9202_v41  ;;  %v9845_v2 = vrot.slane %v10778_v56, %v9202_v41  ;;  %v3312_v35 = vcombine.low %v9544_v5, %v9554_v22  ;;  %v4126_v55 = vcombine.low %v9762_v52, %v9822_v30 }
 0x5ff   : > { %v4128_v14 = vcombine.low %v9764_v18, %v9824_v57  ;;  %v3303_v25 = vcombine.high %v9708_v19, %v3290_v21  ;;  %v4119_v63 = vcombine.high %v4078_v54, %v9720_v58  ;;  %v3300_v7 = vcombine.low %v9726_v4, %v3283_v45  ;;  %v10782_v19 = vld [vmem:[#allocation33_spill] sm:$0xff] }
 0x600   : > { %v10779_v12 = vcombine.low %v9328_v8, %v9334_v24  ;;  %v10780_v27 = vcombine.high %v9328_v8, %v9334_v24  ;;  %v10783_v21 = vcombine.low %v10781_v3, %v10782_v19  ;;  %v10784_v54 = vcombine.high %v10781_v3, %v10782_v19 }
 0x601   : > { %7013 = vmatmul.mubr.f32.gmra.mxu0 %v3303_v25  ;;  %v10787_v6 = vcombine.low %v10785_v49, %v10786_v36  ;;  %v10789_v8 = vcombine.high %v10785_v49, %v10786_v36  ;;  %7085 = vmatmul.mubr.f32.gmra.mxu1 %v4119_v63  ;;  %v4099_v13 = vrot.slane %v4056_v43, %v9202_v41  ;;  %v10792_v49 = vld [vmem:[#allocation36_spill] sm:$0xff]  ;;  %v10794_v43 = vld [vmem:[#allocation29_spill] sm:$0xff] }
 0x602   : > { %v9862_v26 = vrot.slane %v10779_v12, %v9202_v41  ;;  %v9868_v48 = vrot.slane %v10780_v27, %v9202_v41  ;;  %v4071_v58 = vrot.slane %v10783_v21, %v9202_v41  ;;  %v4085_v44 = vrot.slane %v10784_v54, %v9202_v41  ;;  %7015 = vmatprep.mubr.f32.mxu0 %v3300_v7  ;;  %v10791_v54 = vld [vmem:[#allocation34_spill] sm:$0xff] }
 0x603   : > { %v9882_v23 = vrot.slane %v10787_v6, %v9202_v41  ;;  %v9888_v24 = vrot.slane %v10789_v8, %v9202_v41  ;;  %v3297_v56 = vrot.slane %v3241_v59, %v9202_v41  ;;  %v4113_v25 = vrot.slane %v4057_v37, %v9202_v41  ;;  %v10795_v59 = vld [vmem:[#allocation31_spill] sm:$0xff] }
 0x604   : > { %v3348_v12 = vrot.slane %v3310_v40, %v9202_v41  ;;  %v3362_v27 = vrot.slane %v3312_v35, %v9202_v41  ;;  %v4164_v3 = vrot.slane %v4126_v55, %v9202_v41  ;;  %v4178_v19 = vrot.slane %v4128_v14, %v9202_v41 }
 0x605   : > { %10788 = vst [vmem:[#allocation32_spill] sm:$0xff] %v9882_v23  ;;  %10790 = vst [vmem:[#allocation33_spill] sm:$0xff] %v9888_v24  ;;  %v4116_v21 = vcombine.low %v4071_v58, %v4099_v13  ;;  %v10793_v63 = vcombine.low %v10791_v54, %v10792_v49  ;;  %v10796_v36 = vcombine.low %v10794_v43, %v10795_v59 }
 0x606   : > { %v10798_v40 = vcombine.high %v10794_v43, %v10795_v59  ;;  %v3311_v55 = vcombine.high %v9542_v9, %v9552_v46  ;;  %v3313_v14 = vcombine.high %v9544_v5, %v9554_v22  ;;  %v3304_v6 = vcombine.low %v9732_v38, %v3297_v56 }
 0x607   : > { %v9901_v7 = vrot.slane %v10793_v63, %v9202_v41  ;;  %v9907_v37 = vrot.slane %v10796_v36, %v9202_v41  ;;  %v4120_v8 = vcombine.low %v4085_v44, %v4113_v25  ;;  %v4127_v63 = vcombine.high %v9762_v52, %v9822_v30  ;;  %v9922_v36 = vpop.f32.mrf.mxu0  ;;  %7087 = vmatprep.mubr.f32.mxu1 %v4116_v21  ;;  %v10802_v52 = vld [vmem:[#allocation37_spill] sm:$0xff] }
 0x608   : > { %v9913_v35 = vrot.slane %v10798_v40, %v9202_v41  ;;  %v4117_v43 = vcombine.high %v4071_v58, %v4099_v13  ;;  %v10800_v59 = vcombine.high %v10791_v54, %v10792_v49  ;;  %v3374_v9 = vcombine.low %v3348_v12, %v3362_v27  ;;  %v9933_v40 = vpop.f32.mrf.mxu1  ;;  %7016 = vmatmul.mubr.f32.gmra.mxu0 %v3304_v6  ;;  %v10808_v6 = vld [vmem:[#allocation64_spill] sm:$0xff] }
 0x609   : > { %10797 = vst [vmem:[#allocation28_spill] sm:$0xff] %v9907_v37  ;;  %v3301_v37 = vcombine.high %v9726_v4, %v3283_v45  ;;  %v4129_v5 = vcombine.high %v9764_v18, %v9824_v57  ;;  %v4190_v22 = vcombine.low %v4164_v3, %v4178_v19  ;;  %7088 = vmatmul.mubr.f32.gmra.mxu1 %v4120_v8  ;;  %v10801_v4 = vld [vmem:[#allocation35_spill] sm:$0xff]  ;;  %v10805_v18 = vld [vmem:[#allocation38_spill] sm:$0xff]  ;;  %v10806_v57 = vld [vmem:[#allocation40_spill] sm:$0xff] }
 0x60a   : > { %10799 = vst [vmem:[#allocation30_spill] sm:$0xff] %v9913_v35  ;;  %v9929_v46 = vrot.slane %v10800_v59, %v9202_v41  ;;  %7090 = vmatprep.mubr.f32.mxu1 %v4117_v43  ;;  %v10803_v30 = vcombine.low %v10801_v4, %v10802_v52  ;;  %v10804_v58 = vcombine.high %v10801_v4, %v10802_v52  ;;  %v10809_v8 = vld [vmem:[#allocation62_spill] sm:$0xff] }
 0x60b   : > { %7018 = vmatprep.mubr.f32.mxu0 %v3301_v37  ;;  %v10807_v21 = vcombine.low %v10805_v18, %v10806_v57  ;;  %v3355_v49 = vrot.slane %v3311_v55, %v9202_v41  ;;  %v3369_v37 = vrot.slane %v3313_v14, %v9202_v41  ;;  %v3446_v43 = vcombine.low %v10809_v8, %v10808_v6  ;;  %v2737_v14 = vpop.f32.mrf.mxu1 }
 0x60c   : > { %v9939_v45 = vrot.slane %v10803_v30, %v9202_v41  ;;  %v9945_v13 = vrot.slane %v10804_v58, %v9202_v41  ;;  %v10810_v59 = vcombine.high %v10805_v18, %v10806_v57  ;;  %v3375_v52 = vcombine.high %v3348_v12, %v3362_v27  ;;  %v2576_v58 = vpop.f32.mrf.mxu0  ;;  %v10811_v57 = vld [vmem:[#allocation65_spill] sm:$0xff] }
 0x60d   : > { %v9951_v54 = vrot.slane %v10807_v21, %v9202_v41  ;;  %v4171_v30 = vrot.slane %v4127_v63, %v9202_v41  ;;  %v3305_v21 = vcombine.high %v9732_v38, %v3297_v56  ;;  %v4121_v35 = vcombine.high %v4085_v44, %v4113_v25  ;;  %v10813_v25 = vld [vmem:[#allocation39_spill] sm:$0xff] }
 0x60e   : > { %v9961_v4 = vrot.slane %v10810_v59, %v9202_v41  ;;  %v4185_v55 = vrot.slane %v4129_v5, %v9202_v41  ;;  %v4191_v24 = vcombine.high %v4164_v3, %v4178_v19  ;;  %v3412_v23 = vrot.slane %v3374_v9, %v9202_v41  ;;  %v10812_v59 = vld [vmem:[#allocation63_spill] sm:$0xff]  ;;  %v10814_v3 = vld [vmem:[#allocation41_spill] sm:$0xff] }
 0x60f   : > { %v4228_v42 = vrot.slane %v4190_v22, %v9202_v41  ;;  %v3447_v18 = vcombine.high %v10809_v8, %v10808_v6  ;;  %v3448_v12 = vcombine.low %v10812_v59, %v10811_v57  ;;  %v3449_v27 = vcombine.high %v10812_v59, %v10811_v57  ;;  %7019 = vmatmul.mubr.f32.gmra.mxu0 %v3305_v21 }
 0x610   : > { %7091 = vmatmul.mubr.f32.gmra.mxu1 %v4121_v35  ;;  %v4262_v38 = vcombine.low %v9922_v36, %v2576_v58  ;;  %v3434_v44 = vcombine.low %v9738_v20, %v3412_v23  ;;  %v10815_v19 = vcombine.low %v10813_v25, %v10814_v3  ;;  %v3376_v9 = vcombine.low %v3355_v49, %v3369_v37 }
 0x611   : > { %v4250_v56 = vcombine.low %v9901_v7, %v4228_v42  ;;  %v3377_v5 = vcombine.high %v3355_v49, %v3369_v37  ;;  %v4264_v22 = vcombine.low %v9933_v40, %v2737_v14  ;;  %v10816_v35 = vcombine.high %v10813_v25, %v10814_v3 }
 0x612   : > { %v9981_v63 = vrot.slane %v10815_v19, %v9202_v41  ;;  %v4192_v8 = vcombine.low %v4171_v30, %v4185_v55  ;;  %7021 = vmatprep.mubr.f32.mxu0 %v3434_v44  ;;  %v3426_v21 = vrot.slane %v3375_v52, %v9202_v41  ;;  %v4242_v57 = vrot.slane %v4191_v24, %v9202_v41 }
 0x613   : > { %v9988_v6 = vrot.slane %v10816_v35, %v9202_v41  ;;  %7093 = vmatprep.mubr.f32.mxu1 %v4250_v56  ;;  %v9993_v59 = vrot.slane %v3446_v43, %v9202_v41  ;;  %v9996_v49 = vrot.slane %v3447_v18, %v9202_v41  ;;  %v9999_v37 = vrot.slane %v3448_v12, %v9202_v41  ;;  %v2580_v56 = vpop.f32.mrf.mxu0 }
 0x614   : > { %v10002_v25 = vrot.slane %v3449_v27, %v9202_v41  ;;  %v4193_v3 = vcombine.high %v4171_v30, %v4185_v55  ;;  %v4300_v44 = vrot.slane %v4262_v38, %v9202_v41  ;;  %v3438_v52 = vcombine.low %v9747_v1, %v3426_v21 }
 0x615   : > { %v4254_v24 = vcombine.low %v9929_v46, %v4242_v57  ;;  %v4314_v43 = vrot.slane %v4264_v22, %v9202_v41  ;;  %v3435_v19 = vcombine.high %v9738_v20, %v3412_v23  ;;  %v4251_v18 = vcombine.high %v9901_v7, %v4228_v42  ;;  %v10020_v42 = vpop.f32.mrf.mxu1  ;;  %v2582_v23 = vpop.f32.mrf.mxu0 }
 0x616   : > { %v3419_v12 = vrot.slane %v3376_v9, %v9202_v41  ;;  %v4263_v35 = vcombine.high %v9922_v36, %v2576_v58  ;;  %v4265_v27 = vcombine.high %v9933_v40, %v2737_v14  ;;  %7022 = vmatmul.mubr.f32.gmra.mxu0 %v3438_v52  ;;  %v4235_v30 = vrot.slane %v4192_v8, %v9202_v41 }
 0x617   : > { %7094 = vmatmul.mubr.f32.gmra.mxu1 %v4254_v24  ;;  %v3510_v55 = vcombine.low %v9993_v59, %v9999_v37  ;;  %v3511_v38 = vcombine.high %v9993_v59, %v9999_v37  ;;  %v3512_v20 = vcombine.low %v9996_v49, %v10002_v25  ;;  %7024 = vmatprep.mubr.f32.mxu0 %v3435_v19  ;;  %v10054_v24 = vpop.f32.mrf.mxu1 }
 0x618   : > { %7096 = vmatprep.mubr.f32.mxu1 %v4251_v18  ;;  %v3439_v7 = vcombine.high %v9747_v1, %v3426_v21  ;;  %v4255_v36 = vcombine.high %v9929_v46, %v4242_v57  ;;  %v3433_v40 = vrot.slane %v3377_v5, %v9202_v41  ;;  %v4249_v58 = vrot.slane %v4193_v3, %v9202_v41 }
 0x619   : > { %v3513_v14 = vcombine.high %v9996_v49, %v10002_v25  ;;  %v4326_v9 = vcombine.low %v4300_v44, %v4314_v43  ;;  %v3436_v22 = vcombine.low %v9758_v33, %v3419_v12  ;;  %v4252_v8 = vcombine.low %v9939_v45, %v4235_v30 }
 0x61a   : > { %v10817_v59 = vcombine.high %v9633_v32, %v9639_v60  ;;  %v10037_v1 = vrot.slane %v4263_v35, %v9202_v41  ;;  %v10040_v46 = vrot.slane %v4265_v27, %v9202_v41  ;;  %7025 = vmatmul.mubr.f32.gmra.mxu0 %v3439_v7  ;;  %v10818_v5 = vcombine.high %v9636_v53, %v9642_v50 }
 0x61b   : > { %7097 = vmatmul.mubr.f32.gmra.mxu1 %v4255_v36  ;;  %v10819_v57 = vcombine.high %v9672_v62, %v9678_v0  ;;  %v4398_v52 = vcombine.low %v2580_v56, %v2582_v23  ;;  %7027 = vmatprep.mubr.f32.mxu0 %v3436_v22  ;;  %v4327_v19 = vcombine.high %v4300_v44, %v4314_v43 }
 0x61c   : > { %v10034_v37 = vrot.slane %v10817_v59, %v9202_v41  ;;  %v10046_v21 = vrot.slane %v10818_v5, %v9202_v41  ;;  %7099 = vmatprep.mubr.f32.mxu1 %v4252_v8  ;;  %v4399_v18 = vcombine.high %v2580_v56, %v2582_v23  ;;  %v3440_v35 = vcombine.low %v9774_v51, %v3433_v40 }
 0x61d   : > { %v10052_v3 = vrot.slane %v10819_v57, %v9202_v41  ;;  %v4256_v27 = vcombine.low %v9945_v13, %v4249_v58  ;;  %v3437_v7 = vcombine.high %v9758_v33, %v3419_v12  ;;  %v4253_v36 = vcombine.high %v9939_v45, %v4235_v30 }
 0x61e   : > { %v3548_v59 = vrot.slane %v3510_v55, %v9202_v41  ;;  %v4364_v5 = vrot.slane %v4326_v9, %v9202_v41  ;;  %v4328_v57 = vcombine.low %v10037_v1, %v10040_v46  ;;  %v4400_v22 = vcombine.low %v10020_v42, %v10054_v24  ;;  %7028 = vmatmul.mubr.f32.gmra.mxu0 %v3440_v35 }
 0x61f   : > { %v4401_v44 = vcombine.high %v10020_v42, %v10054_v24  ;;  %7100 = vmatmul.mubr.f32.gmra.mxu1 %v4256_v27  ;;  %v4329_v33 = vcombine.high %v10037_v1, %v10040_v46  ;;  %v10071_v45 = vrot.slane %v4398_v52, %v9202_v41  ;;  %7030 = vmatprep.mubr.f32.mxu0 %v3437_v7  ;;  %v10822_v52 = vld [vmem:[#allocation66_spill] sm:$0xff] }
 0x620   : > { %7102 = vmatprep.mubr.f32.mxu1 %v4253_v36  ;;  %v10820_v56 = vcombine.low %v9613_v15, %v9619_v11  ;;  %v3441_v12 = vcombine.high %v9774_v51, %v3433_v40  ;;  %v4257_v30 = vcombine.high %v9945_v13, %v4249_v58  ;;  %v3562_v55 = vrot.slane %v3511_v38, %v9202_v41 }
 0x621   : > { %v4378_v42 = vrot.slane %v4327_v19, %v9202_v41  ;;  %v10084_v23 = vrot.slane %v4399_v18, %v9202_v41  ;;  %v3570_v9 = vcombine.low %v9781_v16, %v3548_v59  ;;  %v4386_v8 = vcombine.low %v9951_v54, %v4364_v5 }
 0x622   : > { %v10077_v43 = vrot.slane %v10820_v56, %v9202_v41  ;;  %v10091_v46 = vrot.slane %v4400_v22, %v9202_v41  ;;  %7031 = vmatmul.mubr.f32.gmra.mxu0 %v3441_v12  ;;  %v10821_v51 = vcombine.high %v9613_v15, %v9619_v11  ;;  %v3571_v40 = vcombine.high %v9781_v16, %v3548_v59  ;;  %v10138_v22 = vpop.f32.mrf.mxu0 }
 0x623   : > { %7103 = vmatmul.mubr.f32.gmra.mxu1 %v4257_v30  ;;  %7033 = vmatprep.mubr.f32.mxu0 %v3570_v9  ;;  %v4387_v58 = vcombine.high %v9951_v54, %v4364_v5  ;;  %v10823_v24 = vcombine.low %v9616_v61, %v10822_v52  ;;  %v3574_v18 = vcombine.low %v9787_v28, %v3562_v55 }
 0x624   : > { %v3706_v1 = vcombine.low %v9808_v31, %v10077_v43  ;;  %v10097_v13 = vrot.slane %v10821_v51, %v9202_v41  ;;  %v3707_v38 = vcombine.high %v9808_v31, %v10077_v43  ;;  %7105 = vmatprep.mubr.f32.mxu1 %v4386_v8  ;;  %v4390_v15 = vcombine.low %v9961_v4, %v4378_v42 }
 0x625   : > { %v10107_v19 = vrot.slane %v10823_v24, %v9202_v41  ;;  %v3555_v16 = vrot.slane %v3512_v20, %v9202_v41  ;;  %v4371_v54 = vrot.slane %v4328_v57, %v9202_v41  ;;  %v10824_v7 = vcombine.high %v9616_v61, %v10822_v52 }
 0x626   : > { %v3710_v11 = vcombine.low %v9814_v39, %v10097_v13  ;;  %v3711_v35 = vcombine.high %v9814_v39, %v10097_v13  ;;  %v4462_v59 = vcombine.low %v10071_v45, %v10091_v46  ;;  %7034 = vmatmul.mubr.f32.gmra.mxu0 %v3574_v18  ;;  %v10825_v20 = vcombine.low %v9633_v32, %v9639_v60 }
 0x627   : > { %v3708_v27 = vcombine.low %v9820_v47, %v10107_v19  ;;  %v10126_v36 = vrot.slane %v10824_v7, %v9202_v41  ;;  %7106 = vmatmul.mubr.f32.gmra.mxu1 %v4390_v15  ;;  %v3709_v5 = vcombine.high %v9820_v47, %v10107_v19  ;;  %7036 = vmatprep.mubr.f32.mxu0 %v3571_v40  ;;  %v10172_v40 = vpop.f32.mrf.mxu0  ;;  %v10829_v7 = vld [vmem:[#allocation68_spill] sm:$0xff] }
 0x628   : > { %v10136_v57 = vrot.slane %v10825_v20, %v9202_v41  ;;  %7108 = vmatprep.mubr.f32.mxu1 %v4387_v58  ;;  %v3575_v61 = vcombine.high %v9787_v28, %v3562_v55  ;;  %v3569_v56 = vrot.slane %v3513_v14, %v9202_v41  ;;  %v4391_v30 = vcombine.high %v9961_v4, %v4378_v42  ;;  %v10160_v14 = vpop.f32.mrf.mxu1 }
 0x629   : > { %v3712_v12 = vcombine.low %v9831_v34, %v10126_v36  ;;  %v4385_v32 = vrot.slane %v4329_v33, %v9202_v41  ;;  %v3713_v60 = vcombine.high %v9831_v34, %v10126_v36  ;;  %v3572_v28 = vcombine.low %v9793_v29, %v3555_v16  ;;  %v10848_v36 = vld [vmem:[#allocation47_spill] sm:$0xff] }
 0x62a   : > { %v3842_v9 = vcombine.low %v9839_v17, %v10136_v57  ;;  %v4388_v55 = vcombine.low %v9981_v63, %v4371_v54  ;;  %v3846_v49 = vcombine.low %v9845_v2, %v10034_v37  ;;  %v3843_v25 = vcombine.high %v9839_v17, %v10136_v57  ;;  %7037 = vmatmul.mubr.f32.gmra.mxu0 %v3575_v61 }
 0x62b   : > { %v4457_v4 = vrot.slane %v4401_v44, %v9202_v41  ;;  %7109 = vmatmul.mubr.f32.gmra.mxu1 %v4391_v30  ;;  %v3847_v33 = vcombine.high %v9845_v2, %v10034_v37  ;;  %v10826_v42 = vcombine.low %v9636_v53, %v9642_v50  ;;  %v4463_v51 = vcombine.high %v10071_v45, %v10091_v46  ;;  %v10832_v30 = vld [vmem:[#allocation44_spill] sm:$0xff] }
 0x62c   : > { %7039 = vmatprep.mubr.f32.mxu0 %v3572_v28  ;;  %7111 = vmatprep.mubr.f32.mxu1 %v4388_v55  ;;  %v3576_v44 = vcombine.low %v9801_v10, %v3569_v56  ;;  %v3573_v58 = vcombine.high %v9793_v29, %v3555_v16  ;;  %v4392_v52 = vcombine.low %v9988_v6, %v4385_v32  ;;  %v10828_v16 = vld [vmem:[#allocation67_spill] sm:$0xff] }
 0x62d   : > { %v10168_v8 = vrot.slane %v10826_v42, %v9202_v41  ;;  %v3848_v53 = vcombine.low %v9868_v48, %v10046_v21  ;;  %v4389_v45 = vcombine.high %v9981_v63, %v4371_v54  ;;  %v4500_v46 = vrot.slane %v4462_v59, %v9202_v41  ;;  %v2749_v54 = vpop.f32.mrf.mxu1  ;;  %v10831_v59 = vld [vmem:[#allocation42_spill] sm:$0xff] }
 0x62e   : > { %v10827_v29 = vcombine.low %v9672_v62, %v9678_v0  ;;  %v10830_v20 = vcombine.high %v10828_v16, %v10829_v7  ;;  %v4534_v63 = vcombine.low %v10138_v22, %v10172_v40  ;;  %7040 = vmatmul.mubr.f32.gmra.mxu0 %v3576_v44  ;;  %v10833_v28 = vcombine.low %v10831_v59, %v10832_v30  ;;  %v10834_v0 = vld [vmem:[#allocation32_spill] sm:$0xff] }
 0x62f   : > { %v3844_v24 = vcombine.low %v9862_v26, %v10168_v8  ;;  %v3845_v50 = vcombine.high %v9862_v26, %v10168_v8  ;;  %7112 = vmatmul.mubr.f32.gmra.mxu1 %v4392_v52  ;;  %7042 = vmatprep.mubr.f32.mxu0 %v3573_v58  ;;  %v3577_v62 = vcombine.high %v9801_v10, %v3569_v56 }
 0x630   : > { %v10191_v15 = vrot.slane %v10827_v29, %v9202_v41  ;;  %v10197_v61 = vrot.slane %v10830_v20, %v9202_v41  ;;  %v4472_v55 = vrot.slane %v10833_v28, %v9202_v41  ;;  %7114 = vmatprep.mubr.f32.mxu1 %v4389_v45  ;;  %v10835_v29 = vld [vmem:[#allocation33_spill] sm:$0xff]  ;;  %v4393_v18 = vcombine.high %v9988_v6, %v4385_v32 }
 0x631   : > { %v4514_v44 = vrot.slane %v4463_v51, %v9202_v41  ;;  %v4464_v58 = vcombine.low %v10084_v23, %v4457_v4  ;;  %v4536_v10 = vcombine.low %v10160_v14, %v2749_v54  ;;  %v10836_v45 = vcombine.low %v10828_v16, %v10829_v7  ;;  %v10838_v51 = vld [vmem:[#allocation30_spill] sm:$0xff]  ;;  %v10839_v16 = vld [vmem:[#allocation28_spill] sm:$0xff] }
 0x632   : > { %v3978_v42 = vcombine.low %v10834_v0, %v10191_v15  ;;  %v4522_v56 = vcombine.low %v4472_v55, %v4500_v46  ;;  %7043 = vmatmul.mubr.f32.gmra.mxu0 %v3577_v62  ;;  %v10837_v6 = vcombine.high %v10831_v59, %v10832_v30  ;;  %v3984_v28 = vcombine.low %v10838_v51, %v10197_v61 }
 0x633   : > { %v10222_v20 = vrot.slane %v10836_v45, %v9202_v41  ;;  %7115 = vmatmul.mubr.f32.gmra.mxu1 %v4393_v18  ;;  %7045 = vmatprep.mubr.f32.mxu0 %v3706_v1  ;;  %v4465_v59 = vcombine.high %v10084_v23, %v4457_v4  ;;  %v4572_v62 = vrot.slane %v4534_v63, %v9202_v41  ;;  %v10840_v23 = vld [vmem:[#allocation43_spill] sm:$0xff]  ;;  %v10841_v1 = vld [vmem:[#allocation45_spill] sm:$0xff]  ;;  %v2753_v18 = vpop.f32.mrf.mxu1 }
 0x634   : > { %v4486_v32 = vrot.slane %v10837_v6, %v9202_v41  ;;  %7117 = vmatprep.mubr.f32.mxu1 %v4522_v56  ;;  %v4586_v45 = vrot.slane %v4536_v10, %v9202_v41  ;;  %v4523_v6 = vcombine.high %v4472_v55, %v4500_v46  ;;  %v4507_v52 = vrot.slane %v4464_v58, %v9202_v41 }
 0x635   : > { %v3980_v7 = vcombine.low %v10839_v16, %v10222_v20  ;;  %v10842_v4 = vcombine.low %v10840_v23, %v10841_v1  ;;  %v4521_v46 = vrot.slane %v4465_v59, %v9202_v41  ;;  %v4535_v55 = vcombine.high %v10138_v22, %v10172_v40 }
 0x636   : > { %v4526_v30 = vcombine.low %v4486_v32, %v4514_v44  ;;  %7046 = vmatmul.mubr.f32.gmra.mxu0 %v3710_v11  ;;  %v4527_v56 = vcombine.high %v4486_v32, %v4514_v44  ;;  %v4537_v58 = vcombine.high %v10160_v14, %v2749_v54  ;;  %v4598_v11 = vcombine.low %v4572_v62, %v4586_v45  ;;  %v10845_v44 = vld [vmem:[#allocation48_spill] sm:$0xff] }
 0x637   : > { %7048 = vmatprep.mubr.f32.mxu0 %v3707_v38  ;;  %v4479_v63 = vrot.slane %v10842_v4, %v9202_v41  ;;  %v10843_v31 = vcombine.high %v10840_v23, %v10841_v1  ;;  %v4599_v38 = vcombine.high %v4572_v62, %v4586_v45  ;;  %v4579_v14 = vrot.slane %v4535_v55, %v9202_v41 }
 0x638   : > { %7118 = vmatmul.mubr.f32.gmra.mxu1 %v4526_v30  ;;  %v2592_v30 = vpop.f32.mrf.mxu0  ;;  %v4593_v40 = vrot.slane %v4537_v58, %v9202_v41  ;;  %v4636_v39 = vrot.slane %v4598_v11, %v9202_v41 }
 0x639   : > { %7120 = vmatprep.mubr.f32.mxu1 %v4523_v6  ;;  %v4524_v10 = vcombine.low %v4479_v63, %v4507_v52  ;;  %v4493_v43 = vrot.slane %v10843_v31, %v9202_v41  ;;  %v4525_v54 = vcombine.high %v4479_v63, %v4507_v52  ;;  %v4650_v62 = vrot.slane %v4599_v38, %v9202_v41 }
 0x63a   : > { %7049 = vmatmul.mubr.f32.gmra.mxu0 %v3711_v35  ;;  %v2594_v13 = vpop.f32.mrf.mxu0  ;;  %v2755_v35 = vpop.f32.mrf.mxu1  ;;  %v4600_v45 = vcombine.low %v4579_v14, %v4593_v40 }
 0x63b   : > { %7051 = vmatprep.mubr.f32.mxu0 %v3708_v27  ;;  %v4528_v22 = vcombine.low %v4493_v43, %v4521_v46  ;;  %v10844_v27 = vld [vmem:[#allocation46_spill] sm:$0xff]  ;;  %v4529_v52 = vcombine.high %v4493_v43, %v4521_v46  ;;  %v4670_v6 = vcombine.low %v2592_v30, %v2594_v13  ;;  %v4672_v23 = vcombine.low %v2753_v18, %v2755_v35 }
 0x63c   : > { %7121 = vmatmul.mubr.f32.gmra.mxu1 %v4527_v56  ;;  %v10846_v32 = vcombine.low %v10844_v27, %v10845_v44  ;;  %v10847_v47 = vcombine.high %v10844_v27, %v10845_v44  ;;  %v4643_v34 = vrot.slane %v4600_v45, %v9202_v41  ;;  %v4671_v11 = vcombine.high %v2592_v30, %v2594_v13  ;;  %v2598_v38 = vpop.f32.mrf.mxu0 }
 0x63d   : > { %7123 = vmatprep.mubr.f32.mxu1 %v4524_v10  ;;  %v4708_v4 = vrot.slane %v4670_v6, %v9202_v41  ;;  %v4722_v63 = vrot.slane %v4672_v23, %v9202_v41  ;;  %v4673_v10 = vcombine.high %v2753_v18, %v2755_v35  ;;  %v10858_v23 = vcombine.high %v10834_v0, %v10191_v15 }
 0x63e   : > { %7052 = vmatmul.mubr.f32.gmra.mxu0 %v3712_v12  ;;  %v4608_v59 = vrot.slane %v10846_v32, %v9202_v41  ;;  %v4622_v19 = vrot.slane %v10847_v47, %v9202_v41  ;;  %v4715_v30 = vrot.slane %v4671_v11, %v9202_v41  ;;  %v2600_v37 = vpop.f32.mrf.mxu0 }
 0x63f   : > { %7054 = vmatprep.mubr.f32.mxu0 %v3709_v5  ;;  %v4601_v5 = vcombine.high %v4579_v14, %v4593_v40  ;;  %v4734_v31 = vcombine.low %v4708_v4, %v4722_v63  ;;  %v10853_v40 = vld [vmem:[#allocation52_spill] sm:$0xff]  ;;  %v4806_v44 = vcombine.low %v2598_v38, %v2600_v37 }
 0x640   : > { %7124 = vmatmul.mubr.f32.gmra.mxu1 %v4528_v22  ;;  %v4658_v1 = vcombine.low %v4608_v59, %v4636_v39  ;;  %v4662_v12 = vcombine.low %v4622_v19, %v4650_v62  ;;  %v4659_v56 = vcombine.high %v4608_v59, %v4636_v39  ;;  %v4663_v55 = vcombine.high %v4622_v19, %v4650_v62 }
 0x641   : > { %7126 = vmatprep.mubr.f32.mxu1 %v4525_v54  ;;  %v4657_v58 = vrot.slane %v4601_v5, %v9202_v41  ;;  %v4729_v22 = vrot.slane %v4673_v10, %v9202_v41  ;;  %v4772_v2 = vrot.slane %v4734_v31, %v9202_v41  ;;  %v4844_v62 = vrot.slane %v4806_v44, %v9202_v41 }
 0x642   : > { %7055 = vmatmul.mubr.f32.gmra.mxu0 %v3713_v60  ;;  %v10849_v60 = vld [vmem:[#allocation49_spill] sm:$0xff] }
 0x643   : > { %7057 = vmatprep.mubr.f32.mxu0 %v3842_v9  ;;  %v10850_v9 = vcombine.low %v10848_v36, %v10849_v60  ;;  %v10851_v17 = vcombine.high %v10848_v36, %v10849_v60  ;;  %v4736_v27 = vcombine.low %v4715_v30, %v4729_v22  ;;  %v2604_v36 = vpop.f32.mrf.mxu0 }
 0x644   : > { %7127 = vmatmul.mubr.f32.gmra.mxu1 %v4529_v52 }
 0x645   : > { %7129 = vmatprep.mubr.f32.mxu1 %v4658_v1  ;;  %v4615_v46 = vrot.slane %v10850_v9, %v9202_v41  ;;  %v4629_v57 = vrot.slane %v10851_v17, %v9202_v41  ;;  %v10860_v1 = vld [vmem:[#allocation53_spill] sm:$0xff]  ;;  %v10862_v9 = vcombine.high %v10835_v29, %v10052_v3 }
 0x646   : > { %7058 = vmatmul.mubr.f32.gmra.mxu0 %v3846_v49  ;;  %v2759_v49 = vpop.f32.mrf.mxu1 }
 0x647   : > { %7060 = vmatprep.mubr.f32.mxu0 %v3843_v25  ;;  %v4660_v43 = vcombine.low %v4615_v46, %v4643_v34  ;;  %v4735_v25 = vcombine.high %v4708_v4, %v4722_v63  ;;  %v4664_v18 = vcombine.low %v4629_v57, %v4657_v58  ;;  %v4661_v14 = vcombine.high %v4615_v46, %v4643_v34 }
 0x648   : > { %7130 = vmatmul.mubr.f32.gmra.mxu1 %v4662_v12  ;;  %v4665_v13 = vcombine.high %v4629_v57, %v4657_v58  ;;  %v4807_v4 = vcombine.high %v2598_v38, %v2600_v37  ;;  %v10866_v38 = vld [vmem:[#allocation56_spill] sm:$0xff] }
 0x649   : > { %7132 = vmatprep.mubr.f32.mxu1 %v4659_v56  ;;  %v4786_v35 = vrot.slane %v4735_v25, %v9202_v41 }
 0x64a   : > { %7061 = vmatmul.mubr.f32.gmra.mxu0 %v3847_v33  ;;  %v2761_v33 = vpop.f32.mrf.mxu1  ;;  %v4851_v58 = vrot.slane %v4807_v4, %v9202_v41 }
 0x64b   : > { %7063 = vmatprep.mubr.f32.mxu0 %v3844_v24  ;;  %v10852_v24 = vld [vmem:[#allocation50_spill] sm:$0xff]  ;;  %v4808_v32 = vcombine.low %v2759_v49, %v2761_v33  ;;  %v4809_v63 = vcombine.high %v2759_v49, %v2761_v33 }
 0x64c   : > { %7133 = vmatmul.mubr.f32.gmra.mxu1 %v4663_v55  ;;  %v10854_v54 = vcombine.low %v10852_v24, %v10853_v40  ;;  %v10856_v26 = vcombine.high %v10852_v24, %v10853_v40  ;;  %v2765_v60 = vpop.f32.mrf.mxu1 }
 0x64d   : > { %7135 = vmatprep.mubr.f32.mxu1 %v4660_v43  ;;  %v4858_v45 = vrot.slane %v4808_v32, %v9202_v41  ;;  %v4865_v11 = vrot.slane %v4809_v63, %v9202_v41  ;;  %v10865_v43 = vld [vmem:[#allocation54_spill] sm:$0xff] }
 0x64e   : > { %7064 = vmatmul.mubr.f32.gmra.mxu0 %v3848_v53  ;;  %v4744_v39 = vrot.slane %v10854_v54, %v9202_v41  ;;  %v10855_v53 = vcombine.high %v9868_v48, %v10046_v21  ;;  %v4758_v8 = vrot.slane %v10856_v26, %v9202_v41  ;;  %v4779_v48 = vrot.slane %v4736_v27, %v9202_v41  ;;  %v2767_v31 = vpop.f32.mrf.mxu1 }
 0x64f   : > { %7066 = vmatprep.mubr.f32.mxu0 %v3845_v50  ;;  %v4737_v50 = vcombine.high %v4715_v30, %v4729_v22  ;;  %v10857_v21 = vcombine.low %v10835_v29, %v10052_v3  ;;  %v4870_v56 = vcombine.low %v4844_v62, %v4858_v45  ;;  %v4871_v46 = vcombine.high %v4844_v62, %v4858_v45  ;;  %v2606_v29 = vpop.f32.mrf.mxu0 }
 0x650   : > { %7136 = vmatmul.mubr.f32.gmra.mxu1 %v4664_v18  ;;  %v4794_v59 = vcombine.low %v4744_v39, %v4772_v2  ;;  %v4798_v52 = vcombine.low %v4758_v8, %v4786_v35  ;;  %v4795_v6 = vcombine.high %v4744_v39, %v4772_v2  ;;  %v4799_v5 = vcombine.high %v4758_v8, %v4786_v35  ;;  %v10870_v39 = vld [vmem:[#allocation55_spill] sm:$0xff] }
 0x651   : > { %7138 = vmatprep.mubr.f32.mxu1 %v4661_v14  ;;  %v4793_v12 = vrot.slane %v4737_v50, %v9202_v41  ;;  %v4908_v3 = vrot.slane %v4870_v56, %v9202_v41  ;;  %v10867_v49 = vcombine.low %v10865_v43, %v10866_v38  ;;  %v4922_v57 = vrot.slane %v4871_v46, %v9202_v41 }
 0x652   : > { %7067 = vmatmul.mubr.f32.gmra.mxu0 %v10855_v53  ;;  %v4872_v18 = vcombine.low %v4851_v58, %v4865_v11  ;;  %v4942_v30 = vcombine.low %v2604_v36, %v2606_v29  ;;  %v4944_v22 = vcombine.low %v2765_v60, %v2767_v31  ;;  %v4943_v44 = vcombine.high %v2604_v36, %v2606_v29 }
 0x653   : > { %7069 = vmatprep.mubr.f32.mxu0 %v3978_v42  ;;  %v10859_v42 = vld [vmem:[#allocation51_spill] sm:$0xff]  ;;  %v4880_v17 = vrot.slane %v10867_v49, %v9202_v41  ;;  %v4945_v32 = vcombine.high %v2765_v60, %v2767_v31 }
 0x654   : > { %7139 = vmatmul.mubr.f32.gmra.mxu1 %v4665_v13  ;;  %v10861_v47 = vcombine.low %v10859_v42, %v10860_v1  ;;  %v10863_v15 = vcombine.high %v10859_v42, %v10860_v1  ;;  %v4980_v33 = vrot.slane %v4942_v30, %v9202_v41  ;;  %v4994_v24 = vrot.slane %v4944_v22, %v9202_v41  ;;  %v10871_v13 = vld [vmem:[#allocation57_spill] sm:$0xff] }
 0x655   : > { %7141 = vmatprep.mubr.f32.mxu1 %v4794_v59  ;;  %v4930_v14 = vcombine.low %v4880_v17, %v4908_v3  ;;  %v4931_v40 = vcombine.high %v4880_v17, %v4908_v3  ;;  %v4915_v54 = vrot.slane %v4872_v18, %v9202_v41  ;;  %v10872_v35 = vcombine.low %v10870_v39, %v10871_v13 }
 0x656   : > { %7070 = vmatmul.mubr.f32.gmra.mxu0 %v10857_v21  ;;  %v4751_v19 = vrot.slane %v10861_v47, %v9202_v41  ;;  %v4765_v0 = vrot.slane %v10863_v15, %v9202_v41  ;;  %v5006_v59 = vcombine.low %v4980_v33, %v4994_v24  ;;  %v10873_v26 = vcombine.high %v10870_v39, %v10871_v13  ;;  %v10874_v21 = vld [vmem:[#allocation58_spill] sm:$0xff]  ;;  %v10879_v15 = vld [vmem:[#allocation61_spill] sm:$0xff] }
 0x657   : > { %7072 = vmatprep.mubr.f32.mxu0 %v10858_v23  ;;  %v4887_v27 = vrot.slane %v10872_v35, %v9202_v41  ;;  %v5007_v50 = vcombine.high %v4980_v33, %v4994_v24  ;;  %v4987_v62 = vrot.slane %v4943_v44, %v9202_v41  ;;  %v5001_v45 = vrot.slane %v4945_v32, %v9202_v41  ;;  %v10875_v23 = vld [vmem:[#allocation60_spill] sm:$0xff] }
 0x658   : > { %7142 = vmatmul.mubr.f32.gmra.mxu1 %v4798_v52  ;;  %v4796_v34 = vcombine.low %v4751_v19, %v4779_v48  ;;  %v4800_v55 = vcombine.low %v4765_v0, %v4793_v12  ;;  %v4797_v10 = vcombine.high %v4751_v19, %v4779_v48  ;;  %v4801_v25 = vcombine.high %v4765_v0, %v4793_v12 }
 0x659   : > { %7144 = vmatprep.mubr.f32.mxu1 %v4795_v6  ;;  %v4932_v53 = vcombine.low %v4887_v27, %v4915_v54  ;;  %v4901_v8 = vrot.slane %v10873_v26, %v9202_v41  ;;  %v4933_v6 = vcombine.high %v4887_v27, %v4915_v54  ;;  %v5044_v48 = vrot.slane %v5006_v59, %v9202_v41 }
 0x65a   : > { %7073 = vmatmul.mubr.f32.gmra.mxu0 %v10862_v9  ;;  %v10876_v42 = vcombine.low %v10874_v21, %v10875_v23  ;;  %v5058_v47 = vrot.slane %v5007_v50, %v9202_v41  ;;  %v10877_v4 = vcombine.high %v10874_v21, %v10875_v23  ;;  %v5009_v56 = vcombine.high %v4987_v62, %v5001_v45  ;;  %v10878_v9 = vld [vmem:[#allocation59_spill] sm:$0xff] }
 0x65b   : > { %7075 = vmatprep.mubr.f32.mxu0 %v3980_v7  ;;  %v10864_v7 = vcombine.high %v10839_v16, %v10222_v20  ;;  %v10869_v20 = vcombine.high %v10838_v51, %v10197_v61  ;;  %v4873_v16 = vcombine.high %v4851_v58, %v4865_v11  ;;  %v10880_v0 = vcombine.low %v10878_v9, %v10879_v15 }
 0x65c   : > { %7145 = vmatmul.mubr.f32.gmra.mxu1 %v4799_v5  ;;  %v5016_v1 = vrot.slane %v10876_v42, %v9202_v41  ;;  %v5008_v5 = vcombine.low %v4987_v62, %v5001_v45  ;;  %v5030_v63 = vrot.slane %v10877_v4, %v9202_v41 }
 0x65d   : > { %7147 = vmatprep.mubr.f32.mxu1 %v4796_v34  ;;  %v4929_v61 = vrot.slane %v4873_v16, %v9202_v41  ;;  %v5023_v46 = vrot.slane %v10880_v0, %v9202_v41 }
 0x65e   : > { %7076 = vmatmul.mubr.f32.gmra.mxu0 %v3984_v28  ;;  %v10868_v28 = vcombine.high %v10865_v43, %v10866_v38  ;;  %v5066_v12 = vcombine.low %v5016_v1, %v5044_v48  ;;  %v5070_v34 = vcombine.low %v5030_v63, %v5058_v47  ;;  %v5067_v36 = vcombine.high %v5016_v1, %v5044_v48  ;;  %v10421_v43 = vld [vmem:[%s10591_s4] ss:$0 sm:$0xff] }
 0x65f   : > { %7078 = vmatprep.mubr.f32.mxu0 %v10864_v7  ;;  %v4936_v52 = vcombine.low %v4901_v8, %v4929_v61  ;;  %v4937_v19 = vcombine.high %v4901_v8, %v4929_v61  ;;  %v5051_v60 = vrot.slane %v5008_v5, %v9202_v41  ;;  %v5071_v58 = vcombine.high %v5030_v63, %v5058_v47 }
 0x660   : > { %7148 = vmatmul.mubr.f32.gmra.mxu1 %v4800_v55  ;;  %v4894_v2 = vrot.slane %v10868_v28, %v9202_v41  ;;  %v5065_v55 = vrot.slane %v5009_v56, %v9202_v41 }
 0x661   : > { %7150 = vmatprep.mubr.f32.mxu1 %v4797_v10  ;;  %v5068_v11 = vcombine.low %v5023_v46, %v5051_v60  ;;  %v10881_v10 = vcombine.high %v10878_v9, %v10879_v15  ;;  %v5069_v31 = vcombine.high %v5023_v46, %v5051_v60 }
 0x662   : > { %7079 = vmatmul.mubr.f32.gmra.mxu0 %v10869_v20  ;;  %v4934_v37 = vcombine.low %v4894_v2, %v4922_v57  ;;  %v4935_v51 = vcombine.high %v4894_v2, %v4922_v57 }
 0x663   : > { %v5037_v3 = vrot.slane %v10881_v10, %v9202_v41 }
 0x664   : > { %7151 = vmatmul.mubr.f32.gmra.mxu1 %v4801_v25 }
 0x665   : > { %7153 = vmatprep.mubr.f32.mxu1 %v4930_v14  ;;  %v5072_v29 = vcombine.low %v5037_v3, %v5065_v55  ;;  %v5073_v7 = vcombine.high %v5037_v3, %v5065_v55 }
 0x668   : > { %7154 = vmatmul.mubr.f32.gmra.mxu1 %v4934_v37 }
 0x669   : > { %7156 = vmatprep.mubr.f32.mxu1 %v4931_v40 }
 0x66c   : > { %7157 = vmatmul.mubr.f32.gmra.mxu1 %v4935_v51 }
 0x66d   : > { %7159 = vmatprep.mubr.f32.mxu1 %v4932_v53 }
 0x670   : > { %7160 = vmatmul.mubr.f32.gmra.mxu1 %v4936_v52 }
 0x671   : > { %7162 = vmatprep.mubr.f32.mxu1 %v4933_v6 }
 0x674   : > { %7163 = vmatmul.mubr.f32.gmra.mxu1 %v4937_v19 }
 0x675   : > { %7165 = vmatprep.mubr.f32.mxu1 %v5066_v12 }
 0x678   : > { %7166 = vmatmul.mubr.f32.gmra.mxu1 %v5070_v34 }
 0x679   : > { %7168 = vmatprep.mubr.f32.mxu1 %v5067_v36 }
 0x67c   : > { %7169 = vmatmul.mubr.f32.gmra.mxu1 %v5071_v58 }
 0x67d   : > { %7171 = vmatprep.mubr.f32.mxu1 %v5068_v11 }
 0x680   : > { %7172 = vmatmul.mubr.f32.gmra.mxu1 %v5072_v29 }
 0x681   : > { %7174 = vmatprep.mubr.f32.mxu1 %v5069_v31 }
 0x684   : > { %7175 = vmatmul.mubr.f32.gmra.mxu1 %v5073_v7 }
 0x69a   : > { %v6987_v38 = vpop.f32.mrf.mxu0 }
 0x69b   : > { %v5297_v49 = vadd.f32 %v6987_v38, %v10421_v43 }
 0x69c   : > { %v5291_v17 = vpop.f32.mrf.mxu0 }
 0x69d   : > { %5931 = vst [vmem:[#allocation10 + $0x8] sm:$0xff] %v5297_v49  ;;  %v5292_v41 = vadd.f32 %v10421_v43, %v5291_v17 }
 0x69e   : > { %v6990_v57 = vpop.f32.mrf.mxu0 }
 0x69f   : > { %5930 = vst [vmem:[#allocation10] sm:$0xff] %v5292_v41  ;;  %v5307_v25 = vadd.f32 %v6990_v57, %v10421_v43 }
 0x6a0   : > { %v5301_v18 = vpop.f32.mrf.mxu0 }
 0x6a1   : > { %5933 = vst [vmem:[#allocation10 + $0x18] sm:$0xff] %v5307_v25  ;;  %v5302_v30 = vadd.f32 %v10421_v43, %v5301_v18 }
 0x6a2   : > { %v6993_v22 = vpop.f32.mrf.mxu0 }
 0x6a3   : > { %5932 = vst [vmem:[#allocation10 + $0x10] sm:$0xff] %v5302_v30  ;;  %v5317_v14 = vadd.f32 %v6993_v22, %v10421_v43 }
 0x6a4   : > { %v5311_v28 = vpop.f32.mrf.mxu0 }
 0x6a5   : > { %5935 = vst [vmem:[#allocation10 + $0x28] sm:$0xff] %v5317_v14  ;;  %v5312_v2 = vadd.f32 %v10421_v43, %v5311_v28 }
 0x6a6   : > { %v6996_v20 = vpop.f32.mrf.mxu0 }
 0x6a7   : > { %5934 = vst [vmem:[#allocation10 + $0x20] sm:$0xff] %v5312_v2  ;;  %v5327_v16 = vadd.f32 %v6996_v20, %v10421_v43 }
 0x6a8   : > { %v5321_v37 = vpop.f32.mrf.mxu0 }
 0x6a9   : > { %5937 = vst [vmem:[#allocation10 + $0x38] sm:$0xff] %v5327_v16  ;;  %v5322_v33 = vadd.f32 %v10421_v43, %v5321_v37 }
 0x6aa   : > { %v6999_v24 = vpop.f32.mrf.mxu0 }
 0x6ab   : > { %5936 = vst [vmem:[#allocation10 + $0x30] sm:$0xff] %v5322_v33  ;;  %v5337_v40 = vadd.f32 %v6999_v24, %v10421_v43 }
 0x6ac   : > { %v5331_v54 = vpop.f32.mrf.mxu0 }
 0x6ad   : > { %5939 = vst [vmem:[#allocation10 + $0x48] sm:$0xff] %v5337_v40  ;;  %v5332_v39 = vadd.f32 %v10421_v43, %v5331_v54 }
 0x6ae   : > { %v7002_v13 = vpop.f32.mrf.mxu0 }
 0x6af   : > { %5938 = vst [vmem:[#allocation10 + $0x40] sm:$0xff] %v5332_v39  ;;  %v5347_v35 = vadd.f32 %v7002_v13, %v10421_v43 }
 0x6b0   : > { %v5341_v27 = vpop.f32.mrf.mxu0 }
 0x6b1   : > { %5941 = vst [vmem:[#allocation10 + $0x58] sm:$0xff] %v5347_v35  ;;  %v5342_v61 = vadd.f32 %v10421_v43, %v5341_v27 }
 0x6b2   : > { %v7005_v51 = vpop.f32.mrf.mxu0 }
 0x6b3   : > { %5940 = vst [vmem:[#allocation10 + $0x50] sm:$0xff] %v5342_v61  ;;  %v5357_v44 = vadd.f32 %v7005_v51, %v10421_v43 }
 0x6b4   : > { %v5351_v32 = vpop.f32.mrf.mxu0 }
 0x6b5   : > { %5943 = vst [vmem:[#allocation10 + $0x68] sm:$0xff] %v5357_v44  ;;  %v5352_v59 = vadd.f32 %v10421_v43, %v5351_v32 }
 0x6b6   : > { %v7008_v53 = vpop.f32.mrf.mxu0 }
 0x6b7   : > { %5942 = vst [vmem:[#allocation10 + $0x60] sm:$0xff] %v5352_v59  ;;  %v5367_v26 = vadd.f32 %v7008_v53, %v10421_v43 }
 0x6b8   : > { %v5361_v8 = vpop.f32.mrf.mxu0 }
 0x6b9   : > { %5945 = vst [vmem:[#allocation10 + $0x78] sm:$0xff] %v5367_v26  ;;  %v5362_v50 = vadd.f32 %v10421_v43, %v5361_v8 }
 0x6ba   : > { %v7011_v52 = vpop.f32.mrf.mxu0 }
 0x6bb   : > { %5944 = vst [vmem:[#allocation10 + $0x70] sm:$0xff] %v5362_v50  ;;  %v5377_v45 = vadd.f32 %v7011_v52, %v10421_v43 }
 0x6bc   : > { %v7083_v62 = vpop.f32.mrf.mxu1  ;;  %v5371_v48 = vpop.f32.mrf.mxu0 }
 0x6bd   : > { %v5617_v6 = vadd.f32 %v7083_v62, %v10421_v43  ;;  %5947 = vst [vmem:[#allocation10 + $0x88] sm:$0xff] %v5377_v45  ;;  %v5372_v23 = vadd.f32 %v10421_v43, %v5371_v48 }
 0x6be   : > { %v5611_v21 = vpop.f32.mrf.mxu1 }
 0x6bf   : > { %5995 = vst [vmem:[#allocation10 + $0x208] sm:$0xff] %v5617_v6  ;;  %v5612_v42 = vadd.f32 %v10421_v43, %v5611_v21  ;;  %5946 = vst [vmem:[#allocation10 + $0x80] sm:$0xff] %v5372_v23 }
 0x6c1   : > { %v7014_v1 = vpop.f32.mrf.mxu0  ;;  %5994 = vst [vmem:[#allocation10 + $0x200] sm:$0xff] %v5612_v42  ;;  %v7086_v19 = vpop.f32.mrf.mxu1 }
 0x6c2   : > { %v5387_v47 = vadd.f32 %v7014_v1, %v10421_v43  ;;  %v5627_v5 = vadd.f32 %v7086_v19, %v10421_v43 }
 0x6c3   : > { %v5381_v12 = vpop.f32.mrf.mxu0  ;;  %v5621_v63 = vpop.f32.mrf.mxu1 }
 0x6c4   : > { %5949 = vst [vmem:[#allocation10 + $0x98] sm:$0xff] %v5387_v47  ;;  %v5382_v4 = vadd.f32 %v10421_v43, %v5381_v12  ;;  %5997 = vst [vmem:[#allocation10 + $0x218] sm:$0xff] %v5627_v5  ;;  %v5622_v56 = vadd.f32 %v10421_v43, %v5621_v63 }
 0x6c6   : > { %5948 = vst [vmem:[#allocation10 + $0x90] sm:$0xff] %v5382_v4  ;;  %5996 = vst [vmem:[#allocation10 + $0x210] sm:$0xff] %v5622_v56 }
 0x6c8   : > { %v7017_v34 = vpop.f32.mrf.mxu0 }
 0x6c9   : > { %v7089_v36 = vpop.f32.mrf.mxu1  ;;  %v5397_v60 = vadd.f32 %v7017_v34, %v10421_v43 }
 0x6ca   : > { %v5637_v9 = vadd.f32 %v7089_v36, %v10421_v43  ;;  %v5391_v15 = vpop.f32.mrf.mxu0 }
 0x6cb   : > { %v5631_v0 = vpop.f32.mrf.mxu1  ;;  %5951 = vst [vmem:[#allocation10 + $0xa8] sm:$0xff] %v5397_v60  ;;  %v5392_v46 = vadd.f32 %v10421_v43, %v5391_v15 }
 0x6cc   : > { %5999 = vst [vmem:[#allocation10 + $0x228] sm:$0xff] %v5637_v9  ;;  %v5632_v55 = vadd.f32 %v10421_v43, %v5631_v0 }
 0x6cd   : > { %5950 = vst [vmem:[#allocation10 + $0xa0] sm:$0xff] %v5392_v46 }
 0x6ce   : > { %5998 = vst [vmem:[#allocation10 + $0x220] sm:$0xff] %v5632_v55 }
 0x6cf   : > { %v7020_v58 = vpop.f32.mrf.mxu0 }
 0x6d0   : > { %v7092_v11 = vpop.f32.mrf.mxu1  ;;  %v5407_v10 = vadd.f32 %v7020_v58, %v10421_v43 }
 0x6d1   : > { %v5647_v3 = vadd.f32 %v7092_v11, %v10421_v43  ;;  %v5401_v29 = vpop.f32.mrf.mxu0 }
 0x6d2   : > { %v5641_v31 = vpop.f32.mrf.mxu1  ;;  %5953 = vst [vmem:[#allocation10 + $0xb8] sm:$0xff] %v5407_v10  ;;  %v5402_v7 = vadd.f32 %v10421_v43, %v5401_v29 }
 0x6d3   : > { %6001 = vst [vmem:[#allocation10 + $0x238] sm:$0xff] %v5647_v3  ;;  %v5642_v38 = vadd.f32 %v10421_v43, %v5641_v31 }
 0x6d4   : > { %5952 = vst [vmem:[#allocation10 + $0xb0] sm:$0xff] %v5402_v7 }
 0x6d5   : > { %6000 = vst [vmem:[#allocation10 + $0x230] sm:$0xff] %v5642_v38 }
 0x6d6   : > { %v7023_v49 = vpop.f32.mrf.mxu0 }
 0x6d7   : > { %v7095_v17 = vpop.f32.mrf.mxu1  ;;  %v5417_v41 = vadd.f32 %v7023_v49, %v10421_v43 }
 0x6d8   : > { %v5657_v57 = vadd.f32 %v7095_v17, %v10421_v43  ;;  %v5411_v25 = vpop.f32.mrf.mxu0 }
 0x6d9   : > { %v5651_v18 = vpop.f32.mrf.mxu1  ;;  %5955 = vst [vmem:[#allocation10 + $0xc8] sm:$0xff] %v5417_v41  ;;  %v5412_v30 = vadd.f32 %v10421_v43, %v5411_v25 }
 0x6da   : > { %6003 = vst [vmem:[#allocation10 + $0x248] sm:$0xff] %v5657_v57  ;;  %v5652_v22 = vadd.f32 %v10421_v43, %v5651_v18  ;;  %v7026_v14 = vpop.f32.mrf.mxu0 }
 0x6db   : > { %v7098_v28 = vpop.f32.mrf.mxu1  ;;  %5954 = vst [vmem:[#allocation10 + $0xc0] sm:$0xff] %v5412_v30  ;;  %v5427_v2 = vadd.f32 %v7026_v14, %v10421_v43 }
 0x6dc   : > { %6002 = vst [vmem:[#allocation10 + $0x240] sm:$0xff] %v5652_v22  ;;  %v5667_v20 = vadd.f32 %v7098_v28, %v10421_v43  ;;  %v5421_v16 = vpop.f32.mrf.mxu0 }
 0x6dd   : > { %v5661_v37 = vpop.f32.mrf.mxu1  ;;  %5957 = vst [vmem:[#allocation10 + $0xd8] sm:$0xff] %v5427_v2  ;;  %v5422_v33 = vadd.f32 %v10421_v43, %v5421_v16 }
 0x6de   : > { %6005 = vst [vmem:[#allocation10 + $0x258] sm:$0xff] %v5667_v20  ;;  %v5662_v24 = vadd.f32 %v10421_v43, %v5661_v37  ;;  %v7029_v40 = vpop.f32.mrf.mxu0 }
 0x6df   : > { %v7101_v54 = vpop.f32.mrf.mxu1  ;;  %5956 = vst [vmem:[#allocation10 + $0xd0] sm:$0xff] %v5422_v33  ;;  %v5437_v39 = vadd.f32 %v7029_v40, %v10421_v43 }
 0x6e0   : > { %6004 = vst [vmem:[#allocation10 + $0x250] sm:$0xff] %v5662_v24  ;;  %v5677_v13 = vadd.f32 %v7101_v54, %v10421_v43  ;;  %v5431_v35 = vpop.f32.mrf.mxu0 }
 0x6e1   : > { %v5671_v27 = vpop.f32.mrf.mxu1  ;;  %5959 = vst [vmem:[#allocation10 + $0xe8] sm:$0xff] %v5437_v39  ;;  %v5432_v61 = vadd.f32 %v10421_v43, %v5431_v35 }
 0x6e2   : > { %6007 = vst [vmem:[#allocation10 + $0x268] sm:$0xff] %v5677_v13  ;;  %v5672_v51 = vadd.f32 %v10421_v43, %v5671_v27  ;;  %v7032_v44 = vpop.f32.mrf.mxu0 }
 0x6e3   : > { %v7104_v32 = vpop.f32.mrf.mxu1  ;;  %5958 = vst [vmem:[#allocation10 + $0xe0] sm:$0xff] %v5432_v61  ;;  %v5447_v59 = vadd.f32 %v7032_v44, %v10421_v43 }
 0x6e4   : > { %6006 = vst [vmem:[#allocation10 + $0x260] sm:$0xff] %v5672_v51  ;;  %v5687_v53 = vadd.f32 %v7104_v32, %v10421_v43  ;;  %v5441_v26 = vpop.f32.mrf.mxu0 }
 0x6e5   : > { %v5681_v8 = vpop.f32.mrf.mxu1  ;;  %5961 = vst [vmem:[#allocation10 + $0xf8] sm:$0xff] %v5447_v59  ;;  %v5442_v50 = vadd.f32 %v10421_v43, %v5441_v26 }
 0x6e6   : > { %6009 = vst [vmem:[#allocation10 + $0x278] sm:$0xff] %v5687_v53  ;;  %v5682_v52 = vadd.f32 %v10421_v43, %v5681_v8  ;;  %v7035_v62 = vpop.f32.mrf.mxu0 }
 0x6e7   : > { %v7107_v45 = vpop.f32.mrf.mxu1  ;;  %5960 = vst [vmem:[#allocation10 + $0xf0] sm:$0xff] %v5442_v50  ;;  %v5457_v6 = vadd.f32 %v7035_v62, %v10421_v43 }
 0x6e8   : > { %6008 = vst [vmem:[#allocation10 + $0x270] sm:$0xff] %v5682_v52  ;;  %v5697_v48 = vadd.f32 %v7107_v45, %v10421_v43  ;;  %v5451_v21 = vpop.f32.mrf.mxu0 }
 0x6e9   : > { %v5691_v23 = vpop.f32.mrf.mxu1  ;;  %5963 = vst [vmem:[#allocation10 + $0x108] sm:$0xff] %v5457_v6  ;;  %v5452_v42 = vadd.f32 %v10421_v43, %v5451_v21 }
 0x6ea   : > { %6011 = vst [vmem:[#allocation10 + $0x288] sm:$0xff] %v5697_v48  ;;  %v5692_v1 = vadd.f32 %v10421_v43, %v5691_v23  ;;  %v7038_v47 = vpop.f32.mrf.mxu0 }
 0x6eb   : > { %v7110_v19 = vpop.f32.mrf.mxu1  ;;  %5962 = vst [vmem:[#allocation10 + $0x100] sm:$0xff] %v5452_v42  ;;  %v5467_v5 = vadd.f32 %v7038_v47, %v10421_v43 }
 0x6ec   : > { %6010 = vst [vmem:[#allocation10 + $0x280] sm:$0xff] %v5692_v1  ;;  %v5707_v12 = vadd.f32 %v7110_v19, %v10421_v43  ;;  %v5461_v4 = vpop.f32.mrf.mxu0 }
 0x6ed   : > { %v5701_v63 = vpop.f32.mrf.mxu1  ;;  %5965 = vst [vmem:[#allocation10 + $0x118] sm:$0xff] %v5467_v5  ;;  %v5462_v56 = vadd.f32 %v10421_v43, %v5461_v4 }
 0x6ee   : > { %6013 = vst [vmem:[#allocation10 + $0x298] sm:$0xff] %v5707_v12  ;;  %v5702_v34 = vadd.f32 %v10421_v43, %v5701_v63  ;;  %v7041_v36 = vpop.f32.mrf.mxu0 }
 0x6ef   : > { %v7113_v60 = vpop.f32.mrf.mxu1  ;;  %5964 = vst [vmem:[#allocation10 + $0x110] sm:$0xff] %v5462_v56  ;;  %v5477_v9 = vadd.f32 %v7041_v36, %v10421_v43 }
 0x6f0   : > { %6012 = vst [vmem:[#allocation10 + $0x290] sm:$0xff] %v5702_v34  ;;  %v5717_v15 = vadd.f32 %v7113_v60, %v10421_v43  ;;  %v5471_v0 = vpop.f32.mrf.mxu0 }
 0x6f1   : > { %v5711_v46 = vpop.f32.mrf.mxu1  ;;  %5967 = vst [vmem:[#allocation10 + $0x128] sm:$0xff] %v5477_v9  ;;  %v5472_v55 = vadd.f32 %v10421_v43, %v5471_v0 }
 0x6f2   : > { %6015 = vst [vmem:[#allocation10 + $0x2a8] sm:$0xff] %v5717_v15  ;;  %v5712_v58 = vadd.f32 %v10421_v43, %v5711_v46  ;;  %v7044_v11 = vpop.f32.mrf.mxu0 }
 0x6f3   : > { %v7116_v10 = vpop.f32.mrf.mxu1  ;;  %5966 = vst [vmem:[#allocation10 + $0x120] sm:$0xff] %v5472_v55  ;;  %v5487_v3 = vadd.f32 %v7044_v11, %v10421_v43 }
 0x6f4   : > { %6014 = vst [vmem:[#allocation10 + $0x2a0] sm:$0xff] %v5712_v58  ;;  %v5727_v29 = vadd.f32 %v7116_v10, %v10421_v43  ;;  %v5481_v31 = vpop.f32.mrf.mxu0 }
 0x6f5   : > { %v5721_v7 = vpop.f32.mrf.mxu1  ;;  %5969 = vst [vmem:[#allocation10 + $0x138] sm:$0xff] %v5487_v3  ;;  %v5482_v38 = vadd.f32 %v10421_v43, %v5481_v31 }
 0x6f6   : > { %6017 = vst [vmem:[#allocation10 + $0x2b8] sm:$0xff] %v5727_v29  ;;  %v5722_v49 = vadd.f32 %v10421_v43, %v5721_v7  ;;  %v7047_v17 = vpop.f32.mrf.mxu0 }
 0x6f7   : > { %5968 = vst [vmem:[#allocation10 + $0x130] sm:$0xff] %v5482_v38  ;;  %v5497_v57 = vadd.f32 %v7047_v17, %v10421_v43 }
 0x6f8   : > { %v7119_v41 = vpop.f32.mrf.mxu1  ;;  %6016 = vst [vmem:[#allocation10 + $0x2b0] sm:$0xff] %v5722_v49  ;;  %v5491_v18 = vpop.f32.mrf.mxu0 }
 0x6f9   : > { %v5737_v25 = vadd.f32 %v7119_v41, %v10421_v43  ;;  %5971 = vst [vmem:[#allocation10 + $0x148] sm:$0xff] %v5497_v57  ;;  %v5492_v22 = vadd.f32 %v10421_v43, %v5491_v18 }
 0x6fa   : > { %v5731_v30 = vpop.f32.mrf.mxu1  ;;  %v7050_v28 = vpop.f32.mrf.mxu0 }
 0x6fb   : > { %6019 = vst [vmem:[#allocation10 + $0x2c8] sm:$0xff] %v5737_v25  ;;  %v5732_v14 = vadd.f32 %v10421_v43, %v5731_v30  ;;  %5970 = vst [vmem:[#allocation10 + $0x140] sm:$0xff] %v5492_v22  ;;  %v5507_v20 = vadd.f32 %v7050_v28, %v10421_v43 }
 0x6fc   : > { %v7122_v2 = vpop.f32.mrf.mxu1  ;;  %v5501_v37 = vpop.f32.mrf.mxu0 }
 0x6fd   : > { %6018 = vst [vmem:[#allocation10 + $0x2c0] sm:$0xff] %v5732_v14  ;;  %v5747_v16 = vadd.f32 %v7122_v2, %v10421_v43  ;;  %5973 = vst [vmem:[#allocation10 + $0x158] sm:$0xff] %v5507_v20  ;;  %v5502_v24 = vadd.f32 %v10421_v43, %v5501_v37 }
 0x6fe   : > { %v5741_v33 = vpop.f32.mrf.mxu1  ;;  %v7053_v54 = vpop.f32.mrf.mxu0 }
 0x6ff   : > { %6021 = vst [vmem:[#allocation10 + $0x2d8] sm:$0xff] %v5747_v16  ;;  %v5742_v40 = vadd.f32 %v10421_v43, %v5741_v33  ;;  %5972 = vst [vmem:[#allocation10 + $0x150] sm:$0xff] %v5502_v24  ;;  %v5517_v13 = vadd.f32 %v7053_v54, %v10421_v43 }
 0x700   : > { %v7125_v39 = vpop.f32.mrf.mxu1  ;;  %v5511_v27 = vpop.f32.mrf.mxu0 }
 0x701   : > { %6020 = vst [vmem:[#allocation10 + $0x2d0] sm:$0xff] %v5742_v40  ;;  %v5757_v35 = vadd.f32 %v7125_v39, %v10421_v43  ;;  %5975 = vst [vmem:[#allocation10 + $0x168] sm:$0xff] %v5517_v13  ;;  %v5512_v51 = vadd.f32 %v10421_v43, %v5511_v27 }
 0x702   : > { %v5751_v61 = vpop.f32.mrf.mxu1  ;;  %v7056_v32 = vpop.f32.mrf.mxu0 }
 0x703   : > { %6023 = vst [vmem:[#allocation10 + $0x2e8] sm:$0xff] %v5757_v35  ;;  %v5752_v44 = vadd.f32 %v10421_v43, %v5751_v61  ;;  %5974 = vst [vmem:[#allocation10 + $0x160] sm:$0xff] %v5512_v51  ;;  %v5527_v53 = vadd.f32 %v7056_v32, %v10421_v43 }
 0x704   : > { %v7128_v59 = vpop.f32.mrf.mxu1  ;;  %v5521_v8 = vpop.f32.mrf.mxu0 }
 0x705   : > { %6022 = vst [vmem:[#allocation10 + $0x2e0] sm:$0xff] %v5752_v44  ;;  %v5767_v26 = vadd.f32 %v7128_v59, %v10421_v43  ;;  %5977 = vst [vmem:[#allocation10 + $0x178] sm:$0xff] %v5527_v53  ;;  %v5522_v52 = vadd.f32 %v10421_v43, %v5521_v8 }
 0x706   : > { %v5761_v50 = vpop.f32.mrf.mxu1  ;;  %v7059_v45 = vpop.f32.mrf.mxu0 }
 0x707   : > { %6025 = vst [vmem:[#allocation10 + $0x2f8] sm:$0xff] %v5767_v26  ;;  %v5762_v62 = vadd.f32 %v10421_v43, %v5761_v50  ;;  %5976 = vst [vmem:[#allocation10 + $0x170] sm:$0xff] %v5522_v52  ;;  %v5537_v48 = vadd.f32 %v7059_v45, %v10421_v43 }
 0x708   : > { %v7131_v6 = vpop.f32.mrf.mxu1  ;;  %v5531_v23 = vpop.f32.mrf.mxu0 }
 0x709   : > { %6024 = vst [vmem:[#allocation10 + $0x2f0] sm:$0xff] %v5762_v62  ;;  %v5777_v21 = vadd.f32 %v7131_v6, %v10421_v43  ;;  %5979 = vst [vmem:[#allocation10 + $0x188] sm:$0xff] %v5537_v48  ;;  %v5532_v1 = vadd.f32 %v10421_v43, %v5531_v23 }
 0x70a   : > { %v5771_v42 = vpop.f32.mrf.mxu1  ;;  %v7062_v19 = vpop.f32.mrf.mxu0 }
 0x70b   : > { %6027 = vst [vmem:[#allocation10 + $0x308] sm:$0xff] %v5777_v21  ;;  %v5772_v47 = vadd.f32 %v10421_v43, %v5771_v42  ;;  %5978 = vst [vmem:[#allocation10 + $0x180] sm:$0xff] %v5532_v1  ;;  %v5547_v12 = vadd.f32 %v7062_v19, %v10421_v43 }
 0x70c   : > { %v7134_v5 = vpop.f32.mrf.mxu1  ;;  %v5541_v63 = vpop.f32.mrf.mxu0 }
 0x70d   : > { %6026 = vst [vmem:[#allocation10 + $0x300] sm:$0xff] %v5772_v47  ;;  %v5787_v4 = vadd.f32 %v7134_v5, %v10421_v43  ;;  %5981 = vst [vmem:[#allocation10 + $0x198] sm:$0xff] %v5547_v12  ;;  %v5542_v34 = vadd.f32 %v10421_v43, %v5541_v63 }
 0x70e   : > { %v5781_v56 = vpop.f32.mrf.mxu1  ;;  %v7065_v60 = vpop.f32.mrf.mxu0 }
 0x70f   : > { %6029 = vst [vmem:[#allocation10 + $0x318] sm:$0xff] %v5787_v4  ;;  %v5782_v36 = vadd.f32 %v10421_v43, %v5781_v56  ;;  %5980 = vst [vmem:[#allocation10 + $0x190] sm:$0xff] %v5542_v34  ;;  %v5557_v15 = vadd.f32 %v7065_v60, %v10421_v43 }
 0x710   : > { %v7137_v9 = vpop.f32.mrf.mxu1  ;;  %v5551_v46 = vpop.f32.mrf.mxu0 }
 0x711   : > { %6028 = vst [vmem:[#allocation10 + $0x310] sm:$0xff] %v5782_v36  ;;  %v5797_v0 = vadd.f32 %v7137_v9, %v10421_v43  ;;  %5983 = vst [vmem:[#allocation10 + $0x1a8] sm:$0xff] %v5557_v15  ;;  %v5552_v58 = vadd.f32 %v10421_v43, %v5551_v46 }
 0x712   : > { %v5791_v55 = vpop.f32.mrf.mxu1  ;;  %v7068_v10 = vpop.f32.mrf.mxu0 }
 0x713   : > { %6031 = vst [vmem:[#allocation10 + $0x328] sm:$0xff] %v5797_v0  ;;  %v5792_v11 = vadd.f32 %v10421_v43, %v5791_v55  ;;  %5982 = vst [vmem:[#allocation10 + $0x1a0] sm:$0xff] %v5552_v58  ;;  %v5567_v29 = vadd.f32 %v7068_v10, %v10421_v43 }
 0x714   : > { %v7140_v3 = vpop.f32.mrf.mxu1  ;;  %v5561_v7 = vpop.f32.mrf.mxu0 }
 0x715   : > { %6030 = vst [vmem:[#allocation10 + $0x320] sm:$0xff] %v5792_v11  ;;  %v5807_v31 = vadd.f32 %v7140_v3, %v10421_v43  ;;  %5985 = vst [vmem:[#allocation10 + $0x1b8] sm:$0xff] %v5567_v29  ;;  %v5562_v49 = vadd.f32 %v10421_v43, %v5561_v7 }
 0x716   : > { %v5801_v38 = vpop.f32.mrf.mxu1  ;;  %v7071_v41 = vpop.f32.mrf.mxu0 }
 0x717   : > { %6033 = vst [vmem:[#allocation10 + $0x338] sm:$0xff] %v5807_v31  ;;  %v5802_v17 = vadd.f32 %v10421_v43, %v5801_v38  ;;  %5984 = vst [vmem:[#allocation10 + $0x1b0] sm:$0xff] %v5562_v49  ;;  %v5577_v25 = vadd.f32 %v7071_v41, %v10421_v43 }
 0x718   : > { %v7143_v57 = vpop.f32.mrf.mxu1  ;;  %v5571_v30 = vpop.f32.mrf.mxu0 }
 0x719   : > { %6032 = vst [vmem:[#allocation10 + $0x330] sm:$0xff] %v5802_v17  ;;  %v5817_v18 = vadd.f32 %v7143_v57, %v10421_v43  ;;  %5987 = vst [vmem:[#allocation10 + $0x1c8] sm:$0xff] %v5577_v25  ;;  %v5572_v14 = vadd.f32 %v10421_v43, %v5571_v30 }
 0x71a   : > { %v5811_v22 = vpop.f32.mrf.mxu1  ;;  %v7074_v2 = vpop.f32.mrf.mxu0 }
 0x71b   : > { %6035 = vst [vmem:[#allocation10 + $0x348] sm:$0xff] %v5817_v18  ;;  %v5812_v28 = vadd.f32 %v10421_v43, %v5811_v22  ;;  %5986 = vst [vmem:[#allocation10 + $0x1c0] sm:$0xff] %v5572_v14  ;;  %v5587_v16 = vadd.f32 %v7074_v2, %v10421_v43 }
 0x71c   : > { %v7146_v20 = vpop.f32.mrf.mxu1  ;;  %v5581_v33 = vpop.f32.mrf.mxu0 }
 0x71d   : > { %6034 = vst [vmem:[#allocation10 + $0x340] sm:$0xff] %v5812_v28  ;;  %v5827_v37 = vadd.f32 %v7146_v20, %v10421_v43  ;;  %5989 = vst [vmem:[#allocation10 + $0x1d8] sm:$0xff] %v5587_v16  ;;  %v5582_v40 = vadd.f32 %v10421_v43, %v5581_v33 }
 0x71e   : > { %v5821_v24 = vpop.f32.mrf.mxu1  ;;  %v7077_v39 = vpop.f32.mrf.mxu0 }
 0x71f   : > { %6037 = vst [vmem:[#allocation10 + $0x358] sm:$0xff] %v5827_v37  ;;  %v5822_v54 = vadd.f32 %v10421_v43, %v5821_v24  ;;  %5988 = vst [vmem:[#allocation10 + $0x1d0] sm:$0xff] %v5582_v40  ;;  %v5597_v35 = vadd.f32 %v7077_v39, %v10421_v43 }
 0x720   : > { %v7149_v13 = vpop.f32.mrf.mxu1  ;;  %v5591_v61 = vpop.f32.mrf.mxu0 }
 0x721   : > { %6036 = vst [vmem:[#allocation10 + $0x350] sm:$0xff] %v5822_v54  ;;  %v5837_v27 = vadd.f32 %v7149_v13, %v10421_v43  ;;  %5991 = vst [vmem:[#allocation10 + $0x1e8] sm:$0xff] %v5597_v35  ;;  %v5592_v44 = vadd.f32 %v10421_v43, %v5591_v61 }
 0x722   : > { %v5831_v51 = vpop.f32.mrf.mxu1  ;;  %v7080_v59 = vpop.f32.mrf.mxu0 }
 0x723   : > { %6039 = vst [vmem:[#allocation10 + $0x368] sm:$0xff] %v5837_v27  ;;  %v5832_v32 = vadd.f32 %v10421_v43, %v5831_v51  ;;  %5990 = vst [vmem:[#allocation10 + $0x1e0] sm:$0xff] %v5592_v44  ;;  %v5607_v26 = vadd.f32 %v7080_v59, %v10421_v43 }
 0x724   : > { %v7152_v53 = vpop.f32.mrf.mxu1  ;;  %v5601_v50 = vpop.f32.mrf.mxu0 }
 0x725   : > { %6038 = vst [vmem:[#allocation10 + $0x360] sm:$0xff] %v5832_v32  ;;  %v5847_v8 = vadd.f32 %v7152_v53, %v10421_v43  ;;  %5993 = vst [vmem:[#allocation10 + $0x1f8] sm:$0xff] %v5607_v26  ;;  %v5602_v62 = vadd.f32 %v10421_v43, %v5601_v50 }
 0x726   : > { %v5841_v52 = vpop.f32.mrf.mxu1 }
 0x727   : > { %6041 = vst [vmem:[#allocation10 + $0x378] sm:$0xff] %v5847_v8  ;;  %v5842_v45 = vadd.f32 %v10421_v43, %v5841_v52  ;;  %5992 = vst [vmem:[#allocation10 + $0x1f0] sm:$0xff] %v5602_v62 }
 0x728   : > { %v7155_v6 = vpop.f32.mrf.mxu1 }
 0x729   : > { %6040 = vst [vmem:[#allocation10 + $0x370] sm:$0xff] %v5842_v45  ;;  %v5857_v48 = vadd.f32 %v7155_v6, %v10421_v43 }
 0x72a   : > { %v5851_v21 = vpop.f32.mrf.mxu1 }
 0x72b   : > { %6043 = vst [vmem:[#allocation10 + $0x388] sm:$0xff] %v5857_v48  ;;  %v5852_v23 = vadd.f32 %v10421_v43, %v5851_v21 }
 0x72c   : > { %v7158_v42 = vpop.f32.mrf.mxu1 }
 0x72d   : > { %6042 = vst [vmem:[#allocation10 + $0x380] sm:$0xff] %v5852_v23  ;;  %v5867_v1 = vadd.f32 %v7158_v42, %v10421_v43 }
 0x72e   : > { %v5861_v47 = vpop.f32.mrf.mxu1 }
 0x72f   : > { %6045 = vst [vmem:[#allocation10 + $0x398] sm:$0xff] %v5867_v1  ;;  %v5862_v19 = vadd.f32 %v10421_v43, %v5861_v47 }
 0x730   : > { %v7161_v5 = vpop.f32.mrf.mxu1 }
 0x731   : > { %6044 = vst [vmem:[#allocation10 + $0x390] sm:$0xff] %v5862_v19  ;;  %v5877_v12 = vadd.f32 %v7161_v5, %v10421_v43 }
 0x732   : > { %v5871_v4 = vpop.f32.mrf.mxu1 }
 0x733   : > { %6047 = vst [vmem:[#allocation10 + $0x3a8] sm:$0xff] %v5877_v12  ;;  %v5872_v63 = vadd.f32 %v10421_v43, %v5871_v4 }
 0x734   : > { %v7164_v56 = vpop.f32.mrf.mxu1 }
 0x735   : > { %6046 = vst [vmem:[#allocation10 + $0x3a0] sm:$0xff] %v5872_v63  ;;  %v5887_v34 = vadd.f32 %v7164_v56, %v10421_v43 }
 0x736   : > { %v5881_v36 = vpop.f32.mrf.mxu1 }
 0x737   : > { %6049 = vst [vmem:[#allocation10 + $0x3b8] sm:$0xff] %v5887_v34  ;;  %v5882_v60 = vadd.f32 %v10421_v43, %v5881_v36 }
 0x738   : > { %v7167_v9 = vpop.f32.mrf.mxu1 }
 0x739   : > { %6048 = vst [vmem:[#allocation10 + $0x3b0] sm:$0xff] %v5882_v60  ;;  %v5897_v15 = vadd.f32 %v7167_v9, %v10421_v43 }
 0x73a   : > { %v5891_v0 = vpop.f32.mrf.mxu1 }
 0x73b   : > { %6051 = vst [vmem:[#allocation10 + $0x3c8] sm:$0xff] %v5897_v15  ;;  %v5892_v46 = vadd.f32 %v10421_v43, %v5891_v0 }
 0x73c   : > { %v7170_v55 = vpop.f32.mrf.mxu1 }
 0x73d   : > { %6050 = vst [vmem:[#allocation10 + $0x3c0] sm:$0xff] %v5892_v46  ;;  %v5907_v58 = vadd.f32 %v7170_v55, %v10421_v43 }
 0x73e   : > { %v5901_v11 = vpop.f32.mrf.mxu1 }
 0x73f   : > { %6053 = vst [vmem:[#allocation10 + $0x3d8] sm:$0xff] %v5907_v58  ;;  %v5902_v10 = vadd.f32 %v10421_v43, %v5901_v11 }
 0x740   : > { %v7173_v3 = vpop.f32.mrf.mxu1 }
 0x741   : > { %6052 = vst [vmem:[#allocation10 + $0x3d0] sm:$0xff] %v5902_v10  ;;  %v5917_v29 = vadd.f32 %v7173_v3, %v10421_v43 }
 0x742   : > { %v5911_v31 = vpop.f32.mrf.mxu1 }
 0x743   : > { %6055 = vst [vmem:[#allocation10 + $0x3e8] sm:$0xff] %v5917_v29  ;;  %v5912_v7 = vadd.f32 %v10421_v43, %v5911_v31 }
 0x744   : > { %v7176_v38 = vpop.f32.mrf.mxu1 }
 0x745   : > { %6054 = vst [vmem:[#allocation10 + $0x3e0] sm:$0xff] %v5912_v7  ;;  %v5927_v49 = vadd.f32 %v7176_v38, %v10421_v43 }
 0x746   : > { %v5921_v17 = vpop.f32.mrf.mxu1 }
 0x747   : > { %6057 = vst [vmem:[#allocation10 + $0x3f8] sm:$0xff] %v5927_v49  ;;  %v5922_v41 = vadd.f32 %v10421_v43, %v5921_v17 }
 0x749   : > { %6056 = vst [vmem:[#allocation10 + $0x3f0] sm:$0xff] %v5922_v41 }
 0x74a PF: > { %p7243_p12 = scmp.eq.s32.totalorder %s7824_s25, 1  ;;  %s7766_s13 = smov [#allocation10]  }
 0x74b   : > { %s6064_s14 = sshll.u32 %s7766_s13, 4  ;;  %s6065_s14 = int_to_ptr.vmem [resolvable:$true] %s6064_s14 }
 0x74c   : > { %s7660_s20 = scalar_lea.vmem %s6065_s14, 16384  ;;  %p7667_p0 = scmp.lt.s32.totalorder %s6065_s14, %s6065_s14 }
 0x74d   : > { %p7661_p1 = scmp.ne.s32.totalorder %s6065_s14, %s7660_s20  ;;  %p7668_p2 = scmp.lt.s32.totalorder %s7660_s20, %s7660_s20 }
 0x74f   : > { %p7662_p4 = pnand %p7661_p1, %p7243_p12  ;;  %p7669_p3 = por %p7668_p2, %p7667_p0 }
 0x751   : > { %p7663_p9 = pneg %p7662_p4 }
 0x753   : > { %p7670_p10 = pnand %p7669_p3, %p7663_p9 }
 0x755   : > { %7673 = shalt.err (!%p7670_p10)
}
 0x756   : > { %s7767_s21 = smov 128   ;;  %s7768_s30 = smov 8  }
 0x757   : > { %7220 = dma.vmem_to_hbm [thread:$0]  (%p7243_p12), %s6065_s14, 16384, %s10592_s5, [#allocation6], %s7767_s21, %s7767_s21, %s7768_s30  }
 0x758   : > { %s7769_s9 = smov [#allocation11]  }
 0x759   : > { %s6077_s10 = sshll.u32 %s7769_s9, 4  ;;  %s6078_s10 = int_to_ptr.vmem [resolvable:$true] %s6077_s10 }
 0x75a   : > { %s7684_s8 = scalar_lea.vmem %s6078_s10, 2048  ;;  %p7691_p8 = scmp.lt.s32.totalorder %s6078_s10, %s6078_s10 }
 0x75b   : > { %p7685_p7 = scmp.ne.s32.totalorder %s6078_s10, %s7684_s8  ;;  %p7692_p11 = scmp.lt.s32.totalorder %s7684_s8, %s7684_s8 }
 0x75d   : > { %p7686_p5 = pnand %p7685_p7, %p7243_p12  ;;  %p7693_p13 = por %p7692_p11, %p7691_p8 }
 0x75f   : > { %p7687_p6 = pneg %p7686_p5 }
 0x761   : > { %p7694_p1 = pnand %p7693_p13, %p7687_p6 }
 0x763   : > { %7697 = shalt.err (!%p7694_p1)
}
 0x764   : > { %7222 = dma.vmem_to_hbm [thread:$0]  (%p7243_p12), %s6078_s10, 2048, %s10593_s6, [#allocation12], %s7767_s21, %s7767_s21, %s7768_s30  }
 0x765   : > { %7733 = dma.done.wait (%p7243_p12), [#allocation6], 16384  }
 0x766   : > { %7735 = vsyncadd (%p7243_p12), [#allocation6], 4294950912 }
 0x767   : > { %7737 = dma.done.wait (%p7243_p12), [#allocation12], 2048  }
 0x768   : > { %7739 = vsyncadd (%p7243_p12), [#allocation12], 4294965248 }
 0x769 PF: > { %p20_p4 = scmp.ge.s32.totalorder %s7871_s19, 4   ;;  %s10882_s21 = smov %s7746_s22 }
 0x76a   : > { %s10883_s22 = smov %s7750_s23  ;;  %s10884_s23 = smov %s7880_s28 }
 0x76b   : > { %s10885_s24 = smov %s7871_s19  ;;  %22 = sbr.rel (!%p20_p4) target bundleno = 6 (0x6), region = 102 }
 0x770   :  { %6097 = vsyncpa [#allocation5], 1 }
 0x771   :  { %6099 = vsyncpa [#allocation5 + $0x1], 1 }
 0x772   :  { %6100 = vsyncpa [#allocation8], 1 }
 0x773   :  { %6101 = vsyncpa [#allocation6], 1 }
 0x774   :  { %6103 = vsyncpa [#allocation6 + $0x1], 1 }
 0x775   :  { %6104 = vsyncpa [#allocation12], 1 }

</bundles_post_ra>
